<compile_context>
chip_gen: v7x
topology: tpu7x:2x2x1
jax: 0.10.0
libtpu: 0.0.40
codegen_flags: <defaults>
</compile_context>

<pallas_src>
import functools
import numpy as np

import jax
import jax.numpy as jnp
from jax.experimental import pallas as pl
from jax.experimental.pallas import tpu as pltpu

LANE = 128        # TPU lane width; time is laid out as (rows, LANE)
PAD_ROWS = 8      # zero history rows prepended; supports delays < PAD_ROWS*LANE


def _parallel_cheby_kernel(order, delays, rows,
                           w_re_ref, w_im_ref,   # SMEM scalar prefetch (NB*order*order,)
                           x_re_ref, x_im_ref,   # (PAD_ROWS + Rp, LANE) resident planes
                           y_ref):               # (rows, 2*LANE) fused [re | im] slab
    t0 = pl.multiple_of(pl.program_id(1) * rows, rows)
    lane_idx = jax.lax.broadcasted_iota(jnp.int32, (rows, LANE), 1)

    # Load each needed row offset directly from the VMEM plane (vld slots are
    # idle in this VALU-bound kernel); memoize so shared offsets load once.
    blocks = {}

    def row_block(ref, tag, off):
        key = (tag, off)
        if key not in blocks:
            blocks[key] = ref[pl.ds(t0 + off, rows), :]
        return blocks[key]

    # Deduplicated delayed signals x(t - d): aligned row blocks + static lane
    # rotation (pltpu.roll) + lane-mask select.  Delays are compile-time ints.
    delayed = {}

    def delayed_pair(d):
        if d in delayed:
            return delayed[d]
        q, r = divmod(d, LANE)
        hi_re = row_block(x_re_ref, "re", PAD_ROWS - q)
        hi_im = row_block(x_im_ref, "im", PAD_ROWS - q)
        if r == 0:
            pair = (hi_re, hi_im)
        else:
            lo_re = row_block(x_re_ref, "re", PAD_ROWS - q - 1)
            lo_im = row_block(x_im_ref, "im", PAD_ROWS - q - 1)
            take_hi = lane_idx >= r
            pair = (jnp.where(take_hi, pltpu.roll(hi_re, shift=r, axis=1),
                              pltpu.roll(lo_re, shift=r, axis=1)),
                    jnp.where(take_hi, pltpu.roll(hi_im, shift=r, axis=1),
                              pltpu.roll(lo_im, shift=r, axis=1)))
        delayed[d] = pair
        return pair

    # Deduplicated envelopes + Chebyshev bases: cheb[d][k] == T_k(|x(t-d)|).
    # Entry 0 is None since T_0 == 1 (handled implicitly below).
    cheb = {}
    for d in sorted({dd for br in delays for dd in br[1:]}):
        dr, di = delayed_pair(d)
        a = jnp.sqrt(dr * dr + di * di)
        Ts = [None] * order
        if order > 1:
            Ts[1] = a
        for k in range(2, order):
            prev2 = Ts[k - 2] if (k - 2) >= 1 else 1.0
            Ts[k] = 2.0 * a * Ts[k - 1] - prev2
        cheb[d] = Ts

    # Merge branches that share d_out: accumulate their f's first, then do a
    # single complex multiply by x(t - d_out) per unique output delay.
    groups = {}
    for j, (d_out, d1, d2) in enumerate(delays):
        groups.setdefault(d_out, []).append((j, d1, d2))

    acc_re = None
    acc_im = None
    for d_out in sorted(groups):
        f_re = None
        f_im = None
        for j, d1, d2 in groups[d_out]:
            T1 = cheb[d1]
            T2 = cheb[d2]
            # Separable expansion: f_j = sum_k T_k(a1) * (sum_l W[j,k,l] T_l(a2)),
            # SMEM scalar weights folded directly into the inner sum.
            for k in range(order):
                base = (j * order + k) * order
                g_re = w_re_ref[base]          # l == 0 term (T_0 == 1)
                g_im = w_im_ref[base]
                for l in range(1, order):
                    g_re = g_re + w_re_ref[base + l] * T2[l]
                    g_im = g_im + w_im_ref[base + l] * T2[l]
                if k > 0:                      # T_0(a1) == 1
                    g_re = T1[k] * g_re
                    g_im = T1[k] * g_im
                f_re = g_re if f_re is None else f_re + g_re
                f_im = g_im if f_im is None else f_im + g_im
        xr, xi = delayed_pair(d_out)
        br_re = xr * f_re - xi * f_im
        br_im = xr * f_im + xi * f_re
        acc_re = br_re if acc_re is None else acc_re + br_re
        acc_im = br_im if acc_im is None else acc_im + br_im

    # Fused lane-dense output slab: lanes [0,128) = real, [128,256) = imag.
    y_ref[:, :LANE] = acc_re
    y_ref[:, LANE:] = acc_im


def _pick_rows_per_step(n_rows, batch, rows_per_step):
    """Tile height: a multiple of 8 (full (8,128) vregs, unmasked stores);
    shrunk only to keep >= 2 grid steps along time when batch == 1 so both
    v7x TensorCores get work."""
    s = max(8, (rows_per_step // 8) * 8)
    if batch == 1:
        while s > 8 and -(-n_rows // s) < 2:
            s = max(8, s - 8)
    return s


def parallel_cheby2d_forward(x, weights, delays, order, rows_per_step=32):
    """x: (B, C, T) complex64 (channel 0 is used); weights: (NB, order, order)
    complex64.  Returns (B, 1, T - 2*(NB//2)) complex64."""
    B, C, T = x.shape
    nb = len(delays)
    assert nb >= 1 and order >= 1
    max_d = max(max(br) for br in delays)
    assert max_d < PAD_ROWS * LANE, "delay exceeds supported history window"

    # Time tiling: rows of 128 samples, host-zero-padded up to a multiple of
    # the tile height S.  Perf/legality independent of T's factorisation.
    R = -(-T // LANE)
    S = _pick_rows_per_step(R, B, rows_per_step)
    Rp = -(-R // S) * S
    Tp = Rp * LANE

    xs = x[:, 0, :]
    x_re = jnp.real(xs).astype(jnp.float32)
    x_im = jnp.imag(xs).astype(jnp.float32)
    head = jnp.zeros((B, PAD_ROWS * LANE), jnp.float32)
    tail = jnp.zeros((B, Tp - T), jnp.float32)
    xp_re = jnp.concatenate([head, x_re, tail], axis=1).reshape(B, PAD_ROWS + Rp, LANE)
    xp_im = jnp.concatenate([head, x_im, tail], axis=1).reshape(B, PAD_ROWS + Rp, LANE)

    w_re = jnp.real(weights).astype(jnp.float32).reshape(-1)
    w_im = jnp.imag(weights).astype(jnp.float32).reshape(-1)

    # Input planes stay fully VMEM-resident per batch element: constant block
    # index along the time axis => one HBM->VMEM DMA per plane per batch
    # element.  Do NOT make this index_map depend on `t` (it would re-DMA the
    # whole plane every time step).
    in_spec = pl.BlockSpec((None, PAD_ROWS + Rp, LANE), lambda b, t, *_: (b, 0, 0))
    # Single fused lane-dense output slab ([re | im] concatenated on lanes).
    out_spec = pl.BlockSpec((None, S, 2 * LANE), lambda b, t, *_: (b, t, 0))

    # VMEM budget: ~2 planes x 2 pipeline buffers of the resident input plus
    # small output tiles; raise the scoped limit explicitly for long records
    # (the v5e scoped default is only ~16 MiB).
    est_vmem = 4 * LANE * (2 * 2 * (PAD_ROWS + Rp) + 2 * 2 * 2 * S) + (1 << 20)
    cp_kwargs = dict(dimension_semantics=("parallel", "parallel"))
    if est_vmem > 16 * 1024 * 1024:
        cp_kwargs["vmem_limit_bytes"] = int(min(est_vmem, 100 * 1024 * 1024))

    kernel = functools.partial(
        _parallel_cheby_kernel, order, tuple(tuple(br) for br in delays), S)

    y = pl.pallas_call(
        kernel,
        out_shape=jax.ShapeDtypeStruct((B, Rp, 2 * LANE), jnp.float32),
        grid_spec=pltpu.PrefetchScalarGridSpec(
            num_scalar_prefetch=2,                 # w_re, w_im -> SMEM
            grid=(B, Rp // S),                     # batch outer, time inner
            in_specs=[in_spec, in_spec],
            out_specs=out_spec),
        compiler_params=pltpu.CompilerParams(**cp_kwargs),
    )(w_re, w_im, xp_re, xp_im)

    y_re = y[:, :, :LANE].reshape(B, Tp)[:, :T]
    y_im = y[:, :, LANE:].reshape(B, Tp)[:, :T]
    out = jax.lax.complex(y_re, y_im)[:, None, :]
    trans_len = nb // 2
    if trans_len > 0:
        out = out[..., trans_len:-trans_len]
    return out


# ----------------------------- pure-JAX reference -----------------------------

def _delay_signal(x, d):
    """Causal integer delay with zero padding. x: (B, T)."""
    if d == 0:
        return x
    pad = jnp.zeros((x.shape[0], d), dtype=x.dtype)
    return jnp.concatenate([pad, x[:, : x.shape[1] - d]], axis=1)


def _cheby_polys(a, order):
    polys = [jnp.ones_like(a)]
    if order > 1:
        polys.append(a)
    for _ in range(2, order):
        polys.append(2.0 * a * polys[-1] - polys[-2])
    return polys


def reference_forward(x, weights, delays, order):
    xs = x[:, 0, :]
    nb = len(delays)
    out = jnp.zeros_like(xs)
    for j, d in enumerate(delays):
        xo = _delay_signal(xs, d[0])
        a1 = jnp.abs(_delay_signal(xs, d[1]))
        a2 = jnp.abs(_delay_signal(xs, d[2]))
        t1 = _cheby_polys(a1, order)
        t2 = _cheby_polys(a2, order)
        f = jnp.zeros_like(xs)
        for k in range(order):
            for l in range(order):
                f = f + weights[j, k, l] * (t1[k] * t2[l])
        out = out + xo * f
    out = out[:, None, :]
    trans_len = nb // 2
    if trans_len > 0:
        out = out[..., trans_len:-trans_len]
    return out


if __name__ == "__main__":
    key = jax.random.PRNGKey(0)
    order = 4
    delays = [[0, 0, 1], [1, 0, 2], [2, 1, 0], [3, 2, 1]]   # [d_out, d_in1, d_in2]
    nb = len(delays)

    k1, k2, k3, k4, k5, k6 = jax.random.split(key, 6)
    weights = (0.1 * (jax.random.normal(k3, (nb, order, order), dtype=jnp.float32)
                      + 1j * jax.random.normal(k4, (nb, order, order), dtype=jnp.float32))
               ).astype(jnp.complex64)

    # Case 1: B=2, T a multiple of 128.
    B, T = 2, 4096
    x = (0.5 * (jax.random.normal(k1, (B, 1, T), dtype=jnp.float32)
                + 1j * jax.random.normal(k2, (B, 1, T), dtype=jnp.float32))
         ).astype(jnp.complex64)
    y = jax.block_until_ready(parallel_cheby2d_forward(x, weights, delays, order))
    y_ref = reference_forward(x, weights, delays, order)
    np.testing.assert_allclose(np.asarray(y), np.asarray(y_ref), rtol=1e-3, atol=1e-3)
    assert y.shape == (B, 1, T - 2 * (nb // 2)) and y.dtype == jnp.complex64

    # Case 2: B=1, T not a multiple of 128 (exercises the cdiv/pad tail path
    # and the B==1 tile shrink that keeps the time grid >= 2 steps).
    B2, T2 = 1, 1530
    x2 = (0.5 * (jax.random.normal(k5, (B2, 1, T2), dtype=jnp.float32)
                 + 1j * jax.random.normal(k6, (B2, 1, T2), dtype=jnp.float32))
          ).astype(jnp.complex64)
    y2 = jax.block_until_ready(parallel_cheby2d_forward(x2, weights, delays, order))
    y2_ref = reference_forward(x2, weights, delays, order)
    np.testing.assert_allclose(np.asarray(y2), np.asarray(y2_ref), rtol=1e-3, atol=1e-3)
    assert y2.shape == (B2, 1, T2 - 2 * (nb // 2)) and y2.dtype == jnp.complex64

    print("KERNEL_OK")
</pallas_src>

<mosaic_0001>
module attributes {stable_mosaic.version = 11 : i64} {
  func.func @_parallel_cheby_kernel(%arg0: i32, %arg1: i32, %arg2: memref<64xf32, #tpu.memory_space<smem>>, %arg3: memref<64xf32, #tpu.memory_space<smem>>, %arg4: memref<1x40x128xf32, #tpu.memory_space<vmem>>, %arg5: memref<1x40x128xf32, #tpu.memory_space<vmem>>, %arg6: memref<1x32x256xf32, #tpu.memory_space<vmem>>) attributes {dimension_semantics = [#tpu.dimension_semantics<parallel>, #tpu.dimension_semantics<parallel>], iteration_bounds = array<i64: 2, 1>, scalar_prefetch = 2 : i64, scratch_operands = 0 : i64, tpu.core_type = #tpu.core_type<tc>, window_params = [{transform_indices = @transform_0, window_bounds = array<i64: 1, 40, 128>}, {transform_indices = @transform_1, window_bounds = array<i64: 1, 40, 128>}, {transform_indices = @transform_2, window_bounds = array<i64: 1, 32, 256>}]} {
    %c32_i32 = arith.constant 32 : i32
    %0 = arith.muli %arg1, %c32_i32 : i32
    %1 = tpu.assume_multiple %0, 32 : i32
    %2 = tpu.iota {dimensions = array<i32: 1>} : vector<32x128xi32>
    %c8_i32 = arith.constant 8 : i32
    %3 = arith.addi %1, %c8_i32 : i32
    %c0 = arith.constant 0 : index
    %4 = arith.index_cast %3 : i32 to index
    %c0_0 = arith.constant 0 : index
    %5 = vector.load %arg4[%c0, %4, %c0_0] : memref<1x40x128xf32, #tpu.memory_space<vmem>>, vector<1x32x128xf32>
    %6 = vector.shape_cast %5 : vector<1x32x128xf32> to vector<32x128xf32>
    %c8_i32_1 = arith.constant 8 : i32
    %7 = arith.addi %1, %c8_i32_1 : i32
    %c0_2 = arith.constant 0 : index
    %8 = arith.index_cast %7 : i32 to index
    %c0_3 = arith.constant 0 : index
    %9 = vector.load %arg5[%c0_2, %8, %c0_3] : memref<1x40x128xf32, #tpu.memory_space<vmem>>, vector<1x32x128xf32>
    %10 = vector.shape_cast %9 : vector<1x32x128xf32> to vector<32x128xf32>
    %11 = arith.mulf %6, %6 : vector<32x128xf32>
    %12 = arith.mulf %10, %10 : vector<32x128xf32>
    %13 = arith.addf %11, %12 : vector<32x128xf32>
    %14 = math.sqrt %13 : vector<32x128xf32>
    %cst = arith.constant 2.000000e+00 : f32
    %15 = vector.broadcast %cst : f32 to vector<32x128xf32>
    %16 = arith.mulf %15, %14 : vector<32x128xf32>
    %17 = arith.mulf %16, %14 : vector<32x128xf32>
    %cst_4 = arith.constant 1.000000e+00 : f32
    %18 = vector.broadcast %cst_4 : f32 to vector<32x128xf32>
    %19 = arith.subf %17, %18 : vector<32x128xf32>
    %cst_5 = arith.constant 2.000000e+00 : f32
    %20 = vector.broadcast %cst_5 : f32 to vector<32x128xf32>
    %21 = arith.mulf %20, %14 : vector<32x128xf32>
    %22 = arith.mulf %21, %19 : vector<32x128xf32>
    %23 = arith.subf %22, %14 : vector<32x128xf32>
    %c7_i32 = arith.constant 7 : i32
    %24 = arith.addi %1, %c7_i32 : i32
    %c0_6 = arith.constant 0 : index
    %25 = arith.index_cast %24 : i32 to index
    %c0_7 = arith.constant 0 : index
    %26 = vector.load %arg4[%c0_6, %25, %c0_7] : memref<1x40x128xf32, #tpu.memory_space<vmem>>, vector<1x32x128xf32>
    %27 = vector.shape_cast %26 : vector<1x32x128xf32> to vector<32x128xf32>
    %c7_i32_8 = arith.constant 7 : i32
    %28 = arith.addi %1, %c7_i32_8 : i32
    %c0_9 = arith.constant 0 : index
    %29 = arith.index_cast %28 : i32 to index
    %c0_10 = arith.constant 0 : index
    %30 = vector.load %arg5[%c0_9, %29, %c0_10] : memref<1x40x128xf32, #tpu.memory_space<vmem>>, vector<1x32x128xf32>
    %31 = vector.shape_cast %30 : vector<1x32x128xf32> to vector<32x128xf32>
    %c1_i32 = arith.constant 1 : i32
    %32 = vector.broadcast %c1_i32 : i32 to vector<32x128xi32>
    %33 = arith.cmpi sge, %2, %32 : vector<32x128xi32>
    %c1_i32_11 = arith.constant 1 : i32
    %34 = tpu.dynamic_rotate %6 by %c1_i32_11 dim 1 : vector<32x128xf32>, i32 -> vector<32x128xf32>
    %c1_i32_12 = arith.constant 1 : i32
    %35 = tpu.dynamic_rotate %27 by %c1_i32_12 dim 1 : vector<32x128xf32>, i32 -> vector<32x128xf32>
    %36 = arith.select %33, %34, %35 : vector<32x128xi1>, vector<32x128xf32>
    %c1_i32_13 = arith.constant 1 : i32
    %37 = tpu.dynamic_rotate %10 by %c1_i32_13 dim 1 : vector<32x128xf32>, i32 -> vector<32x128xf32>
    %c1_i32_14 = arith.constant 1 : i32
    %38 = tpu.dynamic_rotate %31 by %c1_i32_14 dim 1 : vector<32x128xf32>, i32 -> vector<32x128xf32>
    %39 = arith.select %33, %37, %38 : vector<32x128xi1>, vector<32x128xf32>
    %40 = arith.mulf %36, %36 : vector<32x128xf32>
    %41 = arith.mulf %39, %39 : vector<32x128xf32>
    %42 = arith.addf %40, %41 : vector<32x128xf32>
    %43 = math.sqrt %42 : vector<32x128xf32>
    %cst_15 = arith.constant 2.000000e+00 : f32
    %44 = vector.broadcast %cst_15 : f32 to vector<32x128xf32>
    %45 = arith.mulf %44, %43 : vector<32x128xf32>
    %46 = arith.mulf %45, %43 : vector<32x128xf32>
    %cst_16 = arith.constant 1.000000e+00 : f32
    %47 = vector.broadcast %cst_16 : f32 to vector<32x128xf32>
    %48 = arith.subf %46, %47 : vector<32x128xf32>
    %cst_17 = arith.constant 2.000000e+00 : f32
    %49 = vector.broadcast %cst_17 : f32 to vector<32x128xf32>
    %50 = arith.mulf %49, %43 : vector<32x128xf32>
    %51 = arith.mulf %50, %48 : vector<32x128xf32>
    %52 = arith.subf %51, %43 : vector<32x128xf32>
    %c2_i32 = arith.constant 2 : i32
    %53 = vector.broadcast %c2_i32 : i32 to vector<32x128xi32>
    %54 = arith.cmpi sge, %2, %53 : vector<32x128xi32>
    %c2_i32_18 = arith.constant 2 : i32
    %55 = tpu.dynamic_rotate %6 by %c2_i32_18 dim 1 : vector<32x128xf32>, i32 -> vector<32x128xf32>
    %c2_i32_19 = arith.constant 2 : i32
    %56 = tpu.dynamic_rotate %27 by %c2_i32_19 dim 1 : vector<32x128xf32>, i32 -> vector<32x128xf32>
    %57 = arith.select %54, %55, %56 : vector<32x128xi1>, vector<32x128xf32>
    %c2_i32_20 = arith.constant 2 : i32
    %58 = tpu.dynamic_rotate %10 by %c2_i32_20 dim 1 : vector<32x128xf32>, i32 -> vector<32x128xf32>
    %c2_i32_21 = arith.constant 2 : i32
    %59 = tpu.dynamic_rotate %31 by %c2_i32_21 dim 1 : vector<32x128xf32>, i32 -> vector<32x128xf32>
    %60 = arith.select %54, %58, %59 : vector<32x128xi1>, vector<32x128xf32>
    %61 = arith.mulf %57, %57 : vector<32x128xf32>
    %62 = arith.mulf %60, %60 : vector<32x128xf32>
    %63 = arith.addf %61, %62 : vector<32x128xf32>
    %64 = math.sqrt %63 : vector<32x128xf32>
    %cst_22 = arith.constant 2.000000e+00 : f32
    %65 = vector.broadcast %cst_22 : f32 to vector<32x128xf32>
    %66 = arith.mulf %65, %64 : vector<32x128xf32>
    %67 = arith.mulf %66, %64 : vector<32x128xf32>
    %cst_23 = arith.constant 1.000000e+00 : f32
    %68 = vector.broadcast %cst_23 : f32 to vector<32x128xf32>
    %69 = arith.subf %67, %68 : vector<32x128xf32>
    %cst_24 = arith.constant 2.000000e+00 : f32
    %70 = vector.broadcast %cst_24 : f32 to vector<32x128xf32>
    %71 = arith.mulf %70, %64 : vector<32x128xf32>
    %72 = arith.mulf %71, %69 : vector<32x128xf32>
    %73 = arith.subf %72, %64 : vector<32x128xf32>
    %c0_25 = arith.constant 0 : index
    %74 = memref.load %arg2[%c0_25] : memref<64xf32, #tpu.memory_space<smem>>
    %c0_26 = arith.constant 0 : index
    %75 = memref.load %arg3[%c0_26] : memref<64xf32, #tpu.memory_space<smem>>
    %c1 = arith.constant 1 : index
    %76 = memref.load %arg2[%c1] : memref<64xf32, #tpu.memory_space<smem>>
    %77 = vector.broadcast %76 : f32 to vector<32x128xf32>
    %78 = arith.mulf %77, %43 : vector<32x128xf32>
    %79 = vector.broadcast %74 : f32 to vector<32x128xf32>
    %80 = arith.addf %79, %78 : vector<32x128xf32>
    %c1_27 = arith.constant 1 : index
    %81 = memref.load %arg3[%c1_27] : memref<64xf32, #tpu.memory_space<smem>>
    %82 = vector.broadcast %81 : f32 to vector<32x128xf32>
    %83 = arith.mulf %82, %43 : vector<32x128xf32>
    %84 = vector.broadcast %75 : f32 to vector<32x128xf32>
    %85 = arith.addf %84, %83 : vector<32x128xf32>
    %c2 = arith.constant 2 : index
    %86 = memref.load %arg2[%c2] : memref<64xf32, #tpu.memory_space<smem>>
    %87 = vector.broadcast %86 : f32 to vector<32x128xf32>
    %88 = arith.mulf %87, %48 : vector<32x128xf32>
    %89 = arith.addf %80, %88 : vector<32x128xf32>
    %c2_28 = arith.constant 2 : index
    %90 = memref.load %arg3[%c2_28] : memref<64xf32, #tpu.memory_space<smem>>
    %91 = vector.broadcast %90 : f32 to vector<32x128xf32>
    %92 = arith.mulf %91, %48 : vector<32x128xf32>
    %93 = arith.addf %85, %92 : vector<32x128xf32>
    %c3 = arith.constant 3 : index
    %94 = memref.load %arg2[%c3] : memref<64xf32, #tpu.memory_space<smem>>
    %95 = vector.broadcast %94 : f32 to vector<32x128xf32>
    %96 = arith.mulf %95, %52 : vector<32x128xf32>
    %97 = arith.addf %89, %96 : vector<32x128xf32>
    %c3_29 = arith.constant 3 : index
    %98 = memref.load %arg3[%c3_29] : memref<64xf32, #tpu.memory_space<smem>>
    %99 = vector.broadcast %98 : f32 to vector<32x128xf32>
    %100 = arith.mulf %99, %52 : vector<32x128xf32>
    %101 = arith.addf %93, %100 : vector<32x128xf32>
    %c4 = arith.constant 4 : index
    %102 = memref.load %arg2[%c4] : memref<64xf32, #tpu.memory_space<smem>>
    %c4_30 = arith.constant 4 : index
    %103 = memref.load %arg3[%c4_30] : memref<64xf32, #tpu.memory_space<smem>>
    %c5 = arith.constant 5 : index
    %104 = memref.load %arg2[%c5] : memref<64xf32, #tpu.memory_space<smem>>
    %105 = vector.broadcast %104 : f32 to vector<32x128xf32>
    %106 = arith.mulf %105, %43 : vector<32x128xf32>
    %107 = vector.broadcast %102 : f32 to vector<32x128xf32>
    %108 = arith.addf %107, %106 : vector<32x128xf32>
    %c5_31 = arith.constant 5 : index
    %109 = memref.load %arg3[%c5_31] : memref<64xf32, #tpu.memory_space<smem>>
    %110 = vector.broadcast %109 : f32 to vector<32x128xf32>
    %111 = arith.mulf %110, %43 : vector<32x128xf32>
    %112 = vector.broadcast %103 : f32 to vector<32x128xf32>
    %113 = arith.addf %112, %111 : vector<32x128xf32>
    %c6 = arith.constant 6 : index
    %114 = memref.load %arg2[%c6] : memref<64xf32, #tpu.memory_space<smem>>
    %115 = vector.broadcast %114 : f32 to vector<32x128xf32>
    %116 = arith.mulf %115, %48 : vector<32x128xf32>
    %117 = arith.addf %108, %116 : vector<32x128xf32>
    %c6_32 = arith.constant 6 : index
    %118 = memref.load %arg3[%c6_32] : memref<64xf32, #tpu.memory_space<smem>>
    %119 = vector.broadcast %118 : f32 to vector<32x128xf32>
    %120 = arith.mulf %119, %48 : vector<32x128xf32>
    %121 = arith.addf %113, %120 : vector<32x128xf32>
    %c7 = arith.constant 7 : index
    %122 = memref.load %arg2[%c7] : memref<64xf32, #tpu.memory_space<smem>>
    %123 = vector.broadcast %122 : f32 to vector<32x128xf32>
    %124 = arith.mulf %123, %52 : vector<32x128xf32>
    %125 = arith.addf %117, %124 : vector<32x128xf32>
    %c7_33 = arith.constant 7 : index
    %126 = memref.load %arg3[%c7_33] : memref<64xf32, #tpu.memory_space<smem>>
    %127 = vector.broadcast %126 : f32 to vector<32x128xf32>
    %128 = arith.mulf %127, %52 : vector<32x128xf32>
    %129 = arith.addf %121, %128 : vector<32x128xf32>
    %130 = arith.mulf %14, %125 : vector<32x128xf32>
    %131 = arith.mulf %14, %129 : vector<32x128xf32>
    %132 = arith.addf %97, %130 : vector<32x128xf32>
    %133 = arith.addf %101, %131 : vector<32x128xf32>
    %c8 = arith.constant 8 : index
    %134 = memref.load %arg2[%c8] : memref<64xf32, #tpu.memory_space<smem>>
    %c8_34 = arith.constant 8 : index
    %135 = memref.load %arg3[%c8_34] : memref<64xf32, #tpu.memory_space<smem>>
    %c9 = arith.constant 9 : index
    %136 = memref.load %arg2[%c9] : memref<64xf32, #tpu.memory_space<smem>>
    %137 = vector.broadcast %136 : f32 to vector<32x128xf32>
    %138 = arith.mulf %137, %43 : vector<32x128xf32>
    %139 = vector.broadcast %134 : f32 to vector<32x128xf32>
    %140 = arith.addf %139, %138 : vector<32x128xf32>
    %c9_35 = arith.constant 9 : index
    %141 = memref.load %arg3[%c9_35] : memref<64xf32, #tpu.memory_space<smem>>
    %142 = vector.broadcast %141 : f32 to vector<32x128xf32>
    %143 = arith.mulf %142, %43 : vector<32x128xf32>
    %144 = vector.broadcast %135 : f32 to vector<32x128xf32>
    %145 = arith.addf %144, %143 : vector<32x128xf32>
    %c10 = arith.constant 10 : index
    %146 = memref.load %arg2[%c10] : memref<64xf32, #tpu.memory_space<smem>>
    %147 = vector.broadcast %146 : f32 to vector<32x128xf32>
    %148 = arith.mulf %147, %48 : vector<32x128xf32>
    %149 = arith.addf %140, %148 : vector<32x128xf32>
    %c10_36 = arith.constant 10 : index
    %150 = memref.load %arg3[%c10_36] : memref<64xf32, #tpu.memory_space<smem>>
    %151 = vector.broadcast %150 : f32 to vector<32x128xf32>
    %152 = arith.mulf %151, %48 : vector<32x128xf32>
    %153 = arith.addf %145, %152 : vector<32x128xf32>
    %c11 = arith.constant 11 : index
    %154 = memref.load %arg2[%c11] : memref<64xf32, #tpu.memory_space<smem>>
    %155 = vector.broadcast %154 : f32 to vector<32x128xf32>
    %156 = arith.mulf %155, %52 : vector<32x128xf32>
    %157 = arith.addf %149, %156 : vector<32x128xf32>
    %c11_37 = arith.constant 11 : index
    %158 = memref.load %arg3[%c11_37] : memref<64xf32, #tpu.memory_space<smem>>
    %159 = vector.broadcast %158 : f32 to vector<32x128xf32>
    %160 = arith.mulf %159, %52 : vector<32x128xf32>
    %161 = arith.addf %153, %160 : vector<32x128xf32>
    %162 = arith.mulf %19, %157 : vector<32x128xf32>
    %163 = arith.mulf %19, %161 : vector<32x128xf32>
    %164 = arith.addf %132, %162 : vector<32x128xf32>
    %165 = arith.addf %133, %163 : vector<32x128xf32>
    %c12 = arith.constant 12 : index
    %166 = memref.load %arg2[%c12] : memref<64xf32, #tpu.memory_space<smem>>
    %c12_38 = arith.constant 12 : index
    %167 = memref.load %arg3[%c12_38] : memref<64xf32, #tpu.memory_space<smem>>
    %c13 = arith.constant 13 : index
    %168 = memref.load %arg2[%c13] : memref<64xf32, #tpu.memory_space<smem>>
    %169 = vector.broadcast %168 : f32 to vector<32x128xf32>
    %170 = arith.mulf %169, %43 : vector<32x128xf32>
    %171 = vector.broadcast %166 : f32 to vector<32x128xf32>
    %172 = arith.addf %171, %170 : vector<32x128xf32>
    %c13_39 = arith.constant 13 : index
    %173 = memref.load %arg3[%c13_39] : memref<64xf32, #tpu.memory_space<smem>>
    %174 = vector.broadcast %173 : f32 to vector<32x128xf32>
    %175 = arith.mulf %174, %43 : vector<32x128xf32>
    %176 = vector.broadcast %167 : f32 to vector<32x128xf32>
    %177 = arith.addf %176, %175 : vector<32x128xf32>
    %c14 = arith.constant 14 : index
    %178 = memref.load %arg2[%c14] : memref<64xf32, #tpu.memory_space<smem>>
    %179 = vector.broadcast %178 : f32 to vector<32x128xf32>
    %180 = arith.mulf %179, %48 : vector<32x128xf32>
    %181 = arith.addf %172, %180 : vector<32x128xf32>
    %c14_40 = arith.constant 14 : index
    %182 = memref.load %arg3[%c14_40] : memref<64xf32, #tpu.memory_space<smem>>
    %183 = vector.broadcast %182 : f32 to vector<32x128xf32>
    %184 = arith.mulf %183, %48 : vector<32x128xf32>
    %185 = arith.addf %177, %184 : vector<32x128xf32>
    %c15 = arith.constant 15 : index
    %186 = memref.load %arg2[%c15] : memref<64xf32, #tpu.memory_space<smem>>
    %187 = vector.broadcast %186 : f32 to vector<32x128xf32>
    %188 = arith.mulf %187, %52 : vector<32x128xf32>
    %189 = arith.addf %181, %188 : vector<32x128xf32>
    %c15_41 = arith.constant 15 : index
    %190 = memref.load %arg3[%c15_41] : memref<64xf32, #tpu.memory_space<smem>>
    %191 = vector.broadcast %190 : f32 to vector<32x128xf32>
    %192 = arith.mulf %191, %52 : vector<32x128xf32>
    %193 = arith.addf %185, %192 : vector<32x128xf32>
    %194 = arith.mulf %23, %189 : vector<32x128xf32>
    %195 = arith.mulf %23, %193 : vector<32x128xf32>
    %196 = arith.addf %164, %194 : vector<32x128xf32>
    %197 = arith.addf %165, %195 : vector<32x128xf32>
    %198 = arith.mulf %6, %196 : vector<32x128xf32>
    %199 = arith.mulf %10, %197 : vector<32x128xf32>
    %200 = arith.subf %198, %199 : vector<32x128xf32>
    %201 = arith.mulf %6, %197 : vector<32x128xf32>
    %202 = arith.mulf %10, %196 : vector<32x128xf32>
    %203 = arith.addf %201, %202 : vector<32x128xf32>
    %c16 = arith.constant 16 : index
    %204 = memref.load %arg2[%c16] : memref<64xf32, #tpu.memory_space<smem>>
    %c16_42 = arith.constant 16 : index
    %205 = memref.load %arg3[%c16_42] : memref<64xf32, #tpu.memory_space<smem>>
    %c17 = arith.constant 17 : index
    %206 = memref.load %arg2[%c17] : memref<64xf32, #tpu.memory_space<smem>>
    %207 = vector.broadcast %206 : f32 to vector<32x128xf32>
    %208 = arith.mulf %207, %64 : vector<32x128xf32>
    %209 = vector.broadcast %204 : f32 to vector<32x128xf32>
    %210 = arith.addf %209, %208 : vector<32x128xf32>
    %c17_43 = arith.constant 17 : index
    %211 = memref.load %arg3[%c17_43] : memref<64xf32, #tpu.memory_space<smem>>
    %212 = vector.broadcast %211 : f32 to vector<32x128xf32>
    %213 = arith.mulf %212, %64 : vector<32x128xf32>
    %214 = vector.broadcast %205 : f32 to vector<32x128xf32>
    %215 = arith.addf %214, %213 : vector<32x128xf32>
    %c18 = arith.constant 18 : index
    %216 = memref.load %arg2[%c18] : memref<64xf32, #tpu.memory_space<smem>>
    %217 = vector.broadcast %216 : f32 to vector<32x128xf32>
    %218 = arith.mulf %217, %69 : vector<32x128xf32>
    %219 = arith.addf %210, %218 : vector<32x128xf32>
    %c18_44 = arith.constant 18 : index
    %220 = memref.load %arg3[%c18_44] : memref<64xf32, #tpu.memory_space<smem>>
    %221 = vector.broadcast %220 : f32 to vector<32x128xf32>
    %222 = arith.mulf %221, %69 : vector<32x128xf32>
    %223 = arith.addf %215, %222 : vector<32x128xf32>
    %c19 = arith.constant 19 : index
    %224 = memref.load %arg2[%c19] : memref<64xf32, #tpu.memory_space<smem>>
    %225 = vector.broadcast %224 : f32 to vector<32x128xf32>
    %226 = arith.mulf %225, %73 : vector<32x128xf32>
    %227 = arith.addf %219, %226 : vector<32x128xf32>
    %c19_45 = arith.constant 19 : index
    %228 = memref.load %arg3[%c19_45] : memref<64xf32, #tpu.memory_space<smem>>
    %229 = vector.broadcast %228 : f32 to vector<32x128xf32>
    %230 = arith.mulf %229, %73 : vector<32x128xf32>
    %231 = arith.addf %223, %230 : vector<32x128xf32>
    %c20 = arith.constant 20 : index
    %232 = memref.load %arg2[%c20] : memref<64xf32, #tpu.memory_space<smem>>
    %c20_46 = arith.constant 20 : index
    %233 = memref.load %arg3[%c20_46] : memref<64xf32, #tpu.memory_space<smem>>
    %c21 = arith.constant 21 : index
    %234 = memref.load %arg2[%c21] : memref<64xf32, #tpu.memory_space<smem>>
    %235 = vector.broadcast %234 : f32 to vector<32x128xf32>
    %236 = arith.mulf %235, %64 : vector<32x128xf32>
    %237 = vector.broadcast %232 : f32 to vector<32x128xf32>
    %238 = arith.addf %237, %236 : vector<32x128xf32>
    %c21_47 = arith.constant 21 : index
    %239 = memref.load %arg3[%c21_47] : memref<64xf32, #tpu.memory_space<smem>>
    %240 = vector.broadcast %239 : f32 to vector<32x128xf32>
    %241 = arith.mulf %240, %64 : vector<32x128xf32>
    %242 = vector.broadcast %233 : f32 to vector<32x128xf32>
    %243 = arith.addf %242, %241 : vector<32x128xf32>
    %c22 = arith.constant 22 : index
    %244 = memref.load %arg2[%c22] : memref<64xf32, #tpu.memory_space<smem>>
    %245 = vector.broadcast %244 : f32 to vector<32x128xf32>
    %246 = arith.mulf %245, %69 : vector<32x128xf32>
    %247 = arith.addf %238, %246 : vector<32x128xf32>
    %c22_48 = arith.constant 22 : index
    %248 = memref.load %arg3[%c22_48] : memref<64xf32, #tpu.memory_space<smem>>
    %249 = vector.broadcast %248 : f32 to vector<32x128xf32>
    %250 = arith.mulf %249, %69 : vector<32x128xf32>
    %251 = arith.addf %243, %250 : vector<32x128xf32>
    %c23 = arith.constant 23 : index
    %252 = memref.load %arg2[%c23] : memref<64xf32, #tpu.memory_space<smem>>
    %253 = vector.broadcast %252 : f32 to vector<32x128xf32>
    %254 = arith.mulf %253, %73 : vector<32x128xf32>
    %255 = arith.addf %247, %254 : vector<32x128xf32>
    %c23_49 = arith.constant 23 : index
    %256 = memref.load %arg3[%c23_49] : memref<64xf32, #tpu.memory_space<smem>>
    %257 = vector.broadcast %256 : f32 to vector<32x128xf32>
    %258 = arith.mulf %257, %73 : vector<32x128xf32>
    %259 = arith.addf %251, %258 : vector<32x128xf32>
    %260 = arith.mulf %14, %255 : vector<32x128xf32>
    %261 = arith.mulf %14, %259 : vector<32x128xf32>
    %262 = arith.addf %227, %260 : vector<32x128xf32>
    %263 = arith.addf %231, %261 : vector<32x128xf32>
    %c24 = arith.constant 24 : index
    %264 = memref.load %arg2[%c24] : memref<64xf32, #tpu.memory_space<smem>>
    %c24_50 = arith.constant 24 : index
    %265 = memref.load %arg3[%c24_50] : memref<64xf32, #tpu.memory_space<smem>>
    %c25 = arith.constant 25 : index
    %266 = memref.load %arg2[%c25] : memref<64xf32, #tpu.memory_space<smem>>
    %267 = vector.broadcast %266 : f32 to vector<32x128xf32>
    %268 = arith.mulf %267, %64 : vector<32x128xf32>
    %269 = vector.broadcast %264 : f32 to vector<32x128xf32>
    %270 = arith.addf %269, %268 : vector<32x128xf32>
    %c25_51 = arith.constant 25 : index
    %271 = memref.load %arg3[%c25_51] : memref<64xf32, #tpu.memory_space<smem>>
    %272 = vector.broadcast %271 : f32 to vector<32x128xf32>
    %273 = arith.mulf %272, %64 : vector<32x128xf32>
    %274 = vector.broadcast %265 : f32 to vector<32x128xf32>
    %275 = arith.addf %274, %273 : vector<32x128xf32>
    %c26 = arith.constant 26 : index
    %276 = memref.load %arg2[%c26] : memref<64xf32, #tpu.memory_space<smem>>
    %277 = vector.broadcast %276 : f32 to vector<32x128xf32>
    %278 = arith.mulf %277, %69 : vector<32x128xf32>
    %279 = arith.addf %270, %278 : vector<32x128xf32>
    %c26_52 = arith.constant 26 : index
    %280 = memref.load %arg3[%c26_52] : memref<64xf32, #tpu.memory_space<smem>>
    %281 = vector.broadcast %280 : f32 to vector<32x128xf32>
    %282 = arith.mulf %281, %69 : vector<32x128xf32>
    %283 = arith.addf %275, %282 : vector<32x128xf32>
    %c27 = arith.constant 27 : index
    %284 = memref.load %arg2[%c27] : memref<64xf32, #tpu.memory_space<smem>>
    %285 = vector.broadcast %284 : f32 to vector<32x128xf32>
    %286 = arith.mulf %285, %73 : vector<32x128xf32>
    %287 = arith.addf %279, %286 : vector<32x128xf32>
    %c27_53 = arith.constant 27 : index
    %288 = memref.load %arg3[%c27_53] : memref<64xf32, #tpu.memory_space<smem>>
    %289 = vector.broadcast %288 : f32 to vector<32x128xf32>
    %290 = arith.mulf %289, %73 : vector<32x128xf32>
    %291 = arith.addf %283, %290 : vector<32x128xf32>
    %292 = arith.mulf %19, %287 : vector<32x128xf32>
    %293 = arith.mulf %19, %291 : vector<32x128xf32>
    %294 = arith.addf %262, %292 : vector<32x128xf32>
    %295 = arith.addf %263, %293 : vector<32x128xf32>
    %c28 = arith.constant 28 : index
    %296 = memref.load %arg2[%c28] : memref<64xf32, #tpu.memory_space<smem>>
    %c28_54 = arith.constant 28 : index
    %297 = memref.load %arg3[%c28_54] : memref<64xf32, #tpu.memory_space<smem>>
    %c29 = arith.constant 29 : index
    %298 = memref.load %arg2[%c29] : memref<64xf32, #tpu.memory_space<smem>>
    %299 = vector.broadcast %298 : f32 to vector<32x128xf32>
    %300 = arith.mulf %299, %64 : vector<32x128xf32>
    %301 = vector.broadcast %296 : f32 to vector<32x128xf32>
    %302 = arith.addf %301, %300 : vector<32x128xf32>
    %c29_55 = arith.constant 29 : index
    %303 = memref.load %arg3[%c29_55] : memref<64xf32, #tpu.memory_space<smem>>
    %304 = vector.broadcast %303 : f32 to vector<32x128xf32>
    %305 = arith.mulf %304, %64 : vector<32x128xf32>
    %306 = vector.broadcast %297 : f32 to vector<32x128xf32>
    %307 = arith.addf %306, %305 : vector<32x128xf32>
    %c30 = arith.constant 30 : index
    %308 = memref.load %arg2[%c30] : memref<64xf32, #tpu.memory_space<smem>>
    %309 = vector.broadcast %308 : f32 to vector<32x128xf32>
    %310 = arith.mulf %309, %69 : vector<32x128xf32>
    %311 = arith.addf %302, %310 : vector<32x128xf32>
    %c30_56 = arith.constant 30 : index
    %312 = memref.load %arg3[%c30_56] : memref<64xf32, #tpu.memory_space<smem>>
    %313 = vector.broadcast %312 : f32 to vector<32x128xf32>
    %314 = arith.mulf %313, %69 : vector<32x128xf32>
    %315 = arith.addf %307, %314 : vector<32x128xf32>
    %c31 = arith.constant 31 : index
    %316 = memref.load %arg2[%c31] : memref<64xf32, #tpu.memory_space<smem>>
    %317 = vector.broadcast %316 : f32 to vector<32x128xf32>
    %318 = arith.mulf %317, %73 : vector<32x128xf32>
    %319 = arith.addf %311, %318 : vector<32x128xf32>
    %c31_57 = arith.constant 31 : index
    %320 = memref.load %arg3[%c31_57] : memref<64xf32, #tpu.memory_space<smem>>
    %321 = vector.broadcast %320 : f32 to vector<32x128xf32>
    %322 = arith.mulf %321, %73 : vector<32x128xf32>
    %323 = arith.addf %315, %322 : vector<32x128xf32>
    %324 = arith.mulf %23, %319 : vector<32x128xf32>
    %325 = arith.mulf %23, %323 : vector<32x128xf32>
    %326 = arith.addf %294, %324 : vector<32x128xf32>
    %327 = arith.addf %295, %325 : vector<32x128xf32>
    %328 = arith.mulf %36, %326 : vector<32x128xf32>
    %329 = arith.mulf %39, %327 : vector<32x128xf32>
    %330 = arith.subf %328, %329 : vector<32x128xf32>
    %331 = arith.mulf %36, %327 : vector<32x128xf32>
    %332 = arith.mulf %39, %326 : vector<32x128xf32>
    %333 = arith.addf %331, %332 : vector<32x128xf32>
    %334 = arith.addf %200, %330 : vector<32x128xf32>
    %335 = arith.addf %203, %333 : vector<32x128xf32>
    %c32 = arith.constant 32 : index
    %336 = memref.load %arg2[%c32] : memref<64xf32, #tpu.memory_space<smem>>
    %c32_58 = arith.constant 32 : index
    %337 = memref.load %arg3[%c32_58] : memref<64xf32, #tpu.memory_space<smem>>
    %c33 = arith.constant 33 : index
    %338 = memref.load %arg2[%c33] : memref<64xf32, #tpu.memory_space<smem>>
    %339 = vector.broadcast %338 : f32 to vector<32x128xf32>
    %340 = arith.mulf %339, %14 : vector<32x128xf32>
    %341 = vector.broadcast %336 : f32 to vector<32x128xf32>
    %342 = arith.addf %341, %340 : vector<32x128xf32>
    %c33_59 = arith.constant 33 : index
    %343 = memref.load %arg3[%c33_59] : memref<64xf32, #tpu.memory_space<smem>>
    %344 = vector.broadcast %343 : f32 to vector<32x128xf32>
    %345 = arith.mulf %344, %14 : vector<32x128xf32>
    %346 = vector.broadcast %337 : f32 to vector<32x128xf32>
    %347 = arith.addf %346, %345 : vector<32x128xf32>
    %c34 = arith.constant 34 : index
    %348 = memref.load %arg2[%c34] : memref<64xf32, #tpu.memory_space<smem>>
    %349 = vector.broadcast %348 : f32 to vector<32x128xf32>
    %350 = arith.mulf %349, %19 : vector<32x128xf32>
    %351 = arith.addf %342, %350 : vector<32x128xf32>
    %c34_60 = arith.constant 34 : index
    %352 = memref.load %arg3[%c34_60] : memref<64xf32, #tpu.memory_space<smem>>
    %353 = vector.broadcast %352 : f32 to vector<32x128xf32>
    %354 = arith.mulf %353, %19 : vector<32x128xf32>
    %355 = arith.addf %347, %354 : vector<32x128xf32>
    %c35 = arith.constant 35 : index
    %356 = memref.load %arg2[%c35] : memref<64xf32, #tpu.memory_space<smem>>
    %357 = vector.broadcast %356 : f32 to vector<32x128xf32>
    %358 = arith.mulf %357, %23 : vector<32x128xf32>
    %359 = arith.addf %351, %358 : vector<32x128xf32>
    %c35_61 = arith.constant 35 : index
    %360 = memref.load %arg3[%c35_61] : memref<64xf32, #tpu.memory_space<smem>>
    %361 = vector.broadcast %360 : f32 to vector<32x128xf32>
    %362 = arith.mulf %361, %23 : vector<32x128xf32>
    %363 = arith.addf %355, %362 : vector<32x128xf32>
    %c36 = arith.constant 36 : index
    %364 = memref.load %arg2[%c36] : memref<64xf32, #tpu.memory_space<smem>>
    %c36_62 = arith.constant 36 : index
    %365 = memref.load %arg3[%c36_62] : memref<64xf32, #tpu.memory_space<smem>>
    %c37 = arith.constant 37 : index
    %366 = memref.load %arg2[%c37] : memref<64xf32, #tpu.memory_space<smem>>
    %367 = vector.broadcast %366 : f32 to vector<32x128xf32>
    %368 = arith.mulf %367, %14 : vector<32x128xf32>
    %369 = vector.broadcast %364 : f32 to vector<32x128xf32>
    %370 = arith.addf %369, %368 : vector<32x128xf32>
    %c37_63 = arith.constant 37 : index
    %371 = memref.load %arg3[%c37_63] : memref<64xf32, #tpu.memory_space<smem>>
    %372 = vector.broadcast %371 : f32 to vector<32x128xf32>
    %373 = arith.mulf %372, %14 : vector<32x128xf32>
    %374 = vector.broadcast %365 : f32 to vector<32x128xf32>
    %375 = arith.addf %374, %373 : vector<32x128xf32>
    %c38 = arith.constant 38 : index
    %376 = memref.load %arg2[%c38] : memref<64xf32, #tpu.memory_space<smem>>
    %377 = vector.broadcast %376 : f32 to vector<32x128xf32>
    %378 = arith.mulf %377, %19 : vector<32x128xf32>
    %379 = arith.addf %370, %378 : vector<32x128xf32>
    %c38_64 = arith.constant 38 : index
    %380 = memref.load %arg3[%c38_64] : memref<64xf32, #tpu.memory_space<smem>>
    %381 = vector.broadcast %380 : f32 to vector<32x128xf32>
    %382 = arith.mulf %381, %19 : vector<32x128xf32>
    %383 = arith.addf %375, %382 : vector<32x128xf32>
    %c39 = arith.constant 39 : index
    %384 = memref.load %arg2[%c39] : memref<64xf32, #tpu.memory_space<smem>>
    %385 = vector.broadcast %384 : f32 to vector<32x128xf32>
    %386 = arith.mulf %385, %23 : vector<32x128xf32>
    %387 = arith.addf %379, %386 : vector<32x128xf32>
    %c39_65 = arith.constant 39 : index
    %388 = memref.load %arg3[%c39_65] : memref<64xf32, #tpu.memory_space<smem>>
    %389 = vector.broadcast %388 : f32 to vector<32x128xf32>
    %390 = arith.mulf %389, %23 : vector<32x128xf32>
    %391 = arith.addf %383, %390 : vector<32x128xf32>
    %392 = arith.mulf %43, %387 : vector<32x128xf32>
    %393 = arith.mulf %43, %391 : vector<32x128xf32>
    %394 = arith.addf %359, %392 : vector<32x128xf32>
    %395 = arith.addf %363, %393 : vector<32x128xf32>
    %c40 = arith.constant 40 : index
    %396 = memref.load %arg2[%c40] : memref<64xf32, #tpu.memory_space<smem>>
    %c40_66 = arith.constant 40 : index
    %397 = memref.load %arg3[%c40_66] : memref<64xf32, #tpu.memory_space<smem>>
    %c41 = arith.constant 41 : index
    %398 = memref.load %arg2[%c41] : memref<64xf32, #tpu.memory_space<smem>>
    %399 = vector.broadcast %398 : f32 to vector<32x128xf32>
    %400 = arith.mulf %399, %14 : vector<32x128xf32>
    %401 = vector.broadcast %396 : f32 to vector<32x128xf32>
    %402 = arith.addf %401, %400 : vector<32x128xf32>
    %c41_67 = arith.constant 41 : index
    %403 = memref.load %arg3[%c41_67] : memref<64xf32, #tpu.memory_space<smem>>
    %404 = vector.broadcast %403 : f32 to vector<32x128xf32>
    %405 = arith.mulf %404, %14 : vector<32x128xf32>
    %406 = vector.broadcast %397 : f32 to vector<32x128xf32>
    %407 = arith.addf %406, %405 : vector<32x128xf32>
    %c42 = arith.constant 42 : index
    %408 = memref.load %arg2[%c42] : memref<64xf32, #tpu.memory_space<smem>>
    %409 = vector.broadcast %408 : f32 to vector<32x128xf32>
    %410 = arith.mulf %409, %19 : vector<32x128xf32>
    %411 = arith.addf %402, %410 : vector<32x128xf32>
    %c42_68 = arith.constant 42 : index
    %412 = memref.load %arg3[%c42_68] : memref<64xf32, #tpu.memory_space<smem>>
    %413 = vector.broadcast %412 : f32 to vector<32x128xf32>
    %414 = arith.mulf %413, %19 : vector<32x128xf32>
    %415 = arith.addf %407, %414 : vector<32x128xf32>
    %c43 = arith.constant 43 : index
    %416 = memref.load %arg2[%c43] : memref<64xf32, #tpu.memory_space<smem>>
    %417 = vector.broadcast %416 : f32 to vector<32x128xf32>
    %418 = arith.mulf %417, %23 : vector<32x128xf32>
    %419 = arith.addf %411, %418 : vector<32x128xf32>
    %c43_69 = arith.constant 43 : index
    %420 = memref.load %arg3[%c43_69] : memref<64xf32, #tpu.memory_space<smem>>
    %421 = vector.broadcast %420 : f32 to vector<32x128xf32>
    %422 = arith.mulf %421, %23 : vector<32x128xf32>
    %423 = arith.addf %415, %422 : vector<32x128xf32>
    %424 = arith.mulf %48, %419 : vector<32x128xf32>
    %425 = arith.mulf %48, %423 : vector<32x128xf32>
    %426 = arith.addf %394, %424 : vector<32x128xf32>
    %427 = arith.addf %395, %425 : vector<32x128xf32>
    %c44 = arith.constant 44 : index
    %428 = memref.load %arg2[%c44] : memref<64xf32, #tpu.memory_space<smem>>
    %c44_70 = arith.constant 44 : index
    %429 = memref.load %arg3[%c44_70] : memref<64xf32, #tpu.memory_space<smem>>
    %c45 = arith.constant 45 : index
    %430 = memref.load %arg2[%c45] : memref<64xf32, #tpu.memory_space<smem>>
    %431 = vector.broadcast %430 : f32 to vector<32x128xf32>
    %432 = arith.mulf %431, %14 : vector<32x128xf32>
    %433 = vector.broadcast %428 : f32 to vector<32x128xf32>
    %434 = arith.addf %433, %432 : vector<32x128xf32>
    %c45_71 = arith.constant 45 : index
    %435 = memref.load %arg3[%c45_71] : memref<64xf32, #tpu.memory_space<smem>>
    %436 = vector.broadcast %435 : f32 to vector<32x128xf32>
    %437 = arith.mulf %436, %14 : vector<32x128xf32>
    %438 = vector.broadcast %429 : f32 to vector<32x128xf32>
    %439 = arith.addf %438, %437 : vector<32x128xf32>
    %c46 = arith.constant 46 : index
    %440 = memref.load %arg2[%c46] : memref<64xf32, #tpu.memory_space<smem>>
    %441 = vector.broadcast %440 : f32 to vector<32x128xf32>
    %442 = arith.mulf %441, %19 : vector<32x128xf32>
    %443 = arith.addf %434, %442 : vector<32x128xf32>
    %c46_72 = arith.constant 46 : index
    %444 = memref.load %arg3[%c46_72] : memref<64xf32, #tpu.memory_space<smem>>
    %445 = vector.broadcast %444 : f32 to vector<32x128xf32>
    %446 = arith.mulf %445, %19 : vector<32x128xf32>
    %447 = arith.addf %439, %446 : vector<32x128xf32>
    %c47 = arith.constant 47 : index
    %448 = memref.load %arg2[%c47] : memref<64xf32, #tpu.memory_space<smem>>
    %449 = vector.broadcast %448 : f32 to vector<32x128xf32>
    %450 = arith.mulf %449, %23 : vector<32x128xf32>
    %451 = arith.addf %443, %450 : vector<32x128xf32>
    %c47_73 = arith.constant 47 : index
    %452 = memref.load %arg3[%c47_73] : memref<64xf32, #tpu.memory_space<smem>>
    %453 = vector.broadcast %452 : f32 to vector<32x128xf32>
    %454 = arith.mulf %453, %23 : vector<32x128xf32>
    %455 = arith.addf %447, %454 : vector<32x128xf32>
    %456 = arith.mulf %52, %451 : vector<32x128xf32>
    %457 = arith.mulf %52, %455 : vector<32x128xf32>
    %458 = arith.addf %426, %456 : vector<32x128xf32>
    %459 = arith.addf %427, %457 : vector<32x128xf32>
    %460 = arith.mulf %57, %458 : vector<32x128xf32>
    %461 = arith.mulf %60, %459 : vector<32x128xf32>
    %462 = arith.subf %460, %461 : vector<32x128xf32>
    %463 = arith.mulf %57, %459 : vector<32x128xf32>
    %464 = arith.mulf %60, %458 : vector<32x128xf32>
    %465 = arith.addf %463, %464 : vector<32x128xf32>
    %466 = arith.addf %334, %462 : vector<32x128xf32>
    %467 = arith.addf %335, %465 : vector<32x128xf32>
    %c48 = arith.constant 48 : index
    %468 = memref.load %arg2[%c48] : memref<64xf32, #tpu.memory_space<smem>>
    %c48_74 = arith.constant 48 : index
    %469 = memref.load %arg3[%c48_74] : memref<64xf32, #tpu.memory_space<smem>>
    %c49 = arith.constant 49 : index
    %470 = memref.load %arg2[%c49] : memref<64xf32, #tpu.memory_space<smem>>
    %471 = vector.broadcast %470 : f32 to vector<32x128xf32>
    %472 = arith.mulf %471, %43 : vector<32x128xf32>
    %473 = vector.broadcast %468 : f32 to vector<32x128xf32>
    %474 = arith.addf %473, %472 : vector<32x128xf32>
    %c49_75 = arith.constant 49 : index
    %475 = memref.load %arg3[%c49_75] : memref<64xf32, #tpu.memory_space<smem>>
    %476 = vector.broadcast %475 : f32 to vector<32x128xf32>
    %477 = arith.mulf %476, %43 : vector<32x128xf32>
    %478 = vector.broadcast %469 : f32 to vector<32x128xf32>
    %479 = arith.addf %478, %477 : vector<32x128xf32>
    %c50 = arith.constant 50 : index
    %480 = memref.load %arg2[%c50] : memref<64xf32, #tpu.memory_space<smem>>
    %481 = vector.broadcast %480 : f32 to vector<32x128xf32>
    %482 = arith.mulf %481, %48 : vector<32x128xf32>
    %483 = arith.addf %474, %482 : vector<32x128xf32>
    %c50_76 = arith.constant 50 : index
    %484 = memref.load %arg3[%c50_76] : memref<64xf32, #tpu.memory_space<smem>>
    %485 = vector.broadcast %484 : f32 to vector<32x128xf32>
    %486 = arith.mulf %485, %48 : vector<32x128xf32>
    %487 = arith.addf %479, %486 : vector<32x128xf32>
    %c51 = arith.constant 51 : index
    %488 = memref.load %arg2[%c51] : memref<64xf32, #tpu.memory_space<smem>>
    %489 = vector.broadcast %488 : f32 to vector<32x128xf32>
    %490 = arith.mulf %489, %52 : vector<32x128xf32>
    %491 = arith.addf %483, %490 : vector<32x128xf32>
    %c51_77 = arith.constant 51 : index
    %492 = memref.load %arg3[%c51_77] : memref<64xf32, #tpu.memory_space<smem>>
    %493 = vector.broadcast %492 : f32 to vector<32x128xf32>
    %494 = arith.mulf %493, %52 : vector<32x128xf32>
    %495 = arith.addf %487, %494 : vector<32x128xf32>
    %c52 = arith.constant 52 : index
    %496 = memref.load %arg2[%c52] : memref<64xf32, #tpu.memory_space<smem>>
    %c52_78 = arith.constant 52 : index
    %497 = memref.load %arg3[%c52_78] : memref<64xf32, #tpu.memory_space<smem>>
    %c53 = arith.constant 53 : index
    %498 = memref.load %arg2[%c53] : memref<64xf32, #tpu.memory_space<smem>>
    %499 = vector.broadcast %498 : f32 to vector<32x128xf32>
    %500 = arith.mulf %499, %43 : vector<32x128xf32>
    %501 = vector.broadcast %496 : f32 to vector<32x128xf32>
    %502 = arith.addf %501, %500 : vector<32x128xf32>
    %c53_79 = arith.constant 53 : index
    %503 = memref.load %arg3[%c53_79] : memref<64xf32, #tpu.memory_space<smem>>
    %504 = vector.broadcast %503 : f32 to vector<32x128xf32>
    %505 = arith.mulf %504, %43 : vector<32x128xf32>
    %506 = vector.broadcast %497 : f32 to vector<32x128xf32>
    %507 = arith.addf %506, %505 : vector<32x128xf32>
    %c54 = arith.constant 54 : index
    %508 = memref.load %arg2[%c54] : memref<64xf32, #tpu.memory_space<smem>>
    %509 = vector.broadcast %508 : f32 to vector<32x128xf32>
    %510 = arith.mulf %509, %48 : vector<32x128xf32>
    %511 = arith.addf %502, %510 : vector<32x128xf32>
    %c54_80 = arith.constant 54 : index
    %512 = memref.load %arg3[%c54_80] : memref<64xf32, #tpu.memory_space<smem>>
    %513 = vector.broadcast %512 : f32 to vector<32x128xf32>
    %514 = arith.mulf %513, %48 : vector<32x128xf32>
    %515 = arith.addf %507, %514 : vector<32x128xf32>
    %c55 = arith.constant 55 : index
    %516 = memref.load %arg2[%c55] : memref<64xf32, #tpu.memory_space<smem>>
    %517 = vector.broadcast %516 : f32 to vector<32x128xf32>
    %518 = arith.mulf %517, %52 : vector<32x128xf32>
    %519 = arith.addf %511, %518 : vector<32x128xf32>
    %c55_81 = arith.constant 55 : index
    %520 = memref.load %arg3[%c55_81] : memref<64xf32, #tpu.memory_space<smem>>
    %521 = vector.broadcast %520 : f32 to vector<32x128xf32>
    %522 = arith.mulf %521, %52 : vector<32x128xf32>
    %523 = arith.addf %515, %522 : vector<32x128xf32>
    %524 = arith.mulf %64, %519 : vector<32x128xf32>
    %525 = arith.mulf %64, %523 : vector<32x128xf32>
    %526 = arith.addf %491, %524 : vector<32x128xf32>
    %527 = arith.addf %495, %525 : vector<32x128xf32>
    %c56 = arith.constant 56 : index
    %528 = memref.load %arg2[%c56] : memref<64xf32, #tpu.memory_space<smem>>
    %c56_82 = arith.constant 56 : index
    %529 = memref.load %arg3[%c56_82] : memref<64xf32, #tpu.memory_space<smem>>
    %c57 = arith.constant 57 : index
    %530 = memref.load %arg2[%c57] : memref<64xf32, #tpu.memory_space<smem>>
    %531 = vector.broadcast %530 : f32 to vector<32x128xf32>
    %532 = arith.mulf %531, %43 : vector<32x128xf32>
    %533 = vector.broadcast %528 : f32 to vector<32x128xf32>
    %534 = arith.addf %533, %532 : vector<32x128xf32>
    %c57_83 = arith.constant 57 : index
    %535 = memref.load %arg3[%c57_83] : memref<64xf32, #tpu.memory_space<smem>>
    %536 = vector.broadcast %535 : f32 to vector<32x128xf32>
    %537 = arith.mulf %536, %43 : vector<32x128xf32>
    %538 = vector.broadcast %529 : f32 to vector<32x128xf32>
    %539 = arith.addf %538, %537 : vector<32x128xf32>
    %c58 = arith.constant 58 : index
    %540 = memref.load %arg2[%c58] : memref<64xf32, #tpu.memory_space<smem>>
    %541 = vector.broadcast %540 : f32 to vector<32x128xf32>
    %542 = arith.mulf %541, %48 : vector<32x128xf32>
    %543 = arith.addf %534, %542 : vector<32x128xf32>
    %c58_84 = arith.constant 58 : index
    %544 = memref.load %arg3[%c58_84] : memref<64xf32, #tpu.memory_space<smem>>
    %545 = vector.broadcast %544 : f32 to vector<32x128xf32>
    %546 = arith.mulf %545, %48 : vector<32x128xf32>
    %547 = arith.addf %539, %546 : vector<32x128xf32>
    %c59 = arith.constant 59 : index
    %548 = memref.load %arg2[%c59] : memref<64xf32, #tpu.memory_space<smem>>
    %549 = vector.broadcast %548 : f32 to vector<32x128xf32>
    %550 = arith.mulf %549, %52 : vector<32x128xf32>
    %551 = arith.addf %543, %550 : vector<32x128xf32>
    %c59_85 = arith.constant 59 : index
    %552 = memref.load %arg3[%c59_85] : memref<64xf32, #tpu.memory_space<smem>>
    %553 = vector.broadcast %552 : f32 to vector<32x128xf32>
    %554 = arith.mulf %553, %52 : vector<32x128xf32>
    %555 = arith.addf %547, %554 : vector<32x128xf32>
    %556 = arith.mulf %69, %551 : vector<32x128xf32>
    %557 = arith.mulf %69, %555 : vector<32x128xf32>
    %558 = arith.addf %526, %556 : vector<32x128xf32>
    %559 = arith.addf %527, %557 : vector<32x128xf32>
    %c60 = arith.constant 60 : index
    %560 = memref.load %arg2[%c60] : memref<64xf32, #tpu.memory_space<smem>>
    %c60_86 = arith.constant 60 : index
    %561 = memref.load %arg3[%c60_86] : memref<64xf32, #tpu.memory_space<smem>>
    %c61 = arith.constant 61 : index
    %562 = memref.load %arg2[%c61] : memref<64xf32, #tpu.memory_space<smem>>
    %563 = vector.broadcast %562 : f32 to vector<32x128xf32>
    %564 = arith.mulf %563, %43 : vector<32x128xf32>
    %565 = vector.broadcast %560 : f32 to vector<32x128xf32>
    %566 = arith.addf %565, %564 : vector<32x128xf32>
    %c61_87 = arith.constant 61 : index
    %567 = memref.load %arg3[%c61_87] : memref<64xf32, #tpu.memory_space<smem>>
    %568 = vector.broadcast %567 : f32 to vector<32x128xf32>
    %569 = arith.mulf %568, %43 : vector<32x128xf32>
    %570 = vector.broadcast %561 : f32 to vector<32x128xf32>
    %571 = arith.addf %570, %569 : vector<32x128xf32>
    %c62 = arith.constant 62 : index
    %572 = memref.load %arg2[%c62] : memref<64xf32, #tpu.memory_space<smem>>
    %573 = vector.broadcast %572 : f32 to vector<32x128xf32>
    %574 = arith.mulf %573, %48 : vector<32x128xf32>
    %575 = arith.addf %566, %574 : vector<32x128xf32>
    %c62_88 = arith.constant 62 : index
    %576 = memref.load %arg3[%c62_88] : memref<64xf32, #tpu.memory_space<smem>>
    %577 = vector.broadcast %576 : f32 to vector<32x128xf32>
    %578 = arith.mulf %577, %48 : vector<32x128xf32>
    %579 = arith.addf %571, %578 : vector<32x128xf32>
    %c63 = arith.constant 63 : index
    %580 = memref.load %arg2[%c63] : memref<64xf32, #tpu.memory_space<smem>>
    %581 = vector.broadcast %580 : f32 to vector<32x128xf32>
    %582 = arith.mulf %581, %52 : vector<32x128xf32>
    %583 = arith.addf %575, %582 : vector<32x128xf32>
    %c63_89 = arith.constant 63 : index
    %584 = memref.load %arg3[%c63_89] : memref<64xf32, #tpu.memory_space<smem>>
    %585 = vector.broadcast %584 : f32 to vector<32x128xf32>
    %586 = arith.mulf %585, %52 : vector<32x128xf32>
    %587 = arith.addf %579, %586 : vector<32x128xf32>
    %588 = arith.mulf %73, %583 : vector<32x128xf32>
    %589 = arith.mulf %73, %587 : vector<32x128xf32>
    %590 = arith.addf %558, %588 : vector<32x128xf32>
    %591 = arith.addf %559, %589 : vector<32x128xf32>
    %c3_i32 = arith.constant 3 : i32
    %592 = vector.broadcast %c3_i32 : i32 to vector<32x128xi32>
    %593 = arith.cmpi sge, %2, %592 : vector<32x128xi32>
    %c3_i32_90 = arith.constant 3 : i32
    %594 = tpu.dynamic_rotate %6 by %c3_i32_90 dim 1 : vector<32x128xf32>, i32 -> vector<32x128xf32>
    %c3_i32_91 = arith.constant 3 : i32
    %595 = tpu.dynamic_rotate %27 by %c3_i32_91 dim 1 : vector<32x128xf32>, i32 -> vector<32x128xf32>
    %596 = arith.select %593, %594, %595 : vector<32x128xi1>, vector<32x128xf32>
    %c3_i32_92 = arith.constant 3 : i32
    %597 = tpu.dynamic_rotate %10 by %c3_i32_92 dim 1 : vector<32x128xf32>, i32 -> vector<32x128xf32>
    %c3_i32_93 = arith.constant 3 : i32
    %598 = tpu.dynamic_rotate %31 by %c3_i32_93 dim 1 : vector<32x128xf32>, i32 -> vector<32x128xf32>
    %599 = arith.select %593, %597, %598 : vector<32x128xi1>, vector<32x128xf32>
    %600 = arith.mulf %596, %590 : vector<32x128xf32>
    %601 = arith.mulf %599, %591 : vector<32x128xf32>
    %602 = arith.subf %600, %601 : vector<32x128xf32>
    %603 = arith.mulf %596, %591 : vector<32x128xf32>
    %604 = arith.mulf %599, %590 : vector<32x128xf32>
    %605 = arith.addf %603, %604 : vector<32x128xf32>
    %606 = arith.addf %466, %602 : vector<32x128xf32>
    %607 = arith.addf %467, %605 : vector<32x128xf32>
    %c0_94 = arith.constant 0 : index
    %c0_95 = arith.constant 0 : index
    %c0_96 = arith.constant 0 : index
    %608 = vector.load %arg6[%c0_94, %c0_95, %c0_96] : memref<1x32x256xf32, #tpu.memory_space<vmem>>, vector<1x32x128xf32>
    %609 = vector.shape_cast %608 : vector<1x32x128xf32> to vector<32x128xf32>
    %610 = vector.shape_cast %606 : vector<32x128xf32> to vector<1x32x128xf32>
    tpu.vector_store %arg6[%c0_94, %c0_95, %c0_96], %610 {strides = array<i32>} : memref<1x32x256xf32, #tpu.memory_space<vmem>>, vector<1x32x128xf32>,
    %c0_97 = arith.constant 0 : index
    %c0_98 = arith.constant 0 : index
    %c128 = arith.constant 128 : index
    %611 = vector.load %arg6[%c0_97, %c0_98, %c128] : memref<1x32x256xf32, #tpu.memory_space<vmem>>, vector<1x32x128xf32>
    %612 = vector.shape_cast %611 : vector<1x32x128xf32> to vector<32x128xf32>
    %613 = vector.shape_cast %607 : vector<32x128xf32> to vector<1x32x128xf32>
    tpu.vector_store %arg6[%c0_97, %c0_98, %c128], %613 {strides = array<i32>} : memref<1x32x256xf32, #tpu.memory_space<vmem>>, vector<1x32x128xf32>,
    return
  }
  func.func @transform_0(%arg0: i32, %arg1: i32, %arg2: memref<64xf32, #tpu.memory_space<smem>>, %arg3: memref<64xf32, #tpu.memory_space<smem>>) -> (i32, i32, i32) {
    %c0_i32 = arith.constant 0 : i32
    %c0_i32_0 = arith.constant 0 : i32
    %c0_i32_1 = arith.constant 0 : i32
    return %arg0, %c0_i32, %c0_i32_0 : i32, i32, i32
  }
  func.func @transform_1(%arg0: i32, %arg1: i32, %arg2: memref<64xf32, #tpu.memory_space<smem>>, %arg3: memref<64xf32, #tpu.memory_space<smem>>) -> (i32, i32, i32) {
    %c0_i32 = arith.constant 0 : i32
    %c0_i32_0 = arith.constant 0 : i32
    %c0_i32_1 = arith.constant 0 : i32
    return %arg0, %c0_i32, %c0_i32_0 : i32, i32, i32
  }
  func.func @transform_2(%arg0: i32, %arg1: i32, %arg2: memref<64xf32, #tpu.memory_space<smem>>, %arg3: memref<64xf32, #tpu.memory_space<smem>>) -> (i32, i32, i32) {
    %c0_i32 = arith.constant 0 : i32
    %c0_i32_0 = arith.constant 0 : i32
    return %arg0, %arg1, %c0_i32 : i32, i32, i32
  }
}

</mosaic_0001>

<bundles_post_ra>
// kernel: tpu_custom_call.1
= control target key start
LH: loop header
LB: loop body
LE: loop exit
PB: predicated region body
PF: predicated region fallthrough
CT: control target
= control target key end

     0   :  { %s5355_s0 = inlined_call_operand.hbm [shape: f32[64], index: 0, kind: input, shape index: {}]   ;;  %s5356_s2 = inlined_call_operand.hbm [shape: f32[2,40,128], index: 2, kind: input, shape index: {}]   ;;  %s5357_s3 = inlined_call_operand.hbm [shape: f32[2,40,128], index: 3, kind: input, shape index: {}]   ;;  %s5358_s4 = inlined_call_operand.hbm [shape: f32[2,32,256], index: 4, kind: output, shape index: {}]   ;;  %s5359_s1 = inlined_call_operand.vmem [shape: f32[64], index: 1, kind: input, shape index: {}]  }
   0x1   :  { %5599 = sst [smem:[#allocation129_spill]] %s5356_s2  ;;  %s2316_s17 = scalar_lea.hbm %s5355_s0, 16 }
   0x2   :  { %5600 = sst [smem:[#allocation130_spill]] %s5357_s3  ;;  %p2317_p0 = scmp.ne.s32.totalorder %s5355_s0, %s2316_s17 }
   0x3   :  { %5601 = sst [smem:[#allocation131_spill]] %s5358_s4  ;;  %p2320_p1 = scmp.lt.u32.totalorder %s2316_s17, %s5355_s0 }
   0x5   :  { %p2322_p2 = pnand %p2320_p1, %p2317_p0 }
   0x7   :  { %2325 = shalt.err (!%p2322_p2)  }
   0x8   :  { %s2488_s22 = smov [#allocation3]   ;;  %s11_s27 = sshll.u32 %s5359_s1, 4  ;;  %s12_s27 = int_to_ptr.vmem [resolvable:$true] %s11_s27 }
   0x9   :  { %10 = dma.hbm_to_smem %s5355_s0, 16, %s2488_s22, [#allocation2] }
   0xa   :  { %s2326_s28 = scalar_lea.vmem %s12_s27, 16  ;;  %p2331_p4 = scmp.lt.s32.totalorder %s12_s27, %s12_s27 }
   0xb   :  { %p2327_p3 = scmp.ne.s32.totalorder %s12_s27, %s2326_s28  ;;  %p2332_p5 = scmp.lt.s32.totalorder %s2326_s28, %s2326_s28 }
   0xd   :  { %p2333_p6 = por %p2332_p5, %p2331_p4 }
   0xf   :  { %p2334_p7 = pnand %p2333_p6, %p2327_p3 }
  0x11   :  { %2337 = shalt.err (!%p2334_p7)  }
  0x12   :  { %s2489_s29 = smov [#allocation4]  }
  0x13   :  { %14 = dma.vmem_to_smem %s12_s27, 16, %s2489_s29, [#allocation2] }
  0x14   :  { %2450 = dma.done.wait [#allocation2], 32 }
  0x15   :  { %2451 = vsyncadd [#allocation2], 4294967264 }
  0x16   :  { %16 = sfence }
  0x17   :  { %17 = vsyncpa [#allocation6], 0 }
  0x18   :  { %19 = vsyncpa [#allocation6 + $0x1], 0 }
  0x19   :  { %20 = vsyncpa [#allocation9], 0 }
  0x1a   :  { %22 = vsyncpa [#allocation9 + $0x1], 0 }
  0x1b   :  { %23 = vsyncpa [#allocation7], 0 }
  0x1c   :  { %25 = vsyncpa [#allocation7 + $0x1], 0  ;;  %s2540_s0 = smov 0   ;;  %s2542_s1 = smov 0  }
  0x1d   :  { %s2544_s30 = smov 0   ;;  %s2546_s5 = smov 0  }
  0x1e   :  { %s2548_s6 = smov 0   ;;  %s2550_s7 = smov 0  }
  0x1f LB: > { %5602 = sst [smem:[#allocation15_spill]] %s2466_s0  ;;  %s2035_s8 = sadd.s32 4294967295, %s2486_s7   ;;  %s2486_s7 = sphi %s2550_s7, %s31_s7   ;;  %s2482_s6 = sphi %s2548_s6, %s6133_s6   ;;  %s2478_s5 = sphi %s2546_s5, %s6132_s5   ;;  %s2474_s30 = sphi %s2544_s30, %s6131_s30   ;;  %s2470_s1 = sphi %s2542_s1, %s6130_s1   ;;  %s2466_s0 = sphi %s2540_s0, %s6129_s0  }
  0x20   : > { %5603 = sst [smem:[#allocation16_spill]] %s2470_s1  ;;  %s2036_s9 = sadd.s32 4294967294, %s2486_s7  }
  0x21   : > { %5604 = sst [smem:[#allocation17_spill]] %s2474_s30  ;;  %s43_s10 = sadd.s32 1, %s2482_s6 }
  0x22   : > { %5605 = sst [smem:[#allocation18_spill]] %s2478_s5  ;;  %s50_s11 = sadd.s32 1, %s2474_s30 }
  0x23   : > { %5606 = sst [smem:[#allocation19_spill]] %s2482_s6  ;;  %p45_p8 = scmp.ge.s32.totalorder %s43_s10, 2 }
  0x24   : > { %5607 = sst [smem:[#allocation20_spill]] %s2486_s7  ;;  %p57_p9 = scmp.ne.s32.totalorder %s2474_s30, %s2470_s1 }
  0x25   : > { %p58_p10 = scmp.eq.s32.totalorder %s2486_s7, 0  ;;  %p63_p11 = scmp.ne.s32.totalorder %s2470_s1, %s2466_s0 }
  0x26   : > { %s6135_s10 = smov (%p45_p8, %s43_s10), 0  ;;  %p64_p13 = scmp.eq.s32.totalorder %s2035_s8, 0 }
  0x27   : > { %5608 = sst [smem:[#allocation21_spill]] %s6135_s10  ;;  %p2581_p12 = por %p58_p10, %p57_p9 }
  0x28   : > { %s47_s13 = ssub.s32 %s2482_s6, %s6135_s10  ;;  %p115_p0 = scmp.eq.s32.totalorder %s2035_s8, 1 }
  0x29   : > { %p48_p1 = scmp.eq.s32.totalorder %s47_s13, 0  ;;  %p2587_p2 = por %p64_p13, %p63_p11 }
  0x2a   : > { %p2591_p3 = por %p115_p0, %p57_p9  ;;  %p121_p4 = scmp.eq.s32.totalorder %s2036_s9, 1 }
  0x2b   : > { %s5610_s14 = scalar_select %p2587_p2, 1, 0 }
  0x2c   : > { %s5611_s15 = scalar_select %p2591_p3, 1, 0 }
  0x2d   : > { %s2596_s16 = scalar_select %p48_p1, %s2474_s30, %s50_s11  }
  0x2e   : > { %5612 = sst [smem:[#allocation22_spill]] %s5611_s15  ;;  %p2598_p5 = por %p121_p4, %p63_p11 }
  0x2f   : > { %5613 = sst [smem:[#allocation23_spill]] %s2596_s16  ;;  %p2225_p7 = scmp.lt.s32.totalorder %s2486_s7, 2 }
  0x30   : > { %s5614_s17 = scalar_select %p2598_p5, 1, 0 }
  0x31   : > { %s2605_s18 = sand.u32 1, %s2474_s30   ;;  %s2204_s20 = smul.u32 640, %s2482_s6 }
  0x32   : > { %5615 = sst [smem:[#allocation24_spill]] %s5614_s17  ;;  %s2203_s19 = smul.u32 40, %s2605_s18 }
  0x33   : > { %p2611_p8 = pnand %p2225_p7, %p2581_p12  ;;  %s5617_s2 = sld [smem:[#allocation129_spill]] }
  0x34   : > { %s145_s25 = scalar_lea.vmem [#allocation5], %s2203_s19  ;;  %s142_s27 = scalar_lea.sflag [#allocation6], %s2605_s18 }
  0x35   : > { %s152_s26 = sshll.u32 %s145_s25, 4  ;;  %p2340_p11 = pneg %p2611_p8  ;;  %s2624_s26 = int_to_ptr.vmem [resolvable:$true] %s152_s26 }
  0x39   : > { %s2620_s24 = scalar_lea.hbm %s5617_s2, %s2204_s20  ;;  %s2343_s9 = scalar_lea.hbm %s5617_s2, 1280 }
  0x3a   : > { %s2338_s28 = scalar_lea.hbm %s2620_s24, 640  ;;  %p2344_p0 = scmp.lt.u32.totalorder %s2620_s24, %s5617_s2 }
  0x3b   : > { %p2339_p10 = scmp.ne.s32.totalorder %s2620_s24, %s2338_s28  ;;  %p2345_p1 = scmp.lt.u32.totalorder %s2343_s9, %s2338_s28 }
  0x3c   : > { %p2347_p7 = scmp.lt.u32.totalorder %s2338_s28, %s2620_s24 }
  0x3d   : > { %p2341_p12 = pnand %p2340_p11, %p2339_p10  ;;  %p2346_p4 = por %p2345_p1, %p2344_p0 }
  0x3f   : > { %p2342_p13 = pneg %p2341_p12  ;;  %p2348_p6 = por %p2347_p7, %p2346_p4 }
  0x41   : > { %p2349_p9 = pnand %p2348_p6, %p2342_p13 }
  0x43   : > { %2352 = shalt.err (!%p2349_p9)
}
  0x44   : > { %s2353_s13 = scalar_lea.vmem %s2624_s26, 640  ;;  %s2490_s22 = smov [#allocation5]  }
  0x45   : > { %p2354_p10 = scmp.ne.s32.totalorder %s2624_s26, %s2353_s13  ;;  %s2358_s23 = sshll.u32 %s2490_s22, 4  ;;  %s2359_s23 = int_to_ptr.vmem [resolvable:$false] %s2358_s23 }
  0x46   : > { %s2360_s25 = scalar_lea.vmem %s2359_s23, 1280  ;;  %p2361_p3 = scmp.lt.s32.totalorder %s2624_s26, %s2359_s23 }
  0x47   : > { %p2356_p12 = pnand %p2354_p10, %p2340_p11  ;;  %p2362_p0 = scmp.lt.s32.totalorder %s2360_s25, %s2353_s13 }
  0x49   : > { %p2357_p5 = pneg %p2356_p12  ;;  %p2363_p1 = por %p2362_p0, %p2361_p3 }
  0x4b   : > { %p2364_p4 = pnand %p2363_p1, %p2357_p5 }
  0x4d   : > { %2367 = shalt.err (!%p2364_p4)
}
  0x4e   : > { %s2491_s28 = smov 128   ;;  %s2492_s29 = smov 8  }
  0x4f   : > { %2217 = dma.hbm_to_vmem [thread:$0]  (!%p2611_p8), %s2620_s24, 640, %s2624_s26, %s142_s27, %s2491_s28, %s2491_s28, %s2492_s29  }
  0x50   : > { %p181_p3 = scmp.lt.s32.totalorder %s2486_s7, 3  ;;  %s5618_s3 = sld [smem:[#allocation130_spill]] }
  0x51   : > { %p5619_p5 = scmp.ge.s32.totalorder %s2486_s7, 1  ;;  %s166_s13 = scalar_lea.vmem [#allocation8], %s2203_s19 }
  0x52   : > { %s173_s22 = sshll.u32 %s166_s13, 4  ;;  %s163_s24 = scalar_lea.sflag [#allocation9], %s2605_s18  ;;  %s2674_s22 = int_to_ptr.vmem [resolvable:$true] %s173_s22 }
  0x53   : > { %p2668_p6 = pnand %p5619_p5, %p181_p3 }
  0x56   : > { %s2664_s11 = scalar_lea.hbm %s5618_s3, %s2204_s20  ;;  %s2373_s23 = scalar_lea.hbm %s5618_s3, 1280 }
  0x57   : > { %s2368_s26 = scalar_lea.hbm %s2664_s11, 640  ;;  %p2374_p10 = scmp.lt.u32.totalorder %s2664_s11, %s5618_s3 }
  0x58   : > { %p2369_p9 = scmp.ne.s32.totalorder %s2664_s11, %s2368_s26  ;;  %p2375_p12 = scmp.lt.u32.totalorder %s2373_s23, %s2368_s26 }
  0x59   : > { %p2377_p1 = scmp.lt.u32.totalorder %s2368_s26, %s2664_s11 }
  0x5a   : > { %p2371_p13 = pnand %p2369_p9, %p2340_p11  ;;  %p2376_p0 = por %p2375_p12, %p2374_p10 }
  0x5c   : > { %p2372_p7 = pneg %p2371_p13  ;;  %p2378_p4 = por %p2377_p1, %p2376_p0 }
  0x5e   : > { %p2379_p3 = pnand %p2378_p4, %p2372_p7 }
  0x60   : > { %2382 = shalt.err (!%p2379_p3)
}
  0x61   : > { %s2383_s19 = scalar_lea.vmem %s2674_s22, 640  ;;  %s2493_s9 = smov [#allocation8]  }
  0x62   : > { %p2384_p5 = scmp.ne.s32.totalorder %s2674_s22, %s2383_s19  ;;  %s2388_s13 = sshll.u32 %s2493_s9, 4  ;;  %s2389_s13 = int_to_ptr.vmem [resolvable:$false] %s2388_s13 }
  0x63   : > { %s2390_s20 = scalar_lea.vmem %s2389_s13, 1280  ;;  %p2391_p2 = scmp.lt.s32.totalorder %s2674_s22, %s2389_s13 }
  0x64   : > { %p2386_p9 = pnand %p2384_p5, %p2340_p11  ;;  %p2392_p10 = scmp.lt.s32.totalorder %s2390_s20, %s2383_s19 }
  0x66   : > { %p2387_p13 = pneg %p2386_p9  ;;  %p2393_p12 = por %p2392_p10, %p2391_p2 }
  0x68   : > { %p2394_p0 = pnand %p2393_p12, %p2387_p13 }
  0x6a   : > { %2397 = shalt.err (!%p2394_p0)
}
  0x6b   : > { %2220 = dma.hbm_to_vmem [thread:$0]  (!%p2611_p8), %s2664_s11, 640, %s2674_s22, %s163_s24, %s2491_s28, %s2491_s28, %s2492_s29  }
  0x6c   : > { %185 = sbr.rel (%p2668_p6) target bundleno = 563 (0x233), region = 28 }
  0x73   : > { %s2708_s26 = sand.u32 1, %s2470_s1   ;;  %p5622_p2 = scmp.ne.s32.totalorder %s5610_s14, 0 }
  0x74   : > { %5621 = sst [smem:[#allocation25_spill]] %s2708_s26  ;;  %s2207_s27 = smul.u32 40, %s2708_s26 }
  0x75   : > { %s188_s23 = scalar_lea.sflag [#allocation6], %s2708_s26 }
  0x76   : > { %s2712_s21 = scalar_lea.vmem [#allocation5], %s2207_s27 }
  0x77   : > { %2453 = dma.done.wait (%p5622_p2), %s188_s23, 640  }
  0x78   : > { %2455 = vsyncadd (%p5622_p2), %s188_s23, 4294966656  ;;  %s197_s18 = scalar_lea.sflag [#allocation9], %s2708_s26  ;;  %s2719_s28 = scalar_lea.vmem [#allocation8], %s2207_s27 }
  0x79   : > { %5623 = sst [smem:[#allocation26_spill]] %s2719_s28 }
  0x7a   : > { %2457 = dma.done.wait (%p5622_p2), %s197_s18, 640  }
  0x7b   : > { %2459 = vsyncadd (%p5622_p2), %s197_s18, 4294966656  ;;  %v2726_v0 = vld [vmem:[%s2712_s21 + $0x18] sm:$0xff]  ;;  %v2729_v1 = vld [vmem:[%s2712_s21 + $0x8] sm:$0xff]  ;;  %s2494_s29 = smov 1   ;;  %s2495_s14 = smov 2   ;;  %v228_v51 = vlaneseq }
  0x7c   : > { %317 = vrot.lane.b32.xlu1 %v2726_v0, %s2494_s29  ;;  %313 = vrot.lane.b32.xlu0 %v2729_v1, %s2494_s29  ;;  %v2734_v2 = vld [vmem:[%s2712_s21 + $0x20] sm:$0xff]  ;;  %v2737_v3 = vld [vmem:[%s2712_s21 + $0x10] sm:$0xff]  ;;  %v241_v19 = vmul.f32 %v2729_v1, %v2729_v1  ;;  %v243_v25 = vmul.f32 %v2726_v0, %v2726_v0  ;;  %s2135_s11 = sld [smem:[#allocation3 + $0x21]]  ;;  %s5362_s22 = smov 3  }
  0x7d   : > { %v2742_v4 = vld [vmem:[%s2712_s21 + $0xf] sm:$0xff]  ;;  %v2745_v5 = vld [vmem:[%s2712_s21 + $0x7] sm:$0xff]  ;;  %v2750_v6 = vld [vmem:[%s2712_s21 + $0x1f] sm:$0xff]  ;;  %v242_v16 = vmul.f32 %v2737_v3, %v2737_v3  ;;  %v244_v22 = vmul.f32 %v2734_v2, %v2734_v2  ;;  %s2136_s12 = sld [smem:[#allocation4 + $0x21]]  ;;  %s2850_s24 = sld [smem:[#allocation3 + $0x20]] }
  0x7e   : > { %v2753_v7 = vld [vmem:[%s2712_s21 + $0x17] sm:$0xff]  ;;  %v2758_v8 = vld [vmem:[%s2719_s28 + $0x10] sm:$0xff]  ;;  %v2769_v11 = vld [vmem:[%s2719_s28 + $0x18] sm:$0xff]  ;;  %s2852_s25 = sld [smem:[#allocation3 + $0x22]]  ;;  %s2854_s8 = sld [smem:[#allocation4 + $0x20]] }
  0x7f   : > { %v2761_v9 = vld [vmem:[%s2719_s28 + $0x8] sm:$0xff]  ;;  %v2766_v10 = vld [vmem:[%s2719_s28 + $0x20] sm:$0xff]  ;;  %v2785_v15 = vld [vmem:[%s2719_s28 + $0x17] sm:$0xff]  ;;  %v246_v17 = vmul.f32 %v2758_v8, %v2758_v8  ;;  %v247_v26 = vmul.f32 %v2769_v11, %v2769_v11  ;;  %s2856_s19 = sld [smem:[#allocation4 + $0x22]]  ;;  %s2866_s9 = sld [smem:[#allocation3 + $0x25]] }
  0x80   : > { %319 = vrot.lane.b32.xlu1 %v2734_v2, %s2494_s29  ;;  %315 = vrot.lane.b32.xlu0 %v2737_v3, %s2494_s29  ;;  %v2774_v12 = vld [vmem:[%s2719_s28 + $0xf] sm:$0xff]  ;;  %v2777_v13 = vld [vmem:[%s2719_s28 + $0x7] sm:$0xff]  ;;  %v245_v20 = vmul.f32 %v2761_v9, %v2761_v9  ;;  %v248_v23 = vmul.f32 %v2766_v10, %v2766_v10  ;;  %s2868_s13 = sld [smem:[#allocation4 + $0x25]]  ;;  %s2873_s20 = sld [smem:[#allocation3 + $0x23]] }
  0x81   : > { %v2782_v14 = vld [vmem:[%s2719_s28 + $0x1f] sm:$0xff]  ;;  %v250_v18 = vadd.f32 %v246_v17, %v242_v16  ;;  %v2831_v29 = vadd.f32 %v247_v26, %v243_v25  ;;  %s2877_s27 = sld [smem:[#allocation4 + $0x23]]  ;;  %s2883_s23 = sld [smem:[#allocation3 + $0x24]] }
  0x82   : > { %v249_v21 = vadd.f32 %v245_v20, %v241_v19  ;;  %v2825_v27 = vadd.f32 %v248_v23, %v244_v22  ;;  %v2871_v43 = vstv %s2135_s11  ;;  %s2885_s18 = sld [smem:[#allocation4 + $0x24]]  ;;  %s2909_s11 = sld [smem:[#allocation4 + $0x26]] }
  0x83   : > { %2284 = vrsqrt.f32 %v250_v18  ;;  %vm262_vm0 = vcmp.eq.f32.partialorder %v250_v18, inf  ;;  %v265_v30 = vand.u32 2147483648, %v250_v18  ;;  %vm264_vm1 = vcmp.eq.f32.partialorder %v250_v18, 0.0  ;;  %s2951_s2 = sld [smem:[#allocation3 + $0x2a]]  ;;  %s2963_s10 = sld [smem:[#allocation3 + $0x2b]] }
  0x84   : > { %323 = vrot.lane.b32.xlu1 %v2742_v4, %s2494_s29  ;;  %321 = vrot.lane.b32.xlu0 %v2745_v5, %s2494_s29  ;;  %2286 = vrsqrt.f32 %v249_v21  ;;  %vm255_vm2 = vcmp.eq.f32.partialorder %v249_v21, inf  ;;  %v258_v36 = vand.u32 2147483648, %v249_v21  ;;  %vm257_vm3 = vcmp.eq.f32.partialorder %v249_v21, 0.0  ;;  %s2961_s3 = sld [smem:[#allocation4 + $0x2a]]  ;;  %s2987_s6 = sld [smem:[#allocation3 + $0x2c]] }
  0x85   : > { %2288 = vrsqrt.f32 %v2825_v27  ;;  %vm276_vm4 = vcmp.eq.f32.partialorder %v2825_v27, inf  ;;  %v2875_v44 = vstv %s2136_s12  ;;  %v279_v46 = vand.u32 2147483648, %v2825_v27  ;;  %s2911_s12 = sld [smem:[#allocation3 + $0x27]]  ;;  %s3008_s16 = sld [smem:[#allocation3 + $0x2e]] }
  0x86   : > { %2290 = vrsqrt.f32 %v2831_v29  ;;  %vm278_vm5 = vcmp.eq.f32.partialorder %v2825_v27, 0.0  ;;  %vm269_vm6 = vcmp.eq.f32.partialorder %v2831_v29, inf  ;;  %v2904_v52 = vstv %s2850_s24  ;;  %s2924_s24 = sld [smem:[#allocation3 + $0x28]]  ;;  %s3451_s30 = sld [smem:[#allocation3 + $0xd]] }
  0x87   : > { %v2907_v53 = vstv %s2852_s25  ;;  %v272_v55 = vand.u32 2147483648, %v2831_v29  ;;  %v2917_v56 = vstv %s2854_s8  ;;  %v2920_v57 = vstv %s2856_s19  ;;  %s2935_s25 = sld [smem:[#allocation4 + $0x28]]  ;;  %s2937_s8 = sld [smem:[#allocation4 + $0x29]] }
  0x88   : > { %327 = vrot.lane.b32.xlu1 %v2750_v6, %s2494_s29  ;;  %325 = vrot.lane.b32.xlu0 %v2753_v7, %s2494_s29  ;;  %vm271_vm7 = vcmp.eq.f32.partialorder %v2831_v29, 0.0  ;;  %s5628_s19 = smov 3   ;;  %v2946_v62 = vstv %s2866_s9  ;;  %v2949_v63 = vstv %s2868_s13  ;;  %s2975_s9 = sld [smem:[#allocation3 + $0x2d]] }
  0x89   : > { %s2977_s13 = sld [smem:[#allocation4 + $0x2d]]  ;;  %v3017_v25 = vstv %s2883_s23  ;;  %s3047_s23 = sld [smem:[#allocation3 + $0x2f]] }
  0x8a   : > { %s3453_s1 = sld [smem:[#allocation4 + $0xd]]  ;;  %s3462_s7 = sld [smem:[#allocation3 + $0xe]] }
  0x8b   : > { %s3464_s17 = sld [smem:[#allocation4 + $0xe]]  ;;  %s3476_s0 = sld [smem:[#allocation3 + $0xf]] }
  0x8c   : > { %335 = vrot.lane.b32.xlu1 %v2758_v8, %s2494_s29  ;;  %333 = vrot.lane.b32.xlu0 %v2761_v9, %s2494_s29  ;;  %s3478_s4 = sld [smem:[#allocation4 + $0xf]]  ;;  %s3503_s15 = sld [smem:[#allocation4 + $0x11]] }
  0x8d   : > { %v2285_v24 = vpop.eup %2284  ;;  %s3515_s5 = sld [smem:[#allocation3 + $0x12]]  ;;  %s3531_s28 = sld [smem:[#allocation3 + $0x13]] }
  0x8e   : > { %v261_v28 = vmul.f32 %v2285_v24, %v250_v18  ;;  %v2287_v32 = vpop.eup %2286  ;;  %s3517_s26 = sld [smem:[#allocation4 + $0x12]] }
  0x8f   : > { %v254_v34 = vmul.f32 %v2287_v32, %v249_v21  ;;  %v2289_v37 = vpop.eup %2288  ;;  %v3039_v32 = vstv %s2924_s24  ;;  %s3358_s24 = sld [smem:[#allocation4 + $0x4]] }
  0x90   : > { %339 = vrot.lane.b32.xlu1 %v2766_v10, %s2494_s29  ;;  %337 = vrot.lane.b32.xlu0 %v2769_v11, %s2494_s29  ;;  %v263_v31 = vsel %vm262_vm0, %v250_v18, %v261_v28  ;;  %v2291_v40 = vpop.eup %2290  ;;  %v275_v42 = vmul.f32 %v2289_v37, %v2825_v27  ;;  %v3027_v28 = vstv %s2885_s18  ;;  %v3056_v37 = vstv %s2951_s2  ;;  %s3126_s2 = sld [smem:[#allocation3 + $0x1]]  ;;  %s3260_s18 = sld [smem:[#allocation4 + $0x2]] }
  0x91   : > { %v2839_v33 = vsel %vm264_vm1, %v265_v30, %v263_v31  ;;  %v256_v38 = vsel %vm255_vm2, %v249_v21, %v254_v34  ;;  %v268_v47 = vmul.f32 %v2291_v40, %v2831_v29  ;;  %v3033_v30 = vstv %s2911_s12  ;;  %s3356_s12 = sld [smem:[#allocation3 + $0x4]] }
  0x92   : > { %5624 = vst [vmem:[#allocation27_spill] sm:$0xff] %v2839_v33  ;;  %v282_v35 = vmul.f32 2.0, %v2839_v33  ;;  %v2859_v41 = vsel %vm257_vm3, %v258_v36, %v256_v38  ;;  %v277_v49 = vsel %vm276_vm4, %v2825_v27, %v275_v42  ;;  %v1183_v50 = vmul.f32 %v2871_v43, %v2839_v33 }
  0x93   : > { %5625 = vst [vmem:[#allocation28_spill] sm:$0xff] %v2859_v41  ;;  %v2888_v48 = vmul.f32 2.0, %v2859_v41  ;;  %v1194_v54 = vmul.f32 %v2875_v44, %v2839_v33  ;;  %v2929_v59 = vsel %vm278_vm5, %v279_v46, %v277_v49  ;;  %v270_v60 = vsel %vm269_vm6, %v2831_v29, %v268_v47 }
  0x94   : > { %343 = vrot.lane.b32.xlu1 %v2774_v12, %s2494_s29  ;;  %341 = vrot.lane.b32.xlu0 %v2777_v13, %s2494_s29  ;;  %v286_v39 = vmul.f32 %v282_v35, %v2839_v33  ;;  %5627 = vst [vmem:[#allocation30_spill] sm:$0xff] %v2929_v59  ;;  %v2983_v17 = vmul.f32 2.0, %v2929_v59  ;;  %v1247_v18 = vmul.f32 %v2946_v62, %v2839_v33  ;;  %v3030_v29 = vstv %s2909_s11  ;;  %s3346_s11 = sld [smem:[#allocation4 + $0x5]] }
  0x95   : > { %v285_v61 = vmul.f32 %v2888_v48, %v2859_v41  ;;  %v1258_v19 = vmul.f32 %v2949_v63, %v2839_v33  ;;  %v2997_v21 = vmul.f32 %v2946_v62, %v2859_v41  ;;  %v3042_v34 = vstv %s2937_s8  ;;  %s3371_s8 = sld [smem:[#allocation4 + $0x8]] }
  0x96   : > { %v2879_v45 = vadd.f32 -1.0, %v286_v39  ;;  %v1252_v39 = vadd.f32 %v3017_v25, %v1247_v18  ;;  %v3066_v42 = vstv %s2961_s3  ;;  %v3075_v47 = vstv %s2975_s9  ;;  %s3161_s3 = sld [smem:[#allocation3]]  ;;  %s3381_s9 = sld [smem:[#allocation3 + $0x9]] }
  0x97   : > { %v2993_v20 = vadd.f32 -1.0, %v285_v61  ;;  %v3078_v49 = vstv %s2977_s13  ;;  %v1407_v18 = vmul.f32 %v3075_v47, %v2839_v33  ;;  %s3390_s13 = sld [smem:[#allocation4 + $0x3]] }
  0x98   : > { %347 = vrot.lane.b32.xlu1 %v2782_v14, %s2494_s29  ;;  %345 = vrot.lane.b32.xlu0 %v2785_v15, %s2494_s29  ;;  %5626 = vst [vmem:[#allocation29_spill] sm:$0xff] %v2879_v45  ;;  %s2897_s29 = sld [smem:[#allocation3 + $0x26]]  ;;  %v294_v58 = vmul.f32 %v2879_v45, %v282_v35  ;;  %v3045_v35 = vstv %s2935_s25  ;;  %s3369_s25 = sld [smem:[#allocation3 + $0x8]] }
  0x99   : > { %5632 = vst [vmem:[#allocation34_spill] sm:$0xff] %v2993_v20 }
  0x9a   : > { %v2980_v16 = vsub.f32 %v294_v58, %v2839_v33 }
  0x9c   : > { %416 = vrot.lane.b32.xlu1 %v2737_v3, %s2495_s14  ;;  %414 = vrot.lane.b32.xlu0 %v2729_v1, %s2495_s14  ;;  %5631 = vst [vmem:[#allocation33_spill] sm:$0xff] %v2980_v16 }
  0xa0   : > { %420 = vrot.lane.b32.xlu1 %v2734_v2, %s2495_s14  ;;  %418 = vrot.lane.b32.xlu0 %v2726_v0, %s2495_s14 }
  0xa4   : > { %424 = vrot.lane.b32.xlu1 %v2742_v4, %s2495_s14  ;;  %422 = vrot.lane.b32.xlu0 %v2745_v5, %s2495_s14 }
  0xa8   : > { %428 = vrot.lane.b32.xlu1 %v2750_v6, %s2495_s14  ;;  %426 = vrot.lane.b32.xlu0 %v2753_v7, %s2495_s14 }
  0xac   : > { %436 = vrot.lane.b32.xlu1 %v2758_v8, %s2495_s14  ;;  %434 = vrot.lane.b32.xlu0 %v2761_v9, %s2495_s14 }
  0xb0   : > { %440 = vrot.lane.b32.xlu1 %v2766_v10, %s2495_s14  ;;  %438 = vrot.lane.b32.xlu0 %v2769_v11, %s2495_s14 }
  0xb4   : > { %444 = vrot.lane.b32.xlu1 %v2774_v12, %s2495_s14  ;;  %442 = vrot.lane.b32.xlu0 %v2777_v13, %s2495_s14 }
  0xb8   : > { %448 = vrot.lane.b32.xlu1 %v2782_v14, %s2495_s14  ;;  %446 = vrot.lane.b32.xlu0 %v2785_v15, %s2495_s14  ;;  %s2899_s14 = sld [smem:[#allocation3 + $0x29]] }
  0xbc   : > { %1821 = vrot.lane.b32.xlu1 %v2737_v3, %s5362_s22  ;;  %1819 = vrot.lane.b32.xlu0 %v2729_v1, %s5362_s22  ;;  %v1205_v1 = vmul.f32 %v2879_v45, %v2907_v53  ;;  %v2959_v3 = vstv %s2873_s20  ;;  %s2985_s20 = sld [smem:[#allocation4 + $0x2b]] }
  0xbd   : > { %v1225_v24 = vmul.f32 %v2959_v3, %v2980_v16 }
  0xbe   : > { %v3004_v22 = vstv %s2899_s14  ;;  %s3022_s14 = sld [smem:[#allocation4 + $0x2e]] }
  0xbf   : > { %v1327_v36 = vmul.f32 %v3004_v22, %v2839_v33 }
  0xc0   : > { %1825 = vrot.lane.b32.xlu1 %v2734_v2, %s5362_s22  ;;  %1823 = vrot.lane.b32.xlu0 %v2726_v0, %s5362_s22  ;;  %v1188_v0 = vadd.f32 %v2904_v52, %v1183_v50  ;;  %v2956_v2 = vand.u32 127, %v228_v51  ;;  %v1279_v50 = vmul.f32 %v2879_v45, %v3030_v29  ;;  %v1338_v51 = vmul.f32 %v3042_v34, %v2839_v33 }
  0xc1   : > { %v1332_v58 = vadd.f32 %v3039_v32, %v1327_v36 }
  0xc2   : > { %5629 = vst [vmem:[#allocation31_spill] sm:$0xff] %v2956_v2  ;;  %v1209_v23 = vadd.f32 %v1205_v1, %v1188_v0  ;;  %v3101_v0 = vstv %s3008_s16  ;;  %s3258_s16 = sld [smem:[#allocation3 + $0x2]] }
  0xc4   : > { %1829 = vrot.lane.b32.xlu1 %v2742_v4, %s5362_s22  ;;  %1827 = vrot.lane.b32.xlu0 %v2745_v5, %s5362_s22  ;;  %s2922_s22 = sld [smem:[#allocation4 + $0x27]]  ;;  %v1199_v4 = vadd.f32 %v2917_v56, %v1194_v54  ;;  %v1215_v5 = vmul.f32 %v2879_v45, %v2920_v57  ;;  %v3060_v38 = vadd.f32 %v1225_v24, %v1209_v23  ;;  %v3085_v54 = vstv %s2985_s20  ;;  %s3392_s20 = sld [smem:[#allocation4 + $0x9]] }
  0xc5   : > { %v1343_v24 = vadd.f32 %v3045_v35, %v1338_v51  ;;  %v293_v51 = vmul.f32 %v2993_v20, %v2888_v48  ;;  %v1379_v48 = vmul.f32 %v3085_v54, %v2980_v16 }
  0xc6   : > { %v1219_v26 = vadd.f32 %v1215_v5, %v1199_v4  ;;  %5633 = vst [vmem:[#allocation35_spill] sm:$0xff] %v3060_v38  ;;  %v1289_v4 = vmul.f32 %v3033_v30, %v2980_v16  ;;  %v3106_v5 = vstv %s3022_s14  ;;  %s3405_s14 = sld [smem:[#allocation4 + $0x6]] }
  0xc8   : > { %1833 = vrot.lane.b32.xlu1 %v2750_v6, %s5628_s19  ;;  %1831 = vrot.lane.b32.xlu0 %v2753_v7, %s5628_s19  ;;  %v2970_v6 = vsel %vm271_vm7, %v272_v55, %v270_v60  ;;  %v2973_v7 = vstv %s2877_s27  ;;  %s3006_s27 = sld [smem:[#allocation4 + $0x2c]]  ;;  %v3088_v55 = vstv %s2987_s6  ;;  %v1349_v60 = vmul.f32 %v2879_v45, %v3056_v37  ;;  %s3190_s6 = sld [smem:[#allocation4 + $0x1]] }
  0xc9   : > { %5630 = vst [vmem:[#allocation32_spill] sm:$0xff] %v2970_v6  ;;  %v1235_v27 = vmul.f32 %v2973_v7, %v2980_v16 }
  0xca   : > { %v3036_v31 = vstv %s2922_s22  ;;  %s3058_s22 = sld [smem:[#allocation4 + $0x2f]]  ;;  %v1353_v36 = vadd.f32 %v1349_v60, %v1332_v58  ;;  %v1193_v58 = vmul.f32 %v2875_v44, %v2859_v41  ;;  %v1412_v60 = vadd.f32 %v3088_v55, %v1407_v18 }
  0xcb   : > { %v3071_v46 = vadd.f32 %v1235_v27, %v1219_v26  ;;  %v1299_v23 = vmul.f32 %v3036_v31, %v2980_v16  ;;  %v1359_v26 = vmul.f32 %v2879_v45, %v3066_v42  ;;  %v3120_v27 = vstv %s3047_s23  ;;  %s3417_s23 = sld [smem:[#allocation3 + $0xa]] }
  0xcc   : > { %1841 = vrot.lane.b32.xlu1 %v2758_v8, %s5628_s19  ;;  %1839 = vrot.lane.b32.xlu0 %v2761_v9, %s5628_s19  ;;  %v3014_v8 = vmul.f32 %v2949_v63, %v2859_v41  ;;  %v3020_v9 = vstv %s2897_s29  ;;  %v1449_v18 = vmul.f32 %v3120_v27, %v2980_v16  ;;  %s3344_s29 = sld [smem:[#allocation3 + $0x5]] }
  0xcd   : > { %v1269_v40 = vmul.f32 %v2879_v45, %v3020_v9  ;;  %5634 = vst [vmem:[#allocation36_spill] sm:$0xff] %v3071_v46 }
  0xce   : > { %v3098_v61 = vstv %s3006_s27  ;;  %s3403_s27 = sld [smem:[#allocation3 + $0x6]] }
  0xcf   : > { %v1273_v1 = vadd.f32 %v1269_v40, %v1252_v39  ;;  %v1429_v40 = vmul.f32 %v2879_v45, %v3101_v0 }
  0xd0   : > { %1845 = vrot.lane.b32.xlu1 %v2766_v10, %s5628_s19  ;;  %1843 = vrot.lane.b32.xlu0 %v2769_v11, %s5628_s19  ;;  %v3069_v10 = vstv %s2963_s10  ;;  %v1263_v11 = vadd.f32 %v3027_v28, %v1258_v19  ;;  %s3230_s10 = sld [smem:[#allocation4]] }
  0xd1   : > { %v1369_v39 = vmul.f32 %v3069_v10, %v2980_v16  ;;  %v3146_v46 = vadd.f32 %v1289_v4, %v1273_v1  ;;  %v3164_v1 = vsub.f32 %v293_v51, %v2859_v41  ;;  %v1198_v4 = vadd.f32 %v2917_v56, %v1193_v58 }
  0xd2   : > { %v1283_v19 = vadd.f32 %v1279_v50, %v1263_v11  ;;  %v3133_v11 = vstv %s3058_s22  ;;  %v1439_v50 = vmul.f32 %v2879_v45, %v3106_v5  ;;  %v1363_v45 = vadd.f32 %v1359_v26, %v1343_v24  ;;  %s3419_s22 = sld [smem:[#allocation4 + $0xa]] }
  0xd3   : > { %5635 = vst [vmem:[#allocation37_spill] sm:$0xff] %v3146_v46  ;;  %v3152_v2 = vadd.f32 %v1369_v39, %v1353_v36  ;;  %5638 = vst [vmem:[#allocation40_spill] sm:$0xff] %v3164_v1  ;;  %v1433_v24 = vadd.f32 %v1429_v40, %v1412_v60  ;;  %v1251_v39 = vadd.f32 %v3017_v25, %v2997_v21  ;;  %v3188_v40 = vstv %s3126_s2  ;;  %s3424_s2 = sld [smem:[#allocation3 + $0xc]] }
  0xd4   : > { %1849 = vrot.lane.b32.xlu1 %v2774_v12, %s5628_s19  ;;  %1847 = vrot.lane.b32.xlu0 %v2777_v13, %s5628_s19  ;;  %v1418_v12 = vmul.f32 %v3078_v49, %v2839_v33  ;;  %v1182_v13 = vmul.f32 %v2871_v43, %v2859_v41  ;;  %v3148_v38 = vadd.f32 %v1299_v23, %v1283_v19 }
  0xd5   : > { %5637 = vst [vmem:[#allocation39_spill] sm:$0xff] %v3152_v2  ;;  %v1214_v19 = vmul.f32 %v2993_v20, %v2920_v57  ;;  %v1326_v23 = vmul.f32 %v3004_v22, %v2859_v41  ;;  %v1262_v51 = vadd.f32 %v3027_v28, %v3014_v8  ;;  %v1268_v58 = vmul.f32 %v2993_v20, %v3020_v9 }
  0xd6   : > { %v1423_v33 = vadd.f32 %v3098_v61, %v1418_v12  ;;  %5636 = vst [vmem:[#allocation38_spill] sm:$0xff] %v3148_v38  ;;  %v1459_v12 = vmul.f32 %v3133_v11, %v2980_v16  ;;  %v1224_v16 = vmul.f32 %v2959_v3, %v3164_v1  ;;  %v1278_v2 = vmul.f32 %v2993_v20, %v3030_v29 }
  0xd7   : > { %v3181_v38 = vadd.f32 %v1379_v48, %v1363_v45  ;;  %v288_v21 = vmul.f32 %v2983_v17, %v2929_v59  ;;  %5640 = vst [vmem:[#allocation42_spill] sm:$0xff] %v3188_v40  ;;  %v1218_v8 = vadd.f32 %v1214_v19, %v1198_v4  ;;  %v1331_v60 = vadd.f32 %v3039_v32, %v1326_v23 }
  0xd8   : > { %1853 = vrot.lane.b32.xlu1 %v2782_v14, %s5628_s19  ;;  %1851 = vrot.lane.b32.xlu0 %v2785_v15, %s5628_s19  ;;  %v1187_v14 = vadd.f32 %v2904_v52, %v1182_v13  ;;  %v1204_v15 = vmul.f32 %v2993_v20, %v2907_v53  ;;  %v3159_v13 = vmul.f32 2.0, %v2970_v6  ;;  %v1443_v26 = vadd.f32 %v1439_v50, %v1423_v33  ;;  %s3379_s19 = sld [smem:[#allocation3 + $0x3]] }
  0xd9   : > { %5639 = vst [vmem:[#allocation41_spill] sm:$0xff] %v3181_v38  ;;  %v1337_v33 = vmul.f32 %v3042_v34, %v2859_v41  ;;  %v1234_v50 = vmul.f32 %v2973_v7, %v3164_v1  ;;  %v1348_v45 = vmul.f32 %v2993_v20, %v3056_v37  ;;  %v1288_v48 = vmul.f32 %v3033_v30, %v3164_v1 }
  0xda   : > { %v1208_v36 = vadd.f32 %v1204_v15, %v1187_v14  ;;  %v3197_v14 = vadd.f32 %v1449_v18, %v1433_v24  ;;  %v3199_v15 = vadd.f32 %v1459_v12, %v1443_v26  ;;  %v1406_v40 = vmul.f32 %v3075_v47, %v2859_v41 }
  0xdb   : > { %v1272_v4 = vadd.f32 %v1268_v58, %v1251_v39  ;;  %v1282_v19 = vadd.f32 %v1278_v2, %v1262_v51  ;;  %v1298_v23 = vmul.f32 %v3036_v31, %v3164_v1  ;;  %v1342_v46 = vadd.f32 %v3045_v35, %v1337_v33 }
  0xdc   : > { %5641 = vst [vmem:[#allocation43_spill] sm:$0xff] %v3197_v14  ;;  %5642 = vst [vmem:[#allocation44_spill] sm:$0xff] %v3199_v15  ;;  %v3205_v38 = vadd.f32 %v1224_v16, %v1208_v36  ;;  %v1358_v18 = vmul.f32 %v2993_v20, %v3066_v42  ;;  %v3212_v12 = vadd.f32 -1.0, %v288_v21  ;;  %v3215_v24 = vstv %s3161_s3  ;;  %s3426_s3 = sld [smem:[#allocation4 + $0xc]] }
  0xdd   : > { %5645 = vst [vmem:[#allocation47_spill] sm:$0xff] %v3215_v24  ;;  %v3217_v26 = vadd.f32 %v1234_v50, %v1218_v8  ;;  %v1352_v15 = vadd.f32 %v1348_v45, %v1331_v60  ;;  %v1368_v16 = vmul.f32 %v3069_v10, %v3164_v1  ;;  %v1417_v2 = vmul.f32 %v3078_v49, %v2859_v41 }
  0xde   : > { %5643 = vst [vmem:[#allocation45_spill] sm:$0xff] %v3205_v38  ;;  %5644 = vst [vmem:[#allocation46_spill] sm:$0xff] %v3212_v12  ;;  %v1411_v36 = vadd.f32 %v3088_v55, %v1406_v40  ;;  %v1428_v39 = vmul.f32 %v2993_v20, %v3101_v0  ;;  %v1185_v51 = vmul.f32 %v2871_v43, %v2929_v59  ;;  %v3245_v41 = vstv %s3190_s6  ;;  %s3430_s6 = sld [smem:[#allocation3 + $0x7]] }
  0xdf   : > { %5646 = vst [vmem:[#allocation48_spill] sm:$0xff] %v3217_v26  ;;  %v1196_v58 = vmul.f32 %v2875_v44, %v2929_v59  ;;  %v3232_v33 = vadd.f32 %v1288_v48, %v1272_v4  ;;  %v3234_v21 = vadd.f32 %v1298_v23, %v1282_v19  ;;  %v1378_v8 = vmul.f32 %v3085_v54, %v3164_v1 }
  0xe0   : > { %v1249_v40 = vmul.f32 %v2946_v62, %v2929_v59  ;;  %v1362_v50 = vadd.f32 %v1358_v18, %v1342_v46  ;;  %v296_v60 = vmul.f32 %v3212_v12, %v2983_v17  ;;  %v1260_v45 = vmul.f32 %v2949_v63, %v2929_v59  ;;  %5649 = vst [vmem:[#allocation51_spill] sm:$0xff] %v3245_v41 }
  0xe1   : > { %5647 = vst [vmem:[#allocation49_spill] sm:$0xff] %v3232_v33  ;;  %5648 = vst [vmem:[#allocation50_spill] sm:$0xff] %v3234_v21  ;;  %v3247_v24 = vadd.f32 %v1368_v16, %v1352_v15  ;;  %v1438_v48 = vmul.f32 %v2993_v20, %v3106_v5  ;;  %v1448_v4 = vmul.f32 %v3120_v27, %v3164_v1 }
  0xe2   : > { %v1329_v19 = vmul.f32 %v3004_v22, %v2929_v59  ;;  %v1422_v46 = vadd.f32 %v3098_v61, %v1417_v2  ;;  %v1432_v23 = vadd.f32 %v1428_v39, %v1411_v36  ;;  %v1190_v17 = vadd.f32 %v2904_v52, %v1185_v51 }
  0xe3   : > { %5650 = vst [vmem:[#allocation52_spill] sm:$0xff] %v3247_v24  ;;  %v1201_v18 = vadd.f32 %v2917_v56, %v1196_v58  ;;  %v1207_v15 = vmul.f32 %v3212_v12, %v2907_v53  ;;  %v1217_v16 = vmul.f32 %v3212_v12, %v2920_v57  ;;  %v1254_v20 = vadd.f32 %v3017_v25, %v1249_v40 }
  0xe4   : > { %v1271_v2 = vmul.f32 %v3212_v12, %v3020_v9  ;;  %v1458_v36 = vmul.f32 %v3133_v11, %v3164_v1  ;;  %v3272_v39 = vsub.f32 %v296_v60, %v2929_v59  ;;  %v1265_v51 = vadd.f32 %v3027_v28, %v1260_v45 }
  0xe5   : > { %v1281_v58 = vmul.f32 %v3212_v12, %v3030_v29  ;;  %v3277_v41 = vadd.f32 %v1378_v8, %v1362_v50  ;;  %v1334_v14 = vadd.f32 %v3039_v32, %v1329_v19  ;;  %v1340_v40 = vmul.f32 %v3042_v34, %v2929_v59 }
  0xe6   : > { %5651 = vst [vmem:[#allocation53_spill] sm:$0xff] %v3272_v39  ;;  %v1351_v26 = vmul.f32 %v3212_v12, %v3056_v37  ;;  %v1442_v38 = vadd.f32 %v1438_v48, %v1422_v46  ;;  %v3284_v1 = vadd.f32 %v1448_v4, %v1432_v23  ;;  %v287_v60 = vmul.f32 %v3159_v13, %v2970_v6 }
  0xe7   : > { %5652 = vst [vmem:[#allocation54_spill] sm:$0xff] %v3277_v41  ;;  %v3289_v45 = vstv %s3230_s10  ;;  %v1211_v50 = vadd.f32 %v1207_v15, %v1190_v17  ;;  %v1221_v19 = vadd.f32 %v1217_v16, %v1201_v18  ;;  %v1227_v41 = vmul.f32 %v2959_v3, %v3272_v39  ;;  %s3432_s10 = sld [smem:[#allocation4 + $0x7]] }
  0xe8   : > { %5653 = vst [vmem:[#allocation55_spill] sm:$0xff] %v3284_v1  ;;  %5654 = vst [vmem:[#allocation56_spill] sm:$0xff] %v3289_v45  ;;  %v1275_v21 = vadd.f32 %v1271_v2, %v1254_v20  ;;  %v1237_v48 = vmul.f32 %v2973_v7, %v3272_v39  ;;  %v1285_v4 = vadd.f32 %v1281_v58, %v1265_v51  ;;  %v3310_v16 = vadd.f32 -1.0, %v287_v60 }
  0xe9   : > { %v1291_v46 = vmul.f32 %v3033_v30, %v3272_v39  ;;  %v1361_v23 = vmul.f32 %v3212_v12, %v3066_v42  ;;  %v1301_v45 = vmul.f32 %v3036_v31, %v3272_v39  ;;  %v1345_v17 = vadd.f32 %v3045_v35, %v1340_v40 }
  0xea   : > { %v1355_v18 = vadd.f32 %v1351_v26, %v1334_v14  ;;  %v1371_v15 = vmul.f32 %v3069_v10, %v3272_v39  ;;  %v3308_v20 = vadd.f32 %v1458_v36, %v1442_v38  ;;  %5655 = vst [vmem:[#allocation57_spill] sm:$0xff] %v3310_v16  ;;  %v3313_v2 = vstv %s3258_s16  ;;  %s3442_s16 = sld [smem:[#allocation3 + $0xb]] }
  0xeb   : > { %5656 = vst [vmem:[#allocation58_spill] sm:$0xff] %v3313_v2  ;;  %v3316_v51 = vstv %s3260_s18  ;;  %v3322_v33 = vadd.f32 %v1227_v41, %v1211_v50  ;;  %v1409_v14 = vmul.f32 %v3075_v47, %v2929_v59  ;;  %v1420_v26 = vmul.f32 %v3078_v49, %v2929_v59  ;;  %s3444_s18 = sld [smem:[#allocation4 + $0xb]] }
  0xec   : > { %5657 = vst [vmem:[#allocation59_spill] sm:$0xff] %v3316_v51  ;;  %v1184_v38 = vmul.f32 %v2871_v43, %v2970_v6  ;;  %v3330_v36 = vadd.f32 %v1237_v48, %v1221_v19  ;;  %v3332_v40 = vadd.f32 %v1291_v46, %v1275_v21  ;;  %v1195_v60 = vmul.f32 %v2875_v44, %v2970_v6 }
  0xed   : > { %v1248_v41 = vmul.f32 %v2946_v62, %v2970_v6  ;;  %v3338_v50 = vadd.f32 %v1301_v45, %v1285_v4  ;;  %v1365_v51 = vadd.f32 %v1361_v23, %v1345_v17  ;;  %v3340_v2 = vadd.f32 %v1371_v15, %v1355_v18 }
  0xee   : > { %v3291_v24 = vpop.permute.xlu1 %317  ;;  %v3293_v8 = vpop.permute.xlu0 %313  ;;  %v1259_v59 = vmul.f32 %v2949_v63, %v2970_v6  ;;  %v1381_v43 = vmul.f32 %v3085_v54, %v3272_v39  ;;  %v1431_v44 = vmul.f32 %v3212_v12, %v3101_v0  ;;  %v1441_v62 = vmul.f32 %v3212_v12, %v3106_v5 }
  0xef   : > { %v295_v21 = vmul.f32 %v3310_v16, %v3159_v13  ;;  %v1414_v19 = vadd.f32 %v3088_v55, %v1409_v14  ;;  %v1425_v48 = vadd.f32 %v3098_v61, %v1420_v26  ;;  %v1189_v4 = vadd.f32 %v2904_v52, %v1184_v38 }
  0xf0   : > { %v1328_v46 = vmul.f32 %v3004_v22, %v2970_v6  ;;  %v1200_v13 = vadd.f32 %v2917_v56, %v1195_v60  ;;  %v1206_v23 = vmul.f32 %v3310_v16, %v2907_v53  ;;  %v1253_v17 = vadd.f32 %v3017_v25, %v1248_v41 }
  0xf1   : > { %v1339_v18 = vmul.f32 %v3042_v34, %v2970_v6  ;;  %v1216_v52 = vmul.f32 %v3310_v16, %v2920_v57  ;;  %v1264_v22 = vadd.f32 %v3027_v28, %v1259_v59  ;;  %v1270_v56 = vmul.f32 %v3310_v16, %v3020_v9  ;;  %v5659_v9 = vld [vmem:[#allocation31_spill] sm:$0xff] }
  0xf2   : > { %v3318_v58 = vpop.permute.xlu1 %319  ;;  %v3320_v1 = vpop.permute.xlu0 %315  ;;  %v1280_v53 = vmul.f32 %v3310_v16, %v3030_v29  ;;  %v3394_v25 = vadd.f32 %v1381_v43, %v1365_v51  ;;  %v1451_v34 = vmul.f32 %v3120_v27, %v3272_v39  ;;  %v1461_v57 = vmul.f32 %v3133_v11, %v3272_v39 }
  0xf3   : > { %v3401_v59 = vsub.f32 %v295_v21, %v2970_v6  ;;  %vm312_vm8 = vcmp.ge.s32.totalorder %v5659_v9, 1  ;;  %v1435_v15 = vadd.f32 %v1431_v44, %v1414_v19  ;;  %v1333_v51 = vadd.f32 %v3039_v32, %v1328_v46 }
  0xf4   : > { %v1350_v14 = vmul.f32 %v3310_v16, %v3056_v37  ;;  %v1408_v26 = vmul.f32 %v3075_v47, %v2970_v6  ;;  %v1445_v38 = vadd.f32 %v1441_v62, %v1425_v48  ;;  %v1210_v60 = vadd.f32 %v1206_v23, %v1189_v4 }
  0xf5   : > { %5658 = vst [vmem:[#allocation60_spill] sm:$0xff] %v3401_v59  ;;  %v1344_v41 = vadd.f32 %v3045_v35, %v1339_v18  ;;  %v1360_v43 = vmul.f32 %v3310_v16, %v3066_v42  ;;  %v1220_v32 = vadd.f32 %v1216_v52, %v1200_v13  ;;  %v1226_v37 = vmul.f32 %v2959_v3, %v3401_v59 }
  0xf6   : > { %v3360_v63 = vpop.permute.xlu1 %323  ;;  %v3362_v45 = vpop.permute.xlu0 %321  ;;  %v1274_v47 = vadd.f32 %v1270_v56, %v1253_v17  ;;  %v1284_v44 = vadd.f32 %v1280_v53, %v1264_v22  ;;  %v1236_v35 = vmul.f32 %v2973_v7, %v3401_v59  ;;  %v1290_v42 = vmul.f32 %v3033_v30, %v3401_v59 }
  0xf7   : > { %v1300_v62 = vmul.f32 %v3036_v31, %v3401_v59  ;;  %v1419_v21 = vmul.f32 %v3078_v49, %v2970_v6  ;;  %v1354_v48 = vadd.f32 %v1350_v14, %v1333_v51  ;;  %v1370_v7 = vmul.f32 %v3069_v10, %v3401_v59 }
  0xf8   : > { %v1413_v30 = vadd.f32 %v3088_v55, %v1408_v26  ;;  %v1430_v31 = vmul.f32 %v3310_v16, %v3101_v0  ;;  %v3455_v49 = vadd.f32 %v1451_v34, %v1435_v15  ;;  %v1364_v4 = vadd.f32 %v1360_v43, %v1344_v41 }
  0xf9   : > { %v1380_v46 = vmul.f32 %v3085_v54, %v3401_v59  ;;  %v3460_v13 = vstv %s3379_s19  ;;  %v3466_v10 = vadd.f32 %v1461_v57, %v1445_v38  ;;  %v3468_v55 = vadd.f32 %v1226_v37, %v1210_v60  ;;  %s3487_s19 = sld [smem:[#allocation3 + $0x10]] }
  0xfa   : > { %v3408_v28 = vpop.permute.xlu1 %327  ;;  %v3410_v29 = vpop.permute.xlu0 %325  ;;  %v3471_v0 = vstv %s3390_s13  ;;  %v3474_v23 = vstv %s3344_s29  ;;  %v3480_v17 = vadd.f32 %v1236_v35, %v1220_v32  ;;  %v3482_v54 = vadd.f32 %v1290_v42, %v1274_v47  ;;  %s3489_s29 = sld [smem:[#allocation4 + $0x10]]  ;;  %s3501_s13 = sld [smem:[#allocation3 + $0x11]] }
  0xfb   : > { %v1424_v18 = vadd.f32 %v3098_v61, %v1419_v21  ;;  %v1440_v52 = vmul.f32 %v3310_v16, %v3106_v5  ;;  %v3495_v53 = vadd.f32 %v1300_v62, %v1284_v44  ;;  %v3497_v34 = vadd.f32 %v1370_v7, %v1354_v48 }
  0xfc   : > { %v1434_v61 = vadd.f32 %v1430_v31, %v1413_v30  ;;  %v1450_v5 = vmul.f32 %v3120_v27, %v3401_v59  ;;  %v3505_v57 = vadd.f32 %v1380_v46, %v1364_v4  ;;  %v1460_v15 = vmul.f32 %v3133_v11, %v3401_v59 }
  0xfd   : > { %v3510_v51 = vstv %s3356_s12  ;;  %v3513_v14 = vstv %s3346_s11  ;;  %v3520_v27 = vstv %s3358_s24  ;;  %v3523_v26 = vstv %s3403_s27  ;;  %s3533_s12 = sld [smem:[#allocation4 + $0x13]]  ;;  %s3550_s11 = sld [smem:[#allocation3 + $0x14]] }
  0xfe   : > { %v336_v3 = vpop.permute.xlu1 %335  ;;  %v334_v19 = vpop.permute.xlu0 %333  ;;  %5660 = vst [vmem:[#allocation61_spill] sm:$0xff] %v3510_v51  ;;  %5661 = vst [vmem:[#allocation62_spill] sm:$0xff] %v3520_v27  ;;  %v3526_v38 = vstv %s3405_s14  ;;  %v3529_v60 = vstv %s3430_s6  ;;  %v3539_v11 = vsel %vm312_vm8, %v3320_v1, %v3360_v63  ;;  %v3545_v41 = vsel %vm312_vm8, %v3293_v8, %v3362_v45  ;;  %s3552_s24 = sld [smem:[#allocation4 + $0x14]]  ;;  %s3565_s27 = sld [smem:[#allocation3 + $0x15]]  ;;  %v5740_v51 = vld [vmem:[#allocation44_spill] sm:$0xff] }
  0xff   : > { %5662 = vst [vmem:[#allocation63_spill] sm:$0xff] %v3529_v60  ;;  %5663 = vst [vmem:[#allocation64_spill] sm:$0xff] %v3539_v11  ;;  %v1444_v43 = vadd.f32 %v1440_v52, %v1424_v18  ;;  %v3548_v32 = vstv %s3432_s10  ;;  %v3554_v44 = vadd.f32 %v1450_v5, %v1434_v61  ;;  %v3557_v1 = vstv %s3381_s9  ;;  %s3567_s14 = sld [smem:[#allocation4 + $0x15]]  ;;  %s3585_s9 = sld [smem:[#allocation4 + $0x16]] }
 0x100   : > { %5664 = vst [vmem:[#allocation65_spill] sm:$0xff] %v3545_v41  ;;  %5665 = vst [vmem:[#allocation66_spill] sm:$0xff] %v3548_v32  ;;  %v3560_v63 = vstv %s3369_s25  ;;  %v3563_v35 = vstv %s3392_s20  ;;  %v3578_v42 = vstv %s3371_s8  ;;  %v3581_v62 = vstv %s3417_s23  ;;  %s3583_s25 = sld [smem:[#allocation3 + $0x16]]  ;;  %s3595_s8 = sld [smem:[#allocation3 + $0x17]] }
 0x101   : > { %5666 = vst [vmem:[#allocation67_spill] sm:$0xff] %v3557_v1  ;;  %5667 = vst [vmem:[#allocation68_spill] sm:$0xff] %v3560_v63  ;;  %v354_v21 = vmul.f32 %v3539_v11, %v3539_v11  ;;  %s3597_s20 = sld [smem:[#allocation4 + $0x17]]  ;;  %v3599_v7 = vadd.f32 %v1460_v15, %v1444_v43  ;;  %v3602_v30 = vstv %s3419_s22  ;;  %v3605_v31 = vstv %s3442_s16  ;;  %s3610_s23 = sld [smem:[#allocation3 + $0x18]] }
 0x102   : > { %v3491_v22 = vpop.permute.xlu1 %339  ;;  %v3493_v56 = vpop.permute.xlu0 %337  ;;  %5668 = vst [vmem:[#allocation69_spill] sm:$0xff] %v3563_v35  ;;  %5671 = vst [vmem:[#allocation72_spill] sm:$0xff] %v3578_v42  ;;  %v3608_v4 = vstv %s3444_s18  ;;  %s3612_s6 = sld [smem:[#allocation4 + $0x18]]  ;;  %v3619_v5 = vstv %s3451_s30  ;;  %v3622_v15 = vstv %s3424_s2  ;;  %s3624_s22 = sld [smem:[#allocation3 + $0x19]]  ;;  %v3632_v43 = vsel %vm312_vm8, %v3318_v58, %v3408_v28 }
 0x103   : > { %5672 = vst [vmem:[#allocation73_spill] sm:$0xff] %v3581_v62  ;;  %5673 = vst [vmem:[#allocation74_spill] sm:$0xff] %v3602_v30  ;;  %s3626_s10 = sld [smem:[#allocation4 + $0x19]]  ;;  %s3650_s30 = sld [smem:[#allocation3 + $0x1a]]  ;;  %v3656_v58 = vstv %s3453_s1  ;;  %v3662_v28 = vstv %s3462_s7  ;;  %v3725_v39 = vstv %s3531_s28  ;;  %v3728_v12 = vstv %s3533_s12  ;;  %v5737_v62 = vld [vmem:[#allocation48_spill] sm:$0xff] }
 0x104   : > { %5674 = vst [vmem:[#allocation75_spill] sm:$0xff] %v3605_v31  ;;  %5675 = vst [vmem:[#allocation76_spill] sm:$0xff] %v3608_v4  ;;  %s3652_s2 = sld [smem:[#allocation4 + $0x1a]]  ;;  %s3664_s16 = sld [smem:[#allocation3 + $0x1b]]  ;;  %vm413_vm9 = vcmp.ge.s32.totalorder %v5659_v9, 2 }
 0x105   : > { %5676 = vst [vmem:[#allocation77_spill] sm:$0xff] %v3619_v5  ;;  %5677 = vst [vmem:[#allocation78_spill] sm:$0xff] %v3622_v15  ;;  %s3666_s18 = sld [smem:[#allocation4 + $0x1b]]  ;;  %s3678_s1 = sld [smem:[#allocation3 + $0x1c]]  ;;  %v5723_v5 = vld [vmem:[#allocation50_spill] sm:$0xff] }
 0x106   : > { %v344_v37 = vpop.permute.xlu1 %343  ;;  %v342_v47 = vpop.permute.xlu0 %341  ;;  %5678 = vst [vmem:[#allocation79_spill] sm:$0xff] %v3632_v43  ;;  %5682 = vst [vmem:[#allocation83_spill] sm:$0xff] %v3656_v58  ;;  %s3680_s7 = sld [smem:[#allocation4 + $0x1c]]  ;;  %v3747_v11 = vstv %s3583_s25  ;;  %s4625_s28 = sld [smem:[#allocation3 + $0x31]] }
 0x107   : > { %v3571_v8 = vsel %vm312_vm8, %v336_v3, %v344_v37  ;;  %v3575_v45 = vsel %vm312_vm8, %v334_v19, %v342_v47  ;;  %v353_v3 = vmul.f32 %v3545_v41, %v3545_v41  ;;  %v3638_v37 = vsel %vm312_vm8, %v3291_v24, %v3410_v29  ;;  %5684 = vst [vmem:[#allocation85_spill] sm:$0xff] %v3662_v28  ;;  %s4640_s12 = sld [smem:[#allocation3 + $0x35]]  ;;  %s4657_s25 = sld [smem:[#allocation3 + $0x32]] }
 0x108   : > { %5669 = vst [vmem:[#allocation70_spill] sm:$0xff] %v3571_v8  ;;  %5670 = vst [vmem:[#allocation71_spill] sm:$0xff] %v3575_v45  ;;  %v358_v19 = vmul.f32 %v3571_v8, %v3571_v8  ;;  %v357_v48 = vmul.f32 %v3575_v45, %v3575_v45  ;;  %v3659_v24 = vstv %s3426_s3  ;;  %v3670_v29 = vstv %s3464_s17  ;;  %s3710_s17 = sld [smem:[#allocation3 + $0x1e]] }
 0x109   : > { %5679 = vst [vmem:[#allocation80_spill] sm:$0xff] %v3638_v37  ;;  %5683 = vst [vmem:[#allocation84_spill] sm:$0xff] %v3659_v24  ;;  %s3712_s3 = sld [smem:[#allocation4 + $0x1e]]  ;;  %v3719_v45 = vstv %s3515_s5  ;;  %v3722_v41 = vstv %s3517_s26  ;;  %v3731_v8 = vstv %s3565_s27  ;;  %s3878_s5 = sld [smem:[#allocation3 + $0x1f]] }
 0x10a   : > { %v3614_v46 = vadd.f32 %v358_v19, %v354_v21  ;;  %v3616_v18 = vadd.f32 %v357_v48, %v353_v3  ;;  %v348_v52 = vpop.permute.xlu1 %347  ;;  %v346_v61 = vpop.permute.xlu0 %345  ;;  %5685 = vst [vmem:[#allocation86_spill] sm:$0xff] %v3670_v29  ;;  %v356_v3 = vmul.f32 %v3632_v43, %v3632_v43  ;;  %v355_v19 = vmul.f32 %v3638_v37, %v3638_v37  ;;  %s5794_s26 = sld [smem:[#allocation26_spill]]  ;;  %s4651_s27 = sld [smem:[#allocation4 + $0x35]] }
 0x10b   : > { %v3643_v47 = vsel %vm312_vm8, %v3491_v22, %v348_v52  ;;  %v3648_v21 = vsel %vm312_vm8, %v3493_v56, %v346_v61  ;;  %v3673_v22 = vstv %s3476_s0  ;;  %v3676_v56 = vstv %s3478_s4  ;;  %s3694_s4 = sld [smem:[#allocation3 + $0x1d]]  ;;  %5692 = vst [vmem:[#allocation93_spill] sm:$0xff] %v3719_v45  ;;  %5693 = vst [vmem:[#allocation94_spill] sm:$0xff] %v3722_v41 }
 0x10c   : > { %5680 = vst [vmem:[#allocation81_spill] sm:$0xff] %v3643_v47  ;;  %5681 = vst [vmem:[#allocation82_spill] sm:$0xff] %v3648_v21  ;;  %2292 = vrsqrt.f32 %v3614_v46  ;;  %v360_v48 = vmul.f32 %v3643_v47, %v3643_v47  ;;  %v359_v52 = vmul.f32 %v3648_v21, %v3648_v21  ;;  %s3696_s0 = sld [smem:[#allocation4 + $0x1d]]  ;;  %v3699_v37 = vstv %s3501_s13  ;;  %s4638_s13 = sld [smem:[#allocation4 + $0x31]] }
 0x10d   : > { %2294 = vrsqrt.f32 %v3616_v18  ;;  %5686 = vst [vmem:[#allocation87_spill] sm:$0xff] %v3673_v22  ;;  %5687 = vst [vmem:[#allocation88_spill] sm:$0xff] %v3676_v56  ;;  %v3702_v43 = vstv %s3487_s19  ;;  %v3705_v47 = vstv %s3503_s15  ;;  %v3708_v21 = vstv %s3489_s29  ;;  %s3886_s15 = sld [smem:[#allocation4 + $0x1f]]  ;;  %v5778_v9 = vld [vmem:[#allocation83_spill] sm:$0xff]  ;;  %s4631_s19 = sld [smem:[#allocation3 + $0x30]] }
 0x10e   : > { %v3690_v61 = vpop.permute.xlu1 %416  ;;  %v3692_v59 = vpop.permute.xlu0 %414  ;;  %5688 = vst [vmem:[#allocation89_spill] sm:$0xff] %v3699_v37  ;;  %5689 = vst [vmem:[#allocation90_spill] sm:$0xff] %v3702_v43  ;;  %v3714_v16 = vadd.f32 %v360_v48, %v356_v3  ;;  %v3716_v6 = vadd.f32 %v359_v52, %v355_v19  ;;  %v3734_v3 = vstv %s3550_s11  ;;  %v3741_v48 = vstv %s3567_s14  ;;  %s4633_s29 = sld [smem:[#allocation4 + $0x30]]  ;;  %s4643_s11 = sld [smem:[#allocation3 + $0x34]] }
 0x10f   : > { %5690 = vst [vmem:[#allocation91_spill] sm:$0xff] %v3705_v47  ;;  %5691 = vst [vmem:[#allocation92_spill] sm:$0xff] %v3708_v21  ;;  %v3744_v52 = vstv %s3552_s24  ;;  %v3757_v41 = vstv %s3597_s20  ;;  %v3765_v21 = vstv %s3610_s23  ;;  %v3774_v43 = vstv %s3650_s30  ;;  %s4645_s24 = sld [smem:[#allocation4 + $0x34]]  ;;  %s4653_s14 = sld [smem:[#allocation3 + $0x39]] }
 0x110   : > { %5694 = vst [vmem:[#allocation95_spill] sm:$0xff] %v3725_v39  ;;  %5695 = vst [vmem:[#allocation96_spill] sm:$0xff] %v3728_v12  ;;  %2296 = vrsqrt.f32 %v3714_v16  ;;  %v3751_v12 = vstv %s3585_s9  ;;  %v3754_v39 = vstv %s3595_s8  ;;  %vm374_vm10 = vcmp.eq.f32.partialorder %v3614_v46, inf  ;;  %s4659_s9 = sld [smem:[#allocation4 + $0x32]]  ;;  %s4668_s8 = sld [smem:[#allocation3 + $0x38]] }
 0x111   : > { %5696 = vst [vmem:[#allocation97_spill] sm:$0xff] %v3731_v8  ;;  %5697 = vst [vmem:[#allocation98_spill] sm:$0xff] %v3734_v3  ;;  %2298 = vrsqrt.f32 %v3716_v6  ;;  %v3762_v3 = vstv %s3624_s22  ;;  %v3786_v47 = vstv %s3694_s4  ;;  %vm376_vm11 = vcmp.eq.f32.partialorder %v3614_v46, 0.0  ;;  %s4670_s20 = sld [smem:[#allocation4 + $0x38]]  ;;  %s4672_s23 = sld [smem:[#allocation4 + $0x39]] }
 0x112   : > { %v3737_v19 = vpop.permute.xlu1 %420  ;;  %5698 = vst [vmem:[#allocation99_spill] sm:$0xff] %v3741_v48  ;;  %5699 = vst [vmem:[#allocation100_spill] sm:$0xff] %v3744_v52  ;;  %v3759_v45 = vpop.permute.xlu0 %418  ;;  %v3771_v52 = vstv %s3612_s6  ;;  %v3783_v48 = vstv %s3666_s18  ;;  %vm367_vm12 = vcmp.eq.f32.partialorder %v3616_v18, inf  ;;  %vm369_vm13 = vcmp.eq.f32.partialorder %v3616_v18, 0.0  ;;  %s4674_s6 = sld [smem:[#allocation3 + $0x3c]]  ;;  %s4688_s30 = sld [smem:[#allocation3 + $0x33]] }
 0x113   : > { %5700 = vst [vmem:[#allocation101_spill] sm:$0xff] %v3747_v11  ;;  %5701 = vst [vmem:[#allocation102_spill] sm:$0xff] %v3751_v12  ;;  %v3768_v11 = vstv %s3626_s10  ;;  %v3777_v12 = vstv %s3652_s2  ;;  %vm388_vm14 = vcmp.eq.f32.partialorder %v3714_v16, inf  ;;  %vm390_vm15 = vcmp.eq.f32.partialorder %v3714_v16, 0.0  ;;  %s4680_s22 = sld [smem:[#allocation4 + $0x3c]]  ;;  %s4682_s10 = sld [smem:[#allocation3 + $0x3d]] }
 0x114   : > { %5702 = vst [vmem:[#allocation103_spill] sm:$0xff] %v3754_v39  ;;  %5703 = vst [vmem:[#allocation104_spill] sm:$0xff] %v3757_v41  ;;  %v3780_v39 = vstv %s3664_s16  ;;  %vm381_vm0 = vcmp.eq.f32.partialorder %v3716_v6, inf  ;;  %vm383_vm1 = vcmp.eq.f32.partialorder %v3716_v6, 0.0  ;;  %s4690_s2 = sld [smem:[#allocation4 + $0x33]]  ;;  %s4703_s16 = sld [smem:[#allocation3 + $0x36]] }
 0x115   : > { %5704 = vst [vmem:[#allocation105_spill] sm:$0xff] %v3762_v3  ;;  %5705 = vst [vmem:[#allocation106_spill] sm:$0xff] %v3765_v21  ;;  %v3789_v3 = vstv %s3678_s1  ;;  %v3792_v21 = vstv %s3696_s0  ;;  %s4705_s18 = sld [smem:[#allocation4 + $0x36]]  ;;  %s4714_s1 = sld [smem:[#allocation3 + $0x37]] }
 0x116   : > { %5706 = vst [vmem:[#allocation107_spill] sm:$0xff] %v3768_v11  ;;  %5707 = vst [vmem:[#allocation108_spill] sm:$0xff] %v3771_v52  ;;  %v2293_v41 = vpop.eup %2292  ;;  %v425_v8 = vpop.permute.xlu1 %424  ;;  %v3795_v11 = vstv %s3680_s7  ;;  %s4716_s7 = sld [smem:[#allocation4 + $0x37]]  ;;  %s4722_s4 = sld [smem:[#allocation3 + $0x3a]] }
 0x117   : > { %5708 = vst [vmem:[#allocation109_spill] sm:$0xff] %v3774_v43  ;;  %5709 = vst [vmem:[#allocation110_spill] sm:$0xff] %v3777_v12  ;;  %v2295_v37 = vpop.eup %2294  ;;  %v373_v52 = vmul.f32 %v2293_v41, %v3614_v46  ;;  %v3800_v12 = vstv %s3710_s17  ;;  %v370_v41 = vand.u32 2147483648, %v3616_v18  ;;  %s4724_s0 = sld [smem:[#allocation4 + $0x3a]]  ;;  %s4735_s17 = sld [smem:[#allocation3 + $0x3b]] }
 0x118   : > { %5710 = vst [vmem:[#allocation111_spill] sm:$0xff] %v3780_v39  ;;  %5711 = vst [vmem:[#allocation112_spill] sm:$0xff] %v3783_v48  ;;  %v3803_v39 = vstv %s3712_s3  ;;  %v377_v48 = vand.u32 2147483648, %v3614_v46  ;;  %v366_v43 = vmul.f32 %v2295_v37, %v3616_v18  ;;  %s4737_s3 = sld [smem:[#allocation4 + $0x3b]] }
 0x119   : > { %5712 = vst [vmem:[#allocation113_spill] sm:$0xff] %v3786_v47  ;;  %5713 = vst [vmem:[#allocation114_spill] sm:$0xff] %v3789_v3  ;;  %v375_v3 = vsel %vm374_vm10, %v3614_v46, %v373_v52  ;;  %v5720_v46 = vld [vmem:[#allocation37_spill] sm:$0xff] }
 0x11a   : > { %5714 = vst [vmem:[#allocation115_spill] sm:$0xff] %v3792_v21  ;;  %5715 = vst [vmem:[#allocation116_spill] sm:$0xff] %v3795_v11  ;;  %v3813_v11 = vsel %vm376_vm11, %v377_v48, %v375_v3  ;;  %v423_v21 = vpop.permute.xlu0 %422  ;;  %v429_v37 = vpop.permute.xlu1 %428 }
 0x11b   : > { %5716 = vst [vmem:[#allocation117_spill] sm:$0xff] %v3800_v12  ;;  %5717 = vst [vmem:[#allocation118_spill] sm:$0xff] %v3803_v39  ;;  %v368_v39 = vsel %vm367_vm12, %v3616_v18, %v366_v43  ;;  %v391_v12 = vand.u32 2147483648, %v3714_v16  ;;  %v394_v47 = vmul.f32 2.0, %v3813_v11  ;;  %v1307_v52 = vmul.f32 %v5720_v46, %v3813_v11  ;;  %v2297_v22 = vpop.eup %2296  ;;  %v5721_v43 = vld [vmem:[#allocation38_spill] sm:$0xff] }
 0x11c   : > { %5718 = vst [vmem:[#allocation119_spill] sm:$0xff] %v3813_v11  ;;  %v3819_v56 = vsel %vm369_vm13, %v370_v41, %v368_v39  ;;  %v384_v18 = vand.u32 2147483648, %v3716_v6  ;;  %v1311_v48 = vmul.f32 %v5721_v43, %v3813_v11  ;;  %v2299_v24 = vpop.eup %2298  ;;  %v387_v39 = vmul.f32 %v2297_v22, %v3714_v16  ;;  %v5722_v43 = vld [vmem:[#allocation49_spill] sm:$0xff] }
 0x11d   : > { %5719 = vst [vmem:[#allocation120_spill] sm:$0xff] %v3819_v56  ;;  %v393_v3 = vmul.f32 2.0, %v3819_v56  ;;  %v398_v15 = vmul.f32 %v394_v47, %v3813_v11  ;;  %v3834_v41 = vsel %vm413_vm9, %v3690_v61, %v425_v8  ;;  %v3839_v46 = vsel %vm413_vm9, %v3692_v59, %v423_v21  ;;  %v5725_v61 = vld [vmem:[#allocation35_spill] sm:$0xff] }
 0x11e   : > { %v380_v28 = vmul.f32 %v2299_v24, %v3716_v6  ;;  %v1306_v58 = vmul.f32 %v5722_v43, %v3819_v56  ;;  %v1310_v22 = vmul.f32 %v5723_v5, %v3819_v56  ;;  %v389_v8 = vsel %vm388_vm14, %v3714_v16, %v387_v39  ;;  %v3858_v21 = vpop.permute.xlu1 %436  ;;  %v5728_v39 = vld [vmem:[#allocation36_spill] sm:$0xff] }
 0x11f   : > { %v397_v29 = vmul.f32 %v393_v3, %v3819_v56  ;;  %v3847_v4 = vadd.f32 -1.0, %v398_v15  ;;  %v1315_v42 = vadd.f32 %v1307_v52, %v5725_v61  ;;  %v3856_v59 = vsel %vm413_vm9, %v3737_v19, %v429_v37 }
 0x120   : > { %v3864_v5 = vsel %vm390_vm15, %v391_v12, %v389_v8  ;;  %v382_v15 = vsel %vm381_vm0, %v3716_v6, %v380_v28  ;;  %v1319_v43 = vadd.f32 %v1311_v48, %v5728_v39  ;;  %v5731_v28 = vld [vmem:[#allocation41_spill] sm:$0xff]  ;;  %v5732_v8 = vld [vmem:[#allocation52_spill] sm:$0xff] }
 0x121   : > { %5724 = vst [vmem:[#allocation37_spill] sm:$0xff] %v3847_v4  ;;  %v3860_v24 = vadd.f32 -1.0, %v397_v29  ;;  %5727 = vst [vmem:[#allocation49_spill] sm:$0xff] %v3864_v5  ;;  %v406_v52 = vmul.f32 %v3847_v4, %v394_v47  ;;  %v396_v61 = vmul.f32 2.0, %v3864_v5  ;;  %v3874_v19 = vsel %vm383_vm1, %v384_v18, %v382_v15  ;;  %v5730_v29 = vld [vmem:[#allocation39_spill] sm:$0xff]  ;;  %v5734_v15 = vld [vmem:[#allocation45_spill] sm:$0xff] }
 0x122   : > { %5729 = vst [vmem:[#allocation50_spill] sm:$0xff] %v3874_v19  ;;  %v1387_v37 = vmul.f32 %v3847_v4, %v5730_v29  ;;  %v395_v16 = vmul.f32 2.0, %v3874_v19  ;;  %v1391_v48 = vmul.f32 %v3847_v4, %v5731_v28  ;;  %v1314_v39 = vadd.f32 %v1306_v58, %v5734_v15  ;;  %v5735_v29 = vld [vmem:[#allocation54_spill] sm:$0xff]  ;;  %v427_v15 = vpop.permute.xlu0 %426  ;;  %v3906_v1 = vpop.permute.xlu1 %440 }
 0x123   : > { %5726 = vst [vmem:[#allocation38_spill] sm:$0xff] %v3860_v24  ;;  %v405_v12 = vmul.f32 %v3860_v24, %v393_v3  ;;  %v1386_v47 = vmul.f32 %v3860_v24, %v5732_v8  ;;  %v3889_v6 = vsub.f32 %v406_v52, %v3813_v11  ;;  %v400_v18 = vmul.f32 %v396_v61, %v3864_v5  ;;  %v5739_v52 = vld [vmem:[#allocation43_spill] sm:$0xff] }
 0x124   : > { %v1390_v3 = vmul.f32 %v3860_v24, %v5735_v29  ;;  %v399_v28 = vmul.f32 %v395_v16, %v3874_v19  ;;  %v1395_v30 = vadd.f32 %v1387_v37, %v1315_v42  ;;  %v1318_v8 = vadd.f32 %v1310_v22, %v5737_v62  ;;  %5741 = vst [vmem:[#allocation41_spill] sm:$0xff] %v3906_v1  ;;  %v5743_v42 = vld [vmem:[#allocation55_spill] sm:$0xff] }
 0x125   : > { %5733 = vst [vmem:[#allocation35_spill] sm:$0xff] %v3889_v6  ;;  %v3896_v31 = vsub.f32 %v405_v12, %v3819_v56  ;;  %v3900_v63 = vadd.f32 -1.0, %v400_v18  ;;  %v1399_v35 = vadd.f32 %v1391_v48, %v1319_v43  ;;  %v1467_v27 = vmul.f32 %v5739_v52, %v3889_v6 }
 0x126   : > { %v1471_v58 = vmul.f32 %v5740_v51, %v3889_v6  ;;  %v3908_v12 = vadd.f32 -1.0, %v399_v28  ;;  %v1394_v29 = vadd.f32 %v1386_v47, %v1314_v39  ;;  %v1398_v48 = vadd.f32 %v1390_v3, %v1318_v8 }
 0x127   : > { %5736 = vst [vmem:[#allocation36_spill] sm:$0xff] %v3896_v31  ;;  %5738 = vst [vmem:[#allocation39_spill] sm:$0xff] %v3900_v63  ;;  %v1466_v37 = vmul.f32 %v5743_v42, %v3896_v31  ;;  %v1470_v62 = vmul.f32 %v3308_v20, %v3896_v31  ;;  %v408_v22 = vmul.f32 %v3900_v63, %v396_v61 }
 0x128   : > { %5742 = vst [vmem:[#allocation52_spill] sm:$0xff] %v3908_v12  ;;  %v3915_v43 = vadd.f32 %v1467_v27, %v1395_v30  ;;  %v1309_v51 = vmul.f32 %v3332_v40, %v3864_v5  ;;  %v407_v18 = vmul.f32 %v3908_v12, %v395_v16  ;;  %v3920_v28 = vadd.f32 %v1471_v58, %v1399_v35  ;;  %v445_v58 = vpop.permute.xlu1 %444 }
 0x129   : > { %v1313_v47 = vmul.f32 %v3338_v50, %v3864_v5  ;;  %v3927_v20 = vsel %vm413_vm9, %v3759_v45, %v427_v15  ;;  %v3930_v61 = vsub.f32 %v408_v22, %v3864_v5  ;;  %v3932_v27 = vadd.f32 %v1466_v37, %v1394_v29 }
 0x12a   : > { %5744 = vst [vmem:[#allocation45_spill] sm:$0xff] %v3927_v20  ;;  %v3934_v30 = vadd.f32 %v1470_v62, %v1398_v48  ;;  %v3937_v40 = vstv %s3878_s5  ;;  %v455_v35 = vmul.f32 %v3834_v41, %v3834_v41  ;;  %v3943_v50 = vmul.f32 %v3839_v46, %v3839_v46  ;;  %v5758_v48 = vld [vmem:[#allocation42_spill] sm:$0xff]  ;;  %s4745_s5 = sld [smem:[#allocation4 + $0x3d]] }
 0x12b   : > { %5745 = vst [vmem:[#allocation54_spill] sm:$0xff] %v3930_v61  ;;  %5746 = vst [vmem:[#allocation48_spill] sm:$0xff] %v3932_v27  ;;  %v1389_v45 = vmul.f32 %v3900_v63, %v3340_v2  ;;  %v3948_v16 = vstv %s3886_s15  ;;  %v3952_v39 = vmul.f32 %v3915_v43, %v3834_v41  ;;  %v1317_v3 = vadd.f32 %v1309_v51, %v3322_v33  ;;  %s4747_s15 = sld [smem:[#allocation3 + $0x3e]] }
 0x12c   : > { %5747 = vst [vmem:[#allocation43_spill] sm:$0xff] %v3934_v30  ;;  %5748 = vst [vmem:[#allocation44_spill] sm:$0xff] %v3937_v40  ;;  %v3957_v8 = vmul.f32 %v3856_v59, %v3856_v59  ;;  %v3961_v52 = vmul.f32 %v3927_v20, %v3927_v20  ;;  %v3964_v15 = vsub.f32 %v407_v18, %v3874_v19  ;;  %v5759_v18 = vld [vmem:[#allocation51_spill] sm:$0xff] }
 0x12d   : > { %5749 = vst [vmem:[#allocation55_spill] sm:$0xff] %v3943_v50  ;;  %5750 = vst [vmem:[#allocation121_spill] sm:$0xff] %v3948_v16  ;;  %v3968_v2 = vmul.f32 %v3920_v28, %v3834_v41  ;;  %v1321_v29 = vadd.f32 %v1313_v47, %v3330_v36  ;;  %v1469_v33 = vmul.f32 %v3455_v49, %v3930_v61  ;;  %v5777_v50 = vld [vmem:[#allocation77_spill] sm:$0xff] }
 0x12e   : > { %5751 = vst [vmem:[#allocation122_spill] sm:$0xff] %v3952_v39  ;;  %5752 = vst [vmem:[#allocation123_spill] sm:$0xff] %v3957_v8  ;;  %v3975_v42 = vmul.f32 %v3932_v27, %v3839_v46  ;;  %v3979_v37 = vmul.f32 %v3934_v30, %v3839_v46  ;;  %v1393_v62 = vmul.f32 %v3900_v63, %v3394_v25  ;;  %v5764_v8 = vld [vmem:[#allocation59_spill] sm:$0xff]  ;;  %v5772_v27 = vld [vmem:[#allocation73_spill] sm:$0xff] }
 0x12f   : > { %5753 = vst [vmem:[#allocation124_spill] sm:$0xff] %v3961_v52  ;;  %5754 = vst [vmem:[#allocation125_spill] sm:$0xff] %v3964_v15  ;;  %v1308_v41 = vmul.f32 %v3482_v54, %v3874_v19  ;;  %v1397_v22 = vadd.f32 %v1389_v45, %v1317_v3  ;;  %v1473_v36 = vmul.f32 %v3466_v10, %v3930_v61  ;;  %v5761_v45 = vld [vmem:[#allocation47_spill] sm:$0xff]  ;;  %v5773_v61 = vld [vmem:[#allocation74_spill] sm:$0xff] }
 0x130   : > { %5755 = vst [vmem:[#allocation126_spill] sm:$0xff] %v3968_v2  ;;  %5756 = vst [vmem:[#allocation127_spill] sm:$0xff] %v3975_v42  ;;  %v3990_v49 = vsel %vm413_vm9, %v3858_v21, %v445_v58  ;;  %v519_v51 = vmul.f32 %v5758_v48, %v3813_v11  ;;  %v1312_v46 = vmul.f32 %v3495_v53, %v3874_v19  ;;  %v5762_v58 = vld [vmem:[#allocation58_spill] sm:$0xff]  ;;  %v5774_v63 = vld [vmem:[#allocation75_spill] sm:$0xff] }
 0x131   : > { %5757 = vst [vmem:[#allocation128_spill] sm:$0xff] %v3979_v37  ;;  %v1388_v25 = vmul.f32 %v3908_v12, %v3497_v34  ;;  %v459_v54 = vmul.f32 %v3990_v49, %v3990_v49  ;;  %v530_v10 = vmul.f32 %v5759_v18, %v3813_v11  ;;  %v4002_v47 = vadd.f32 %v1469_v33, %v1397_v22  ;;  %v5763_v33 = vld [vmem:[#allocation56_spill] sm:$0xff] }
 0x132   : > { %v4006_v21 = vmul.f32 %v3908_v12, %v3505_v57  ;;  %v524_v3 = vadd.f32 %v5761_v45, %v519_v51  ;;  %v541_v53 = vmul.f32 %v3847_v4, %v5762_v58  ;;  %v1401_v52 = vadd.f32 %v1393_v62, %v1321_v29 }
 0x133   : > { %5760 = vst [vmem:[#allocation42_spill] sm:$0xff] %v4002_v47  ;;  %v1316_v34 = vadd.f32 %v1308_v41, %v3468_v55  ;;  %v4014_v37 = vmul.f32 %v3554_v44, %v3964_v15  ;;  %v4016_v42 = vadd.f32 %v459_v54, %v455_v35  ;;  %v535_v22 = vadd.f32 %v5763_v33, %v530_v10  ;;  %v5767_v54 = vld [vmem:[#allocation67_spill] sm:$0xff] }
 0x134   : > { %v545_v19 = vadd.f32 %v541_v53, %v524_v3  ;;  %v551_v57 = vmul.f32 %v3847_v4, %v5764_v8  ;;  %v561_v51 = vmul.f32 %v3460_v13, %v3889_v6  ;;  %v4023_v12 = vadd.f32 %v1473_v36, %v1401_v52  ;;  %v5768_v53 = vld [vmem:[#allocation61_spill] sm:$0xff] }
 0x135   : > { %v1320_v29 = vadd.f32 %v1312_v46, %v3480_v17  ;;  %v4028_v55 = vmul.f32 %v3599_v7, %v3964_v15  ;;  %2300 = vrsqrt.f32 %v4016_v42  ;;  %v4033_v44 = vmul.f32 %v4002_v47, %v3856_v59 }
 0x136   : > { %5765 = vst [vmem:[#allocation51_spill] sm:$0xff] %v4023_v12  ;;  %v4035_v35 = vadd.f32 %v1388_v25, %v1316_v34  ;;  %v555_v62 = vadd.f32 %v551_v57, %v535_v22  ;;  %v565_v41 = vadd.f32 %v561_v51, %v545_v19  ;;  %v571_v52 = vmul.f32 %v3471_v0, %v3889_v6  ;;  %v5769_v22 = vld [vmem:[#allocation62_spill] sm:$0xff]  ;;  %v5770_v51 = vld [vmem:[#allocation69_spill] sm:$0xff] }
 0x137   : > { %5766 = vst [vmem:[#allocation47_spill] sm:$0xff] %v4033_v44  ;;  %v583_v17 = vmul.f32 %v3474_v23, %v3813_v11  ;;  %v594_v7 = vmul.f32 %v3513_v14, %v3813_v11  ;;  %v605_v36 = vmul.f32 %v3847_v4, %v3523_v26  ;;  %v615_v46 = vmul.f32 %v3847_v4, %v3526_v38  ;;  %v5771_v44 = vld [vmem:[#allocation68_spill] sm:$0xff] }
 0x138   : > { %v625_v25 = vmul.f32 %v3529_v60, %v3889_v6  ;;  %v635_v19 = vmul.f32 %v3548_v32, %v3889_v6  ;;  %v663_v10 = vmul.f32 %v5767_v54, %v3813_v11  ;;  %vm475_vm2 = vcmp.eq.f32.partialorder %v4016_v42, inf  ;;  %v5784_v32 = vld [vmem:[#allocation27_spill] sm:$0xff] }
 0x139   : > { %v575_v3 = vadd.f32 %v571_v52, %v555_v62  ;;  %v588_v34 = vadd.f32 %v5768_v53, %v583_v17  ;;  %v599_v57 = vadd.f32 %v5769_v22, %v594_v7  ;;  %v674_v15 = vmul.f32 %v5770_v51, %v3813_v11  ;;  %v5775_v52 = vld [vmem:[#allocation72_spill] sm:$0xff] }
 0x13a   : > { %v668_v47 = vadd.f32 %v5771_v44, %v663_v10  ;;  %v685_v1 = vmul.f32 %v3847_v4, %v5772_v27  ;;  %v695_v30 = vmul.f32 %v3847_v4, %v5773_v61  ;;  %v705_v2 = vmul.f32 %v5774_v63, %v3889_v6  ;;  %v5776_v7 = vld [vmem:[#allocation76_spill] sm:$0xff]  ;;  %v5779_v27 = vld [vmem:[#allocation85_spill] sm:$0xff] }
 0x13b   : > { %v609_v20 = vadd.f32 %v605_v36, %v588_v34  ;;  %v619_v62 = vadd.f32 %v615_v46, %v599_v57  ;;  %v679_v17 = vadd.f32 %v5775_v52, %v674_v15  ;;  %v715_v5 = vmul.f32 %v5776_v7, %v3889_v6  ;;  %v5780_v36 = vld [vmem:[#allocation86_spill] sm:$0xff]  ;;  %v5782_v7 = vld [vmem:[#allocation84_spill] sm:$0xff] }
 0x13c   : > { %v689_v39 = vadd.f32 %v685_v1, %v668_v47  ;;  %v743_v10 = vmul.f32 %v5777_v50, %v3813_v11  ;;  %v754_v44 = vmul.f32 %v5778_v9, %v3813_v11  ;;  %v765_v61 = vmul.f32 %v3847_v4, %v5779_v27  ;;  %v5781_v34 = vld [vmem:[#allocation78_spill] sm:$0xff]  ;;  %v5783_v47 = vld [vmem:[#allocation87_spill] sm:$0xff] }
 0x13d   : > { %v629_v51 = vadd.f32 %v625_v25, %v609_v20  ;;  %v639_v54 = vadd.f32 %v635_v19, %v619_v62  ;;  %v699_v63 = vadd.f32 %v695_v30, %v679_v17  ;;  %v775_v46 = vmul.f32 %v3847_v4, %v5780_v36  ;;  %v5785_v20 = vld [vmem:[#allocation88_spill] sm:$0xff]  ;;  %v5786_v17 = vld [vmem:[#allocation29_spill] sm:$0xff] }
 0x13e   : > { %v709_v15 = vadd.f32 %v705_v2, %v689_v39  ;;  %v748_v57 = vadd.f32 %v5781_v34, %v743_v10  ;;  %v759_v1 = vadd.f32 %v5782_v7, %v754_v44  ;;  %v785_v50 = vmul.f32 %v5783_v47, %v3889_v6  ;;  %v5822_v7 = vld [vmem:[#allocation116_spill] sm:$0xff] }
 0x13f   : > { %v2301_v52 = vpop.eup %2300  ;;  %v643_v11 = vmul.f32 %v629_v51, %v5784_v32  ;;  %v647_v9 = vmul.f32 %v639_v54, %v5784_v32  ;;  %v719_v27 = vadd.f32 %v715_v5, %v699_v63  ;;  %v795_v30 = vmul.f32 %v5785_v20, %v3889_v6  ;;  %v5815_v20 = vld [vmem:[#allocation114_spill] sm:$0xff] }
 0x140   : > { %v474_v25 = vmul.f32 %v2301_v52, %v4016_v42  ;;  %v478_v39 = vand.u32 2147483648, %v4016_v42  ;;  %v769_v2 = vadd.f32 %v765_v61, %v748_v57  ;;  %v779_v19 = vadd.f32 %v775_v46, %v759_v1  ;;  %v5790_v57 = vld [vmem:[#allocation91_spill] sm:$0xff] }
 0x141   : > { %v651_v62 = vadd.f32 %v643_v11, %v565_v41  ;;  %v655_v44 = vadd.f32 %v647_v9, %v575_v3  ;;  %v723_v10 = vmul.f32 %v5786_v17, %v709_v15  ;;  %v727_v4 = vmul.f32 %v5786_v17, %v719_v27  ;;  %v5788_v11 = vld [vmem:[#allocation33_spill] sm:$0xff] }
 0x142   : > { %v476_v54 = vsel %vm475_vm2, %v4016_v42, %v474_v25  ;;  %vm477_vm3 = vcmp.eq.f32.partialorder %v4016_v42, 0.0  ;;  %v789_v63 = vadd.f32 %v785_v50, %v769_v2  ;;  %v799_v5 = vadd.f32 %v795_v30, %v779_v19  ;;  %v5789_v3 = vld [vmem:[#allocation89_spill] sm:$0xff] }
 0x143   : > { %v1400_v51 = vadd.f32 %v4006_v21, %v1320_v29  ;;  %v4093_v52 = vsel %vm477_vm3, %v478_v39, %v476_v54  ;;  %v731_v61 = vadd.f32 %v723_v10, %v651_v62  ;;  %v735_v46 = vadd.f32 %v727_v4, %v655_v44  ;;  %v5791_v50 = vld [vmem:[#allocation97_spill] sm:$0xff]  ;;  %v5792_v29 = vld [vmem:[#allocation99_spill] sm:$0xff]  ;;  %v5798_v10 = vld [vmem:[#allocation90_spill] sm:$0xff] }
 0x144   : > { %5787 = vst [vmem:[#allocation58_spill] sm:$0xff] %v4093_v52  ;;  %v495_v9 = vmul.f32 2.0, %v4093_v52  ;;  %v803_v41 = vmul.f32 %v789_v63, %v5788_v11  ;;  %v807_v27 = vmul.f32 %v799_v5, %v5788_v11  ;;  %v847_v15 = vmul.f32 %v5789_v3, %v4093_v52  ;;  %v5793_v4 = vld [vmem:[#allocation105_spill] sm:$0xff]  ;;  %v5799_v63 = vld [vmem:[#allocation92_spill] sm:$0xff] }
 0x145   : > { %v858_v42 = vmul.f32 %v5790_v57, %v4093_v52  ;;  %v911_v21 = vmul.f32 %v5791_v50, %v4093_v52  ;;  %v922_v1 = vmul.f32 %v5792_v29, %v4093_v52  ;;  %v991_v30 = vmul.f32 %v5793_v4, %v4093_v52  ;;  %v5801_v4 = vld [vmem:[#allocation98_spill] sm:$0xff]  ;;  %v5810_v50 = vld [vmem:[#allocation108_spill] sm:$0xff]  ;;  %v5811_v57 = vld [vmem:[#allocation115_spill] sm:$0xff] }
 0x146   : > { %v4110_v25 = vmul.f32 %v4023_v12, %v3856_v59  ;;  %v499_v39 = vmul.f32 %v495_v9, %v4093_v52  ;;  %v811_v2 = vadd.f32 %v803_v41, %v731_v61  ;;  %v815_v19 = vadd.f32 %v807_v27, %v735_v46  ;;  %v5803_v29 = vld [vmem:[#allocation106_spill] sm:$0xff]  ;;  %v5805_v27 = vld [vmem:[#allocation113_spill] sm:$0xff] }
 0x147   : > { %v4115_v62 = vadd.f32 %v4014_v37, %v4035_v35  ;;  %v4118_v44 = vadd.f32 %v4028_v55, %v1400_v51  ;;  %v852_v54 = vadd.f32 %v5798_v10, %v847_v15  ;;  %v863_v5 = vadd.f32 %v5799_v63, %v858_v42  ;;  %v2308_v46 = vld [vmem:[%s2712_s21 + $0x10] sm:$0xff]  ;;  %v5804_v55 = vld [vmem:[#allocation107_spill] sm:$0xff] }
 0x148   : > { %5795 = vst [vmem:[#allocation56_spill] sm:$0xff] %v4110_v25  ;;  %v4122_v6 = vadd.f32 -1.0, %v499_v39  ;;  %v916_v59 = vadd.f32 %v5801_v4, %v911_v21  ;;  %v5802_v25 = vld [vmem:[#allocation100_spill] sm:$0xff]  ;;  %v996_v61 = vadd.f32 %v5803_v29, %v991_v30  ;;  %v4128_v41 = vmul.f32 %v2308_v46, %v811_v2  ;;  %v2309_v37 = vld [vmem:[%s5794_s26 + $0x10] sm:$0xff]  ;;  %v5809_v63 = vld [vmem:[#allocation102_spill] sm:$0xff] }
 0x149   : > { %5796 = vst [vmem:[#allocation59_spill] sm:$0xff] %v4115_v62  ;;  %5797 = vst [vmem:[#allocation61_spill] sm:$0xff] %v4118_v44  ;;  %v927_v12 = vadd.f32 %v5802_v25, %v922_v1  ;;  %v4131_v35 = vmul.f32 %v2309_v37, %v815_v19  ;;  %v1002_v51 = vmul.f32 %v5804_v55, %v4093_v52  ;;  %v5806_v21 = vld [vmem:[#allocation93_spill] sm:$0xff]  ;;  %v5807_v25 = vld [vmem:[#allocation94_spill] sm:$0xff] }
 0x14a   : > { %5800 = vst [vmem:[#allocation27_spill] sm:$0xff] %v4122_v6  ;;  %v1071_v15 = vmul.f32 %v5805_v27, %v4093_v52  ;;  %v507_v42 = vmul.f32 %v4122_v6, %v495_v9  ;;  %v831_v39 = vmul.f32 %v2308_v46, %v815_v19  ;;  %v869_v1 = vmul.f32 %v4122_v6, %v5806_v21  ;;  %v5808_v29 = vld [vmem:[#allocation101_spill] sm:$0xff]  ;;  %v5814_v62 = vld [vmem:[#allocation110_spill] sm:$0xff] }
 0x14b   : > { %v879_v30 = vmul.f32 %v4122_v6, %v5807_v25  ;;  %v933_v4 = vmul.f32 %v4122_v6, %v5808_v29  ;;  %v943_v10 = vmul.f32 %v4122_v6, %v5809_v63  ;;  %v1007_v55 = vadd.f32 %v5810_v50, %v1002_v51  ;;  %v5813_v21 = vld [vmem:[#allocation109_spill] sm:$0xff]  ;;  %v5816_v51 = vld [vmem:[#allocation95_spill] sm:$0xff] }
 0x14c   : > { %v1082_v27 = vmul.f32 %v5811_v57, %v4093_v52  ;;  %v4150_v9 = vsub.f32 %v507_v42, %v4093_v52  ;;  %v873_v19 = vadd.f32 %v869_v1, %v852_v54  ;;  %v1013_v3 = vmul.f32 %v4122_v6, %v5813_v21  ;;  %v5817_v57 = vld [vmem:[#allocation96_spill] sm:$0xff]  ;;  %v5818_v42 = vld [vmem:[#allocation103_spill] sm:$0xff] }
 0x14d   : > { %v883_v46 = vadd.f32 %v879_v30, %v863_v5  ;;  %v937_v25 = vadd.f32 %v933_v4, %v916_v59  ;;  %v947_v44 = vadd.f32 %v943_v10, %v927_v12  ;;  %v1023_v29 = vmul.f32 %v4122_v6, %v5814_v62  ;;  %v5819_v5 = vld [vmem:[#allocation104_spill] sm:$0xff]  ;;  %v5820_v12 = vld [vmem:[#allocation111_spill] sm:$0xff] }
 0x14e   : > { %5812 = vst [vmem:[#allocation29_spill] sm:$0xff] %v4150_v9  ;;  %v1076_v63 = vadd.f32 %v5815_v20, %v1071_v15  ;;  %v889_v50 = vmul.f32 %v5816_v51, %v4150_v9  ;;  %v899_v47 = vmul.f32 %v5817_v57, %v4150_v9  ;;  %v953_v54 = vmul.f32 %v5818_v42, %v4150_v9  ;;  %v5821_v59 = vld [vmem:[#allocation112_spill] sm:$0xff]  ;;  %v5823_v42 = vld [vmem:[#allocation117_spill] sm:$0xff] }
 0x14f   : > { %v963_v1 = vmul.f32 %v5819_v5, %v4150_v9  ;;  %v1017_v30 = vadd.f32 %v1013_v3, %v996_v61  ;;  %v1027_v4 = vadd.f32 %v1023_v29, %v1007_v55  ;;  %v1033_v10 = vmul.f32 %v5820_v12, %v4150_v9  ;;  %v5824_v61 = vld [vmem:[#allocation118_spill] sm:$0xff] }
 0x150   : > { %v1043_v15 = vmul.f32 %v5821_v59, %v4150_v9  ;;  %v893_v52 = vadd.f32 %v889_v50, %v873_v19  ;;  %v903_v62 = vadd.f32 %v899_v47, %v883_v46  ;;  %v957_v51 = vadd.f32 %v953_v54, %v937_v25  ;;  %v5841_v5 = vld [vmem:[#allocation78_spill] sm:$0xff] }
 0x151   : > { %v967_v21 = vadd.f32 %v963_v1, %v947_v44  ;;  %v1037_v20 = vadd.f32 %v1033_v10, %v1017_v30  ;;  %v1087_v34 = vadd.f32 %v5822_v7, %v1082_v27  ;;  %v1093_v36 = vmul.f32 %v4122_v6, %v5823_v42  ;;  %v4182_v1 = vpop.permute.xlu0 %434 }
 0x152   : > { %v1047_v57 = vadd.f32 %v1043_v15, %v1027_v4  ;;  %v971_v3 = vmul.f32 %v957_v51, %v5784_v32  ;;  %v1103_v55 = vmul.f32 %v4122_v6, %v5824_v61  ;;  %v1113_v50 = vmul.f32 %v3937_v40, %v4150_v9  ;;  %v5837_v61 = vld [vmem:[#allocation77_spill] sm:$0xff] }
 0x153   : > { %v975_v29 = vmul.f32 %v967_v21, %v5784_v32  ;;  %v835_v47 = vmul.f32 %v2309_v37, %v811_v2  ;;  %v1051_v25 = vmul.f32 %v5786_v17, %v1037_v20  ;;  %v1097_v44 = vadd.f32 %v1093_v36, %v1076_v63 }
 0x154   : > { %v1123_v27 = vmul.f32 %v3948_v16, %v4150_v9  ;;  %v979_v19 = vadd.f32 %v971_v3, %v893_v52  ;;  %v1055_v54 = vmul.f32 %v5786_v17, %v1047_v57  ;;  %v1107_v51 = vadd.f32 %v1103_v55, %v1087_v34  ;;  %v5835_v16 = vld [vmem:[#allocation75_spill] sm:$0xff] }
 0x155   : > { %v983_v46 = vadd.f32 %v975_v29, %v903_v62  ;;  %v1117_v32 = vadd.f32 %v1113_v50, %v1097_v44  ;;  %v4186_v21 = vmul.f32 %v3920_v28, %v3990_v49  ;;  %v518_v2 = vmul.f32 %v5758_v48, %v3819_v56  ;;  %v4218_v29 = vpop.permute.xlu0 %438  ;;  %v5826_v44 = vld [vmem:[#allocation64_spill] sm:$0xff] }
 0x156   : > { %v529_v36 = vmul.f32 %v5759_v18, %v3819_v56  ;;  %v1059_v20 = vadd.f32 %v1051_v25, %v979_v19  ;;  %v1127_v52 = vadd.f32 %v1123_v27, %v1107_v51  ;;  %v4194_v17 = vmul.f32 %v3915_v43, %v3990_v49  ;;  %5825 = vst [vmem:[#allocation33_spill] sm:$0xff] %v4218_v29  ;;  %v5827_v19 = vld [vmem:[#allocation70_spill] sm:$0xff] }
 0x157   : > { %v1063_v63 = vadd.f32 %v1055_v54, %v983_v46  ;;  %v827_v34 = vsub.f32 %v4128_v41, %v4131_v35  ;;  %v1131_v57 = vmul.f32 %v1117_v32, %v5788_v11  ;;  %v540_v28 = vmul.f32 %v3860_v24, %v5762_v58 }
 0x158   : > { %v550_v62 = vmul.f32 %v3860_v24, %v5764_v8  ;;  %v839_v37 = vadd.f32 %v835_v47, %v831_v39  ;;  %v1135_v30 = vmul.f32 %v1127_v52, %v5788_v11  ;;  %v582_v4 = vmul.f32 %v3474_v23, %v3819_v56  ;;  %v5830_v52 = vld [vmem:[#allocation69_spill] sm:$0xff] }
 0x159   : > { %v593_v43 = vmul.f32 %v3513_v14, %v3819_v56  ;;  %v1139_v49 = vadd.f32 %v1131_v57, %v1059_v20  ;;  %v523_v41 = vadd.f32 %v5761_v45, %v518_v2  ;;  %v534_v35 = vadd.f32 %v5763_v33, %v529_v36  ;;  %v5828_v2 = vld [vmem:[#allocation66_spill] sm:$0xff]  ;;  %v5829_v20 = vld [vmem:[#allocation67_spill] sm:$0xff] }
 0x15a   : > { %v560_v10 = vmul.f32 %v3460_v13, %v3896_v31  ;;  %v1143_v15 = vadd.f32 %v1135_v30, %v1063_v63  ;;  %v570_v39 = vmul.f32 %v3471_v0, %v3896_v31  ;;  %v604_v11 = vmul.f32 %v3860_v24, %v3523_v26  ;;  %v5831_v30 = vld [vmem:[#allocation73_spill] sm:$0xff] }
 0x15b   : > { %v614_v3 = vmul.f32 %v3860_v24, %v3526_v38  ;;  %v544_v55 = vadd.f32 %v540_v28, %v523_v41  ;;  %v554_v50 = vadd.f32 %v550_v62, %v534_v35  ;;  %v587_v47 = vadd.f32 %v5768_v53, %v582_v4 }
 0x15c   : > { %v598_v25 = vadd.f32 %v5769_v22, %v593_v43  ;;  %v1147_v27 = vmul.f32 %v1139_v49, %v5826_v44  ;;  %v1151_v46 = vmul.f32 %v1143_v15, %v5827_v19  ;;  %v1159_v54 = vmul.f32 %v1143_v15, %v5826_v44  ;;  %v5832_v43 = vld [vmem:[#allocation74_spill] sm:$0xff]  ;;  %v5833_v15 = vld [vmem:[#allocation68_spill] sm:$0xff] }
 0x15d   : > { %v1163_v51 = vmul.f32 %v1139_v49, %v5827_v19  ;;  %v624_v32 = vmul.f32 %v3529_v60, %v3896_v31  ;;  %v634_v36 = vmul.f32 %v5828_v2, %v3896_v31  ;;  %v662_v63 = vmul.f32 %v5829_v20, %v3819_v56  ;;  %v5834_v19 = vld [vmem:[#allocation72_spill] sm:$0xff] }
 0x15e   : > { %v673_v57 = vmul.f32 %v5830_v52, %v3819_v56  ;;  %v608_v28 = vadd.f32 %v604_v11, %v587_v47  ;;  %v618_v62 = vadd.f32 %v614_v3, %v598_v25  ;;  %v684_v4 = vmul.f32 %v3860_v24, %v5831_v30  ;;  %v5836_v11 = vld [vmem:[#allocation76_spill] sm:$0xff] }
 0x15f   : > { %v694_v49 = vmul.f32 %v3860_v24, %v5832_v43  ;;  %v564_v41 = vadd.f32 %v560_v10, %v544_v55  ;;  %v574_v35 = vadd.f32 %v570_v39, %v554_v50  ;;  %v667_v44 = vadd.f32 %v5833_v15, %v662_v63  ;;  %v5838_v10 = vld [vmem:[#allocation83_spill] sm:$0xff]  ;;  %v443_v55 = vpop.permute.xlu0 %442 }
 0x160   : > { %v678_v9 = vadd.f32 %v5834_v19, %v673_v57  ;;  %v628_v6 = vadd.f32 %v624_v32, %v608_v28  ;;  %v638_v29 = vadd.f32 %v634_v36, %v618_v62  ;;  %v704_v40 = vmul.f32 %v5835_v16, %v3896_v31  ;;  %v5839_v57 = vld [vmem:[#allocation85_spill] sm:$0xff]  ;;  %v5840_v36 = vld [vmem:[#allocation86_spill] sm:$0xff] }
 0x161   : > { %v714_v3 = vmul.f32 %v5836_v11, %v3896_v31  ;;  %v688_v47 = vadd.f32 %v684_v4, %v667_v44  ;;  %v742_v59 = vmul.f32 %v5837_v61, %v3819_v56  ;;  %v753_v39 = vmul.f32 %v5838_v10, %v3819_v56  ;;  %v5843_v44 = vld [vmem:[#allocation87_spill] sm:$0xff]  ;;  %v5844_v56 = vld [vmem:[#allocation88_spill] sm:$0xff] }
 0x162   : > { %v698_v25 = vadd.f32 %v694_v49, %v678_v9  ;;  %v1155_v50 = vsub.f32 %v1147_v27, %v1151_v46  ;;  %v1167_v63 = vadd.f32 %v1163_v51, %v1159_v54  ;;  %v764_v32 = vmul.f32 %v3860_v24, %v5839_v57  ;;  %v5842_v9 = vld [vmem:[#allocation84_spill] sm:$0xff] }
 0x163   : > { %v774_v28 = vmul.f32 %v3860_v24, %v5840_v36  ;;  %v708_v62 = vadd.f32 %v704_v40, %v688_v47  ;;  %v747_v4 = vadd.f32 %v5841_v5, %v742_v59  ;;  %v758_v49 = vadd.f32 %v5842_v9, %v753_v39  ;;  %v5846_v54 = vld [vmem:[#allocation28_spill] sm:$0xff]  ;;  %v5848_v9 = vld [vmem:[#allocation55_spill] sm:$0xff] }
 0x164   : > { %v718_v12 = vadd.f32 %v714_v3, %v698_v25  ;;  %v784_v42 = vmul.f32 %v5843_v44, %v3896_v31  ;;  %v794_v7 = vmul.f32 %v5844_v56, %v3896_v31  ;;  %v4261_v46 = vsel %vm413_vm9, %v4182_v1, %v443_v55  ;;  %v5847_v44 = vld [vmem:[#allocation34_spill] sm:$0xff] }
 0x165   : > { %v642_v51 = vmul.f32 %v628_v6, %v5846_v54  ;;  %v768_v24 = vadd.f32 %v764_v32, %v747_v4  ;;  %v778_v40 = vadd.f32 %v774_v28, %v758_v49  ;;  %v458_v59 = vmul.f32 %v4261_v46, %v4261_v46  ;;  %v5849_v6 = vld [vmem:[#allocation122_spill] sm:$0xff]  ;;  %v5850_v4 = vld [vmem:[#allocation49_spill] sm:$0xff]  ;;  %v5860_v49 = vld [vmem:[#allocation39_spill] sm:$0xff] }
 0x166   : > { %v646_v3 = vmul.f32 %v638_v29, %v5846_v54  ;;  %v1171_v47 = vadd.f32 %v1155_v50, %v827_v34  ;;  %v1175_v25 = vadd.f32 %v1167_v63, %v839_v37  ;;  %v722_v36 = vmul.f32 %v5847_v44, %v708_v62  ;;  %v5851_v34 = vld [vmem:[#allocation45_spill] sm:$0xff]  ;;  %v5852_v37 = vld [vmem:[#allocation59_spill] sm:$0xff]  ;;  %v5858_v50 = vld [vmem:[#allocation40_spill] sm:$0xff] }
 0x167   : > { %v650_v39 = vadd.f32 %v642_v51, %v564_v41  ;;  %v788_v31 = vadd.f32 %v784_v42, %v768_v24  ;;  %v798_v56 = vadd.f32 %v794_v7, %v778_v40  ;;  %v4269_v27 = vadd.f32 %v458_v59, %v5848_v9  ;;  %v5854_v24 = vld [vmem:[#allocation61_spill] sm:$0xff]  ;;  %v5856_v42 = vld [vmem:[#allocation126_spill] sm:$0xff] }
 0x168   : > { %v654_v1 = vadd.f32 %v646_v3, %v574_v35  ;;  %v1491_v55 = vsub.f32 %v5849_v6, %v4186_v21  ;;  %v726_v32 = vmul.f32 %v5847_v44, %v718_v12  ;;  %v521_v29 = vmul.f32 %v5758_v48, %v5850_v4  ;;  %v5861_v3 = vld [vmem:[#allocation43_spill] sm:$0xff] }
 0x169   : > { %v730_v28 = vadd.f32 %v722_v36, %v650_v39  ;;  %v4278_v41 = vmul.f32 %v5852_v37, %v5851_v34  ;;  %v4282_v7 = vmul.f32 %v5854_v24, %v5851_v34  ;;  %v1503_v35 = vadd.f32 %v4194_v17, %v5856_v42  ;;  %v2311_v42 = vld [vmem:[%s5794_s26 + $0x8] sm:$0xff]  ;;  %v5863_v24 = vld [vmem:[#allocation30_spill] sm:$0xff] }
 0x16a   : > { %2302 = vrsqrt.f32 %v4269_v27  ;;  %v4287_v21 = vadd.f32 %v1491_v55, %v1171_v47  ;;  %v734_v12 = vadd.f32 %v726_v32, %v654_v1  ;;  %v802_v63 = vmul.f32 %v788_v31, %v5858_v50  ;;  %v2310_v32 = vld [vmem:[%s2712_s21 + $0x8] sm:$0xff] }
 0x16b   : > { %5853 = vst [vmem:[#allocation64_spill] sm:$0xff] %v4278_v41  ;;  %5855 = vst [vmem:[#allocation70_spill] sm:$0xff] %v4282_v7  ;;  %v806_v36 = vmul.f32 %v798_v56, %v5858_v50  ;;  %v4291_v62 = vadd.f32 %v1503_v35, %v1175_v25  ;;  %v532_v9 = vmul.f32 %v5759_v18, %v5850_v4  ;;  %vm468_vm4 = vcmp.eq.f32.partialorder %v4269_v27, inf  ;;  %v5862_v25 = vld [vmem:[#allocation54_spill] sm:$0xff] }
 0x16c   : > { %5857 = vst [vmem:[#allocation28_spill] sm:$0xff] %v4287_v21  ;;  %v543_v51 = vmul.f32 %v5860_v49, %v5762_v58  ;;  %v553_v17 = vmul.f32 %v5860_v49, %v5764_v8  ;;  %v810_v40 = vadd.f32 %v802_v63, %v730_v28  ;;  %v4301_v31 = vmul.f32 %v5861_v3, %v4261_v46 }
 0x16d   : > { %5859 = vst [vmem:[#allocation34_spill] sm:$0xff] %v4291_v62  ;;  %v814_v59 = vadd.f32 %v806_v36, %v734_v12  ;;  %v526_v56 = vadd.f32 %v5761_v45, %v521_v29  ;;  %v537_v47 = vadd.f32 %v5763_v33, %v532_v9  ;;  %v563_v39 = vmul.f32 %v3460_v13, %v5862_v25 }
 0x16e   : > { %v585_v1 = vmul.f32 %v3474_v23, %v5850_v4  ;;  %v596_v6 = vmul.f32 %v3513_v14, %v5850_v4  ;;  %vm470_vm5 = vcmp.eq.f32.partialorder %v4269_v27, 0.0  ;;  %v471_v55 = vand.u32 2147483648, %v4269_v27 }
 0x16f   : > { %v4315_v28 = vmul.f32 %v2310_v32, %v810_v40  ;;  %v547_v29 = vadd.f32 %v543_v51, %v526_v56  ;;  %v573_v34 = vmul.f32 %v3471_v0, %v5862_v25  ;;  %v4320_v35 = vmul.f32 %v2311_v42, %v814_v59 }
 0x170   : > { %v4322_v12 = vmul.f32 %v2310_v32, %v814_v59  ;;  %v4324_v63 = vmul.f32 %v2311_v42, %v810_v40  ;;  %v557_v36 = vadd.f32 %v553_v17, %v537_v47  ;;  %v590_v9 = vadd.f32 %v5768_v53, %v585_v1 }
 0x171   : > { %v601_v3 = vadd.f32 %v5769_v22, %v596_v6  ;;  %v607_v62 = vmul.f32 %v5860_v49, %v3523_v26  ;;  %v617_v51 = vmul.f32 %v5860_v49, %v3526_v38  ;;  %v567_v56 = vadd.f32 %v563_v39, %v547_v29 }
 0x172   : > { %v627_v21 = vmul.f32 %v3529_v60, %v5862_v25  ;;  %v637_v59 = vmul.f32 %v5828_v2, %v5862_v25  ;;  %v665_v17 = vmul.f32 %v5829_v20, %v5850_v4  ;;  %v676_v1 = vmul.f32 %v5830_v52, %v5850_v4  ;;  %v5880_v20 = vld [vmem:[#allocation114_spill] sm:$0xff]  ;;  %v5881_v2 = vld [vmem:[#allocation115_spill] sm:$0xff] }
 0x173   : > { %v611_v40 = vadd.f32 %v607_v62, %v590_v9  ;;  %v621_v47 = vadd.f32 %v617_v51, %v601_v3  ;;  %v687_v6 = vmul.f32 %v5860_v49, %v5831_v30  ;;  %v577_v42 = vadd.f32 %v573_v34, %v557_v36  ;;  %v5878_v30 = vld [vmem:[#allocation108_spill] sm:$0xff] }
 0x174   : > { %v2303_v32 = vpop.eup %2302  ;;  %v670_v39 = vadd.f32 %v5833_v15, %v665_v17  ;;  %v697_v29 = vmul.f32 %v5860_v49, %v5832_v43  ;;  %v707_v7 = vmul.f32 %v5835_v16, %v5862_v25  ;;  %v717_v3 = vmul.f32 %v5836_v11, %v5862_v25  ;;  %v5874_v11 = vld [vmem:[#allocation84_spill] sm:$0xff]  ;;  %v5877_v43 = vld [vmem:[#allocation106_spill] sm:$0xff] }
 0x175   : > { %v467_v41 = vmul.f32 %v2303_v32, %v4269_v27  ;;  %v631_v62 = vadd.f32 %v627_v21, %v611_v40  ;;  %v641_v9 = vadd.f32 %v637_v59, %v621_v47  ;;  %v681_v51 = vadd.f32 %v5834_v19, %v676_v1  ;;  %v5875_v19 = vld [vmem:[#allocation98_spill] sm:$0xff] }
 0x176   : > { %v691_v37 = vadd.f32 %v687_v6, %v670_v39  ;;  %v745_v34 = vmul.f32 %v5837_v61, %v5850_v4  ;;  %v756_v36 = vmul.f32 %v5838_v10, %v5850_v4  ;;  %v767_v59 = vmul.f32 %v5860_v49, %v5839_v57  ;;  %v5865_v4 = vld [vmem:[#allocation89_spill] sm:$0xff]  ;;  %v5868_v57 = vld [vmem:[#allocation99_spill] sm:$0xff] }
 0x177   : > { %v469_v17 = vsel %vm468_vm4, %v4269_v27, %v467_v41  ;;  %v645_v32 = vmul.f32 %v631_v62, %v5863_v24  ;;  %v649_v21 = vmul.f32 %v641_v9, %v5863_v24  ;;  %v701_v47 = vadd.f32 %v697_v29, %v681_v51  ;;  %v5866_v62 = vld [vmem:[#allocation91_spill] sm:$0xff]  ;;  %v5867_v9 = vld [vmem:[#allocation97_spill] sm:$0xff] }
 0x178   : > { %v4364_v40 = vsel %vm470_vm5, %v471_v55, %v469_v17  ;;  %v711_v1 = vadd.f32 %v707_v7, %v691_v37  ;;  %v750_v6 = vadd.f32 %v5841_v5, %v745_v34  ;;  %v5869_v55 = vld [vmem:[#allocation105_spill] sm:$0xff]  ;;  %v5870_v37 = vld [vmem:[#allocation107_spill] sm:$0xff]  ;;  %v5872_v5 = vld [vmem:[#allocation90_spill] sm:$0xff] }
 0x179   : > { %5864 = vst [vmem:[#allocation55_spill] sm:$0xff] %v4364_v40  ;;  %v494_v39 = vmul.f32 2.0, %v4364_v40  ;;  %v846_v41 = vmul.f32 %v5865_v4, %v4364_v40  ;;  %v857_v10 = vmul.f32 %v5866_v62, %v4364_v40  ;;  %v910_v24 = vmul.f32 %v5867_v9, %v4364_v40  ;;  %v5871_v51 = vld [vmem:[#allocation113_spill] sm:$0xff]  ;;  %v5873_v62 = vld [vmem:[#allocation92_spill] sm:$0xff] }
 0x17a   : > { %v921_v27 = vmul.f32 %v5868_v57, %v4364_v40  ;;  %v990_v29 = vmul.f32 %v5869_v55, %v4364_v40  ;;  %v1001_v7 = vmul.f32 %v5870_v37, %v4364_v40  ;;  %v1070_v34 = vmul.f32 %v5871_v51, %v4364_v40  ;;  %v5876_v57 = vld [vmem:[#allocation100_spill] sm:$0xff] }
 0x17b   : > { %v498_v17 = vmul.f32 %v494_v39, %v4364_v40  ;;  %v851_v4 = vadd.f32 %v5872_v5, %v846_v41  ;;  %v862_v61 = vadd.f32 %v5873_v62, %v857_v10  ;;  %v761_v9 = vadd.f32 %v5874_v11, %v756_v36  ;;  %v5882_v62 = vld [vmem:[#allocation46_spill] sm:$0xff] }
 0x17c   : > { %v915_v15 = vadd.f32 %v5875_v19, %v910_v24  ;;  %v926_v16 = vadd.f32 %v5876_v57, %v921_v27  ;;  %v995_v55 = vadd.f32 %v5877_v43, %v990_v29  ;;  %v1006_v52 = vadd.f32 %v5878_v30, %v1001_v7  ;;  %v5883_v27 = vld [vmem:[#allocation93_spill] sm:$0xff]  ;;  %v5884_v43 = vld [vmem:[#allocation94_spill] sm:$0xff] }
 0x17d   : > { %v4390_v37 = vadd.f32 -1.0, %v498_v17  ;;  %v1075_v51 = vadd.f32 %v5880_v20, %v1070_v34  ;;  %v1081_v22 = vmul.f32 %v5881_v2, %v4364_v40  ;;  %v653_v41 = vadd.f32 %v645_v32, %v567_v56  ;;  %v5885_v17 = vld [vmem:[#allocation101_spill] sm:$0xff]  ;;  %v5886_v20 = vld [vmem:[#allocation102_spill] sm:$0xff] }
 0x17e   : > { %v657_v5 = vadd.f32 %v649_v21, %v577_v42  ;;  %v721_v10 = vadd.f32 %v717_v3, %v701_v47  ;;  %v725_v36 = vmul.f32 %v5882_v62, %v711_v1  ;;  %v771_v11 = vadd.f32 %v767_v59, %v750_v6  ;;  %v5887_v56 = vld [vmem:[#allocation109_spill] sm:$0xff]  ;;  %v5888_v3 = vld [vmem:[#allocation110_spill] sm:$0xff] }
 0x17f   : > { %5879 = vst [vmem:[#allocation122_spill] sm:$0xff] %v4390_v37  ;;  %v506_v24 = vmul.f32 %v4390_v37, %v494_v39  ;;  %v868_v29 = vmul.f32 %v4390_v37, %v5883_v27  ;;  %v878_v7 = vmul.f32 %v4390_v37, %v5884_v43  ;;  %v932_v34 = vmul.f32 %v4390_v37, %v5885_v17  ;;  %v5889_v21 = vld [vmem:[#allocation86_spill] sm:$0xff]  ;;  %v5891_v39 = vld [vmem:[#allocation116_spill] sm:$0xff] }
 0x180   : > { %v942_v2 = vmul.f32 %v4390_v37, %v5886_v20  ;;  %v1012_v42 = vmul.f32 %v4390_v37, %v5887_v56  ;;  %v1022_v32 = vmul.f32 %v4390_v37, %v5888_v3  ;;  %v777_v59 = vmul.f32 %v5860_v49, %v5889_v21  ;;  %v5892_v20 = vld [vmem:[#allocation117_spill] sm:$0xff]  ;;  %v5893_v56 = vld [vmem:[#allocation95_spill] sm:$0xff]  ;;  %v5894_v3 = vld [vmem:[#allocation96_spill] sm:$0xff] }
 0x181   : > { %v4412_v47 = vsub.f32 %v506_v24, %v4364_v40  ;;  %v872_v1 = vadd.f32 %v868_v29, %v851_v4  ;;  %v882_v6 = vadd.f32 %v878_v7, %v862_v61  ;;  %v1086_v43 = vadd.f32 %v5891_v39, %v1081_v22  ;;  %v5895_v49 = vld [vmem:[#allocation103_spill] sm:$0xff]  ;;  %v5896_v4 = vld [vmem:[#allocation104_spill] sm:$0xff] }
 0x182   : > { %v936_v17 = vadd.f32 %v932_v34, %v915_v15  ;;  %v946_v27 = vadd.f32 %v942_v2, %v926_v16  ;;  %v1016_v30 = vadd.f32 %v1012_v42, %v995_v55  ;;  %v1092_v57 = vmul.f32 %v4390_v37, %v5892_v20  ;;  %v5897_v22 = vld [vmem:[#allocation111_spill] sm:$0xff]  ;;  %v5898_v2 = vld [vmem:[#allocation112_spill] sm:$0xff]  ;;  %v5899_v55 = vld [vmem:[#allocation118_spill] sm:$0xff] }
 0x183   : > { %5890 = vst [vmem:[#allocation45_spill] sm:$0xff] %v4412_v47  ;;  %v888_v19 = vmul.f32 %v5893_v56, %v4412_v47  ;;  %v898_v60 = vmul.f32 %v5894_v3, %v4412_v47  ;;  %v952_v24 = vmul.f32 %v5895_v49, %v4412_v47  ;;  %v962_v61 = vmul.f32 %v5896_v4, %v4412_v47  ;;  %v5900_v39 = vld [vmem:[#allocation44_spill] sm:$0xff] }
 0x184   : > { %v1026_v29 = vadd.f32 %v1022_v32, %v1006_v52  ;;  %v1032_v16 = vmul.f32 %v5897_v22, %v4412_v47  ;;  %v1042_v15 = vmul.f32 %v5898_v2, %v4412_v47  ;;  %v1102_v7 = vmul.f32 %v4390_v37, %v5899_v55  ;;  %v5901_v2 = vld [vmem:[#allocation121_spill] sm:$0xff] }
 0x185   : > { %v892_v34 = vadd.f32 %v888_v19, %v872_v1  ;;  %v956_v42 = vadd.f32 %v952_v24, %v936_v17  ;;  %v966_v40 = vadd.f32 %v962_v61, %v946_v27  ;;  %v1096_v3 = vadd.f32 %v1092_v57, %v1075_v51 }
 0x186   : > { %v902_v56 = vadd.f32 %v898_v60, %v882_v6  ;;  %v1036_v20 = vadd.f32 %v1032_v16, %v1016_v30  ;;  %v1046_v49 = vadd.f32 %v1042_v15, %v1026_v29  ;;  %v1112_v4 = vmul.f32 %v5900_v39, %v4412_v47  ;;  %v449_v30 = vpop.permute.xlu1 %448 }
 0x187   : > { %v970_v52 = vmul.f32 %v956_v42, %v5846_v54  ;;  %v974_v32 = vmul.f32 %v966_v40, %v5846_v54  ;;  %v1106_v22 = vadd.f32 %v1102_v7, %v1086_v43  ;;  %v1122_v21 = vmul.f32 %v5901_v2, %v4412_v47  ;;  %v5902_v43 = vld [vmem:[#allocation87_spill] sm:$0xff]  ;;  %v5903_v40 = vld [vmem:[#allocation88_spill] sm:$0xff]  ;;  %v5910_v42 = vld [vmem:[#allocation65_spill] sm:$0xff] }
 0x188   : > { %v1050_v37 = vmul.f32 %v5847_v44, %v1036_v20  ;;  %v1054_v19 = vmul.f32 %v5847_v44, %v1046_v49  ;;  %v1116_v27 = vadd.f32 %v1112_v4, %v1096_v3  ;;  %v729_v60 = vmul.f32 %v5882_v62, %v721_v10  ;;  %v5904_v49 = vld [vmem:[#allocation41_spill] sm:$0xff]  ;;  %v5905_v10 = vld [vmem:[#allocation31_spill] sm:$0xff] }
 0x189   : > { %v978_v57 = vadd.f32 %v970_v52, %v892_v34  ;;  %v982_v51 = vadd.f32 %v974_v32, %v902_v56  ;;  %v1126_v17 = vadd.f32 %v1122_v21, %v1106_v22  ;;  %v733_v1 = vadd.f32 %v725_v36, %v653_v41  ;;  %v5906_v22 = vld [vmem:[#allocation48_spill] sm:$0xff]  ;;  %v5908_v7 = vld [vmem:[#allocation123_spill] sm:$0xff] }
 0x18a   : > { %v1130_v6 = vmul.f32 %v1116_v27, %v5858_v50  ;;  %v781_v24 = vadd.f32 %v777_v59, %v761_v9  ;;  %v787_v54 = vmul.f32 %v5902_v43, %v5862_v25  ;;  %v797_v61 = vmul.f32 %v5903_v40, %v5862_v25 }
 0x18b   : > { %v1058_v20 = vadd.f32 %v1050_v37, %v978_v57  ;;  %v1062_v29 = vadd.f32 %v1054_v19, %v982_v51  ;;  %v1134_v44 = vmul.f32 %v1126_v17, %v5858_v50  ;;  %v453_v3 = vsel %vm413_vm9, %v5904_v49, %v449_v30  ;;  %v5907_v37 = vld [vmem:[#allocation53_spill] sm:$0xff]  ;;  %v5912_v51 = vld [vmem:[#allocation42_spill] sm:$0xff] }
 0x18c   : > { %v737_v56 = vadd.f32 %v729_v60, %v657_v5  ;;  %v791_v21 = vadd.f32 %v787_v54, %v771_v11  ;;  %v801_v41 = vadd.f32 %v797_v61, %v781_v24  ;;  %v461_v36 = vmul.f32 %v453_v3, %v453_v3  ;;  %v5909_v5 = vld [vmem:[#allocation51_spill] sm:$0xff] }
 0x18d   : > { %v826_v9 = vsub.f32 %v4315_v28, %v4320_v35  ;;  %v1138_v59 = vadd.f32 %v1130_v6, %v1058_v20  ;;  %v1142_v4 = vadd.f32 %v1134_v44, %v1062_v29  ;;  %v1498_v16 = vmul.f32 %v5906_v22, %v4261_v46  ;;  %v5911_v28 = vld [vmem:[#allocation71_spill] sm:$0xff]  ;;  %v5913_v6 = vld [vmem:[#allocation50_spill] sm:$0xff] }
 0x18e   : > { %v805_v15 = vmul.f32 %v791_v21, %v5907_v37  ;;  %v809_v50 = vmul.f32 %v801_v41, %v5907_v37  ;;  %v4456_v34 = vadd.f32 %v461_v36, %v5908_v7  ;;  %v4459_v11 = vmul.f32 %v5909_v5, %v453_v3  ;;  %v2312_v54 = vld [vmem:[%s2712_s21 + $0x20] sm:$0xff] }
 0x18f   : > { %v1146_v52 = vmul.f32 %v1138_v59, %v5910_v42  ;;  %v1150_v35 = vmul.f32 %v1142_v4, %v5911_v28  ;;  %v1158_v32 = vmul.f32 %v1142_v4, %v5910_v42  ;;  %v1162_v46 = vmul.f32 %v1138_v59, %v5911_v28  ;;  %v2313_v20 = vld [vmem:[%s5794_s26 + $0x20] sm:$0xff]  ;;  %v5917_v4 = vld [vmem:[#allocation52_spill] sm:$0xff]  ;;  %v5919_v42 = vld [vmem:[#allocation125_spill] sm:$0xff] }
 0x190   : > { %v838_v19 = vadd.f32 %v4324_v63, %v4322_v12  ;;  %v813_v27 = vadd.f32 %v805_v15, %v733_v1  ;;  %v817_v60 = vadd.f32 %v809_v50, %v737_v56  ;;  %2304 = vrsqrt.f32 %v4456_v34  ;;  %v5914_v12 = vld [vmem:[#allocation127_spill] sm:$0xff]  ;;  %v5915_v1 = vld [vmem:[#allocation128_spill] sm:$0xff] }
 0x191   : > { %v1154_v30 = vsub.f32 %v1146_v52, %v1150_v35  ;;  %v1166_v57 = vadd.f32 %v1162_v46, %v1158_v32  ;;  %v1501_v17 = vmul.f32 %v5912_v51, %v453_v3  ;;  %v520_v24 = vmul.f32 %v5758_v48, %v5913_v6  ;;  %v5916_v3 = vld [vmem:[#allocation47_spill] sm:$0xff]  ;;  %v5918_v15 = vld [vmem:[#allocation56_spill] sm:$0xff] }
 0x192   : > { %v4472_v61 = vmul.f32 %v2312_v54, %v813_v27  ;;  %v4475_v29 = vmul.f32 %v2313_v20, %v817_v60  ;;  %v833_v44 = vmul.f32 %v2312_v54, %v817_v60  ;;  %v837_v49 = vmul.f32 %v2313_v20, %v813_v27  ;;  %v5926_v54 = vld [vmem:[#allocation74_spill] sm:$0xff] }
 0x193   : > { %v4480_v56 = vadd.f32 %v1498_v16, %v5915_v1  ;;  %v492_v21 = vand.u32 2147483648, %v4456_v34  ;;  %v4485_v48 = vadd.f32 %v1154_v30, %v826_v9  ;;  %v4487_v36 = vadd.f32 %v1166_v57, %v838_v19  ;;  %v5947_v16 = vld [vmem:[#allocation106_spill] sm:$0xff] }
 0x194   : > { %vm489_vm6 = vcmp.eq.f32.partialorder %v4456_v34, inf  ;;  %v531_v59 = vmul.f32 %v5759_v18, %v5913_v6  ;;  %v542_v22 = vmul.f32 %v5917_v4, %v5762_v58  ;;  %vm491_vm7 = vcmp.eq.f32.partialorder %v4456_v34, 0.0 }
 0x195   : > { %v4498_v50 = vadd.f32 %v1501_v17, %v5918_v15  ;;  %v525_v9 = vadd.f32 %v5761_v45, %v520_v24  ;;  %v552_v7 = vmul.f32 %v5917_v4, %v5764_v8  ;;  %v4503_v5 = vadd.f32 %v837_v49, %v833_v44  ;;  %v5925_v24 = vld [vmem:[#allocation73_spill] sm:$0xff] }
 0x196   : > { %v536_v18 = vadd.f32 %v5763_v33, %v531_v59  ;;  %v562_v58 = vmul.f32 %v3460_v13, %v5919_v42  ;;  %v584_v52 = vmul.f32 %v3474_v23, %v5913_v6  ;;  %v572_v28 = vmul.f32 %v3471_v0, %v5919_v42  ;;  %v5920_v13 = vld [vmem:[#allocation63_spill] sm:$0xff]  ;;  %v5921_v23 = vld [vmem:[#allocation62_spill] sm:$0xff] }
 0x197   : > { %v595_v35 = vmul.f32 %v3513_v14, %v5913_v6  ;;  %v606_v45 = vmul.f32 %v5917_v4, %v3523_v26  ;;  %v616_v8 = vmul.f32 %v5917_v4, %v3526_v38  ;;  %v546_v32 = vadd.f32 %v542_v22, %v525_v9  ;;  %v5922_v0 = vld [vmem:[#allocation66_spill] sm:$0xff]  ;;  %v5923_v14 = vld [vmem:[#allocation67_spill] sm:$0xff]  ;;  %v5924_v26 = vld [vmem:[#allocation69_spill] sm:$0xff] }
 0x198   : > { %v556_v33 = vadd.f32 %v552_v7, %v536_v18  ;;  %v589_v46 = vadd.f32 %v5768_v53, %v584_v52  ;;  %v626_v19 = vmul.f32 %v5920_v13, %v5919_v42  ;;  %v636_v60 = vmul.f32 %v5922_v0, %v5919_v42  ;;  %v5927_v59 = vld [vmem:[#allocation75_spill] sm:$0xff]  ;;  %v5928_v9 = vld [vmem:[#allocation68_spill] sm:$0xff] }
 0x199   : > { %v600_v27 = vadd.f32 %v5921_v23, %v595_v35  ;;  %v664_v30 = vmul.f32 %v5923_v14, %v5913_v6  ;;  %v675_v57 = vmul.f32 %v5924_v26, %v5913_v6  ;;  %v566_v38 = vadd.f32 %v562_v58, %v546_v32  ;;  %v5929_v18 = vld [vmem:[#allocation72_spill] sm:$0xff]  ;;  %v5936_v26 = vld [vmem:[#allocation91_spill] sm:$0xff] }
 0x19a   : > { %v2305_v51 = vpop.eup %2304  ;;  %v610_v17 = vadd.f32 %v606_v45, %v589_v46  ;;  %v686_v53 = vmul.f32 %v5917_v4, %v5925_v24  ;;  %v696_v20 = vmul.f32 %v5917_v4, %v5926_v54  ;;  %v4533_v49 = vadd.f32 %v572_v28, %v556_v33  ;;  %v5930_v52 = vld [vmem:[#allocation76_spill] sm:$0xff]  ;;  %v5931_v28 = vld [vmem:[#allocation77_spill] sm:$0xff]  ;;  %v5938_v24 = vld [vmem:[#allocation99_spill] sm:$0xff] }
 0x19b   : > { %v488_v44 = vmul.f32 %v2305_v51, %v4456_v34  ;;  %v620_v1 = vadd.f32 %v616_v8, %v600_v27  ;;  %v706_v22 = vmul.f32 %v5927_v59, %v5919_v42  ;;  %v669_v7 = vadd.f32 %v5928_v9, %v664_v30  ;;  %v5932_v8 = vld [vmem:[#allocation83_spill] sm:$0xff]  ;;  %v5935_v30 = vld [vmem:[#allocation89_spill] sm:$0xff] }
 0x19c   : > { %v630_v15 = vadd.f32 %v626_v19, %v610_v17  ;;  %v680_v58 = vadd.f32 %v5929_v18, %v675_v57  ;;  %v716_v35 = vmul.f32 %v5930_v52, %v5919_v42  ;;  %v744_v33 = vmul.f32 %v5931_v28, %v5913_v6  ;;  %v5934_v19 = vld [vmem:[#allocation32_spill] sm:$0xff]  ;;  %v5937_v51 = vld [vmem:[#allocation97_spill] sm:$0xff] }
 0x19d   : > { %v490_v45 = vsel %vm489_vm6, %v4456_v34, %v488_v44  ;;  %v640_v32 = vadd.f32 %v636_v60, %v620_v1  ;;  %v4548_v46 = vmul.f32 %v5932_v8, %v5913_v6  ;;  %v690_v27 = vadd.f32 %v686_v53, %v669_v7  ;;  %v5940_v53 = vld [vmem:[#allocation107_spill] sm:$0xff]  ;;  %v5941_v44 = vld [vmem:[#allocation113_spill] sm:$0xff]  ;;  %v5943_v7 = vld [vmem:[#allocation92_spill] sm:$0xff] }
 0x19e   : > { %v4552_v13 = vsel %vm491_vm7, %v492_v21, %v490_v45  ;;  %v644_v23 = vmul.f32 %v630_v15, %v5934_v19  ;;  %v700_v0 = vadd.f32 %v696_v20, %v680_v58  ;;  %v5939_v21 = vld [vmem:[#allocation105_spill] sm:$0xff]  ;;  %v5942_v15 = vld [vmem:[#allocation90_spill] sm:$0xff]  ;;  %v5946_v8 = vld [vmem:[#allocation100_spill] sm:$0xff]  ;;  %vm1818_vm10 = vcmp.ge.s32.totalorder %v5905_v10, 3 }
 0x19f   : > { %5933 = vst [vmem:[#allocation126_spill] sm:$0xff] %v4552_v13  ;;  %v497_v14 = vmul.f32 2.0, %v4552_v13  ;;  %v849_v60 = vmul.f32 %v5935_v30, %v4552_v13  ;;  %v860_v57 = vmul.f32 %v5936_v26, %v4552_v13  ;;  %v913_v17 = vmul.f32 %v5937_v51, %v4552_v13  ;;  %v5944_v58 = vld [vmem:[#allocation78_spill] sm:$0xff]  ;;  %v5948_v6 = vld [vmem:[#allocation108_spill] sm:$0xff] }
 0x1a0   : > { %v924_v34 = vmul.f32 %v5938_v24, %v4552_v13  ;;  %v993_v54 = vmul.f32 %v5939_v21, %v4552_v13  ;;  %v1004_v20 = vmul.f32 %v5940_v53, %v4552_v13  ;;  %v1073_v1 = vmul.f32 %v5941_v44, %v4552_v13  ;;  %v5945_v45 = vld [vmem:[#allocation98_spill] sm:$0xff]  ;;  %v5951_v21 = vld [vmem:[#allocation115_spill] sm:$0xff] }
 0x1a1   : > { %v501_v59 = vmul.f32 %v497_v14, %v4552_v13  ;;  %v854_v9 = vadd.f32 %v5942_v15, %v849_v60  ;;  %v865_v18 = vadd.f32 %v5943_v7, %v860_v57  ;;  %v4574_v52 = vadd.f32 %v5944_v58, %v744_v33  ;;  %v5950_v44 = vld [vmem:[#allocation114_spill] sm:$0xff]  ;;  %v5952_v15 = vld [vmem:[#allocation85_spill] sm:$0xff] }
 0x1a2   : > { %v918_v28 = vadd.f32 %v5945_v45, %v913_v17  ;;  %v929_v41 = vadd.f32 %v5946_v8, %v924_v34  ;;  %v998_v63 = vadd.f32 %v5947_v16, %v993_v54  ;;  %v1009_v25 = vadd.f32 %v5948_v6, %v1004_v20  ;;  %v5953_v54 = vld [vmem:[#allocation93_spill] sm:$0xff] }
 0x1a3   : > { %v4580_v47 = vadd.f32 -1.0, %v501_v59  ;;  %v1078_v53 = vadd.f32 %v5950_v44, %v1073_v1  ;;  %v1084_v60 = vmul.f32 %v5951_v21, %v4552_v13  ;;  %v648_v57 = vmul.f32 %v640_v32, %v5934_v19  ;;  %v5954_v59 = vld [vmem:[#allocation94_spill] sm:$0xff]  ;;  %v5955_v1 = vld [vmem:[#allocation101_spill] sm:$0xff] }
 0x1a4   : > { %v652_v7 = vadd.f32 %v644_v23, %v566_v38  ;;  %v710_v33 = vadd.f32 %v706_v22, %v690_v27  ;;  %v720_v58 = vadd.f32 %v716_v35, %v700_v0  ;;  %v766_v17 = vmul.f32 %v5917_v4, %v5952_v15  ;;  %v5956_v21 = vld [vmem:[#allocation102_spill] sm:$0xff]  ;;  %v5957_v38 = vld [vmem:[#allocation109_spill] sm:$0xff] }
 0x1a5   : > { %5949 = vst [vmem:[#allocation40_spill] sm:$0xff] %v4580_v47  ;;  %v509_v34 = vmul.f32 %v4580_v47, %v497_v14  ;;  %v871_v20 = vmul.f32 %v4580_v47, %v5953_v54  ;;  %v881_v6 = vmul.f32 %v4580_v47, %v5954_v59  ;;  %v935_v44 = vmul.f32 %v4580_v47, %v5955_v1  ;;  %v5958_v35 = vld [vmem:[#allocation110_spill] sm:$0xff]  ;;  %v5961_v59 = vld [vmem:[#allocation116_spill] sm:$0xff] }
 0x1a6   : > { %v945_v32 = vmul.f32 %v4580_v47, %v5956_v21  ;;  %v1015_v22 = vmul.f32 %v4580_v47, %v5957_v38  ;;  %v1025_v23 = vmul.f32 %v4580_v47, %v5958_v35  ;;  %v5959_v27 = vld [vmem:[#allocation86_spill] sm:$0xff]  ;;  %v1089_v54 = vadd.f32 %v5961_v59, %v1084_v60  ;;  %v5962_v21 = vld [vmem:[#allocation117_spill] sm:$0xff]  ;;  %v5963_v38 = vld [vmem:[#allocation95_spill] sm:$0xff] }
 0x1a7   : > { %v776_v0 = vmul.f32 %v5917_v4, %v5959_v27  ;;  %v4604_v14 = vsub.f32 %v509_v34, %v4552_v13  ;;  %v875_v15 = vadd.f32 %v871_v20, %v854_v9  ;;  %v885_v19 = vadd.f32 %v881_v6, %v865_v18  ;;  %v5964_v35 = vld [vmem:[#allocation96_spill] sm:$0xff]  ;;  %v5965_v27 = vld [vmem:[#allocation103_spill] sm:$0xff] }
 0x1a8   : > { %v939_v1 = vadd.f32 %v935_v44, %v918_v28  ;;  %v949_v16 = vadd.f32 %v945_v32, %v929_v41  ;;  %v1019_v8 = vadd.f32 %v1015_v22, %v998_v63  ;;  %v1095_v45 = vmul.f32 %v4580_v47, %v5962_v21  ;;  %v5966_v9 = vld [vmem:[#allocation104_spill] sm:$0xff]  ;;  %v5967_v44 = vld [vmem:[#allocation111_spill] sm:$0xff] }
 0x1a9   : > { %5960 = vst [vmem:[#allocation43_spill] sm:$0xff] %v4604_v14  ;;  %v891_v24 = vmul.f32 %v5963_v38, %v4604_v14  ;;  %v901_v51 = vmul.f32 %v5964_v35, %v4604_v14  ;;  %v955_v34 = vmul.f32 %v5965_v27, %v4604_v14  ;;  %v965_v6 = vmul.f32 %v5966_v9, %v4604_v14  ;;  %v5968_v63 = vld [vmem:[#allocation112_spill] sm:$0xff] }
 0x1aa   : > { %v1029_v18 = vadd.f32 %v1025_v23, %v1009_v25  ;;  %v1035_v41 = vmul.f32 %v5967_v44, %v4604_v14  ;;  %v1045_v28 = vmul.f32 %v5968_v63, %v4604_v14  ;;  %v1105_v60 = vmul.f32 %v4580_v47, %v5899_v55  ;;  %v5969_v25 = vld [vmem:[#allocation30_spill] sm:$0xff] }
 0x1ab   : > { %v895_v20 = vadd.f32 %v891_v24, %v875_v15  ;;  %v959_v32 = vadd.f32 %v955_v34, %v939_v1  ;;  %v969_v22 = vadd.f32 %v965_v6, %v949_v16  ;;  %v1099_v4 = vadd.f32 %v1095_v45, %v1078_v53  ;;  %v5970_v24 = vld [vmem:[#allocation57_spill] sm:$0xff]  ;;  %v447_v15 = vpop.permute.xlu0 %446 }
 0x1ac   : > { %v905_v13 = vadd.f32 %v901_v51, %v885_v19  ;;  %v1039_v35 = vadd.f32 %v1035_v41, %v1019_v8  ;;  %v1049_v27 = vadd.f32 %v1045_v28, %v1029_v18  ;;  %v1115_v9 = vmul.f32 %v5900_v39, %v4604_v14  ;;  %v5973_v18 = vld [vmem:[#allocation61_spill] sm:$0xff] }
 0x1ad   : > { %v973_v23 = vmul.f32 %v959_v32, %v5969_v25  ;;  %v977_v44 = vmul.f32 %v969_v22, %v5969_v25  ;;  %v1109_v63 = vadd.f32 %v1105_v60, %v1089_v54  ;;  %v1125_v47 = vmul.f32 %v5901_v2, %v4604_v14  ;;  %v5977_v60 = vld [vmem:[#allocation81_spill] sm:$0xff] }
 0x1ae   : > { %v1053_v16 = vmul.f32 %v5882_v62, %v1039_v35  ;;  %v1119_v19 = vadd.f32 %v1115_v9, %v1099_v4  ;;  %v656_v51 = vadd.f32 %v648_v57, %v4533_v49  ;;  %v724_v53 = vmul.f32 %v5970_v24, %v710_v33  ;;  %v5971_v33 = vld [vmem:[#allocation84_spill] sm:$0xff] }
 0x1af   : > { %v981_v45 = vadd.f32 %v973_v23, %v895_v20  ;;  %v985_v8 = vadd.f32 %v977_v44, %v905_v13  ;;  %v1057_v54 = vmul.f32 %v5882_v62, %v1049_v27  ;;  %v1129_v1 = vadd.f32 %v1125_v47, %v1109_v63  ;;  %v5975_v44 = vld [vmem:[#allocation59_spill] sm:$0xff] }
 0x1b0   : > { %v1133_v4 = vmul.f32 %v1119_v19, %v5907_v37  ;;  %v728_v49 = vmul.f32 %v5970_v24, %v720_v58  ;;  %v732_v57 = vadd.f32 %v724_v53, %v652_v7  ;;  %v760_v35 = vadd.f32 %v5971_v33, %v4548_v46  ;;  %v5972_v58 = vld [vmem:[#allocation33_spill] sm:$0xff]  ;;  %v5976_v63 = vld [vmem:[#allocation79_spill] sm:$0xff]  ;;  %v5981_v53 = vld [vmem:[#allocation124_spill] sm:$0xff] }
 0x1b1   : > { %v1061_v13 = vadd.f32 %v1053_v16, %v981_v45  ;;  %v1065_v62 = vadd.f32 %v1057_v54, %v985_v8  ;;  %v1137_v47 = vmul.f32 %v1129_v1, %v5907_v37  ;;  %v770_v27 = vadd.f32 %v766_v17, %v4574_v52  ;;  %v5980_v16 = vld [vmem:[#allocation60_spill] sm:$0xff]  ;;  %v6012_v33 = vld [vmem:[#allocation37_spill] sm:$0xff] }
 0x1b2   : > { %v780_v34 = vadd.f32 %v776_v0, %v760_v35  ;;  %v786_v7 = vmul.f32 %v5902_v43, %v5919_v42  ;;  %v796_v46 = vmul.f32 %v5903_v40, %v5919_v42  ;;  %v452_v9 = vsel %vm413_vm9, %v5972_v58, %v447_v15 }
 0x1b3   : > { %v1141_v37 = vadd.f32 %v1133_v4, %v1061_v13  ;;  %v1145_v52 = vadd.f32 %v1137_v47, %v1065_v62  ;;  %v736_v17 = vadd.f32 %v728_v49, %v656_v51  ;;  %v460_v6 = vmul.f32 %v452_v9, %v452_v9  ;;  %v2314_v13 = vld [vmem:[%s2712_s21 + $0x18] sm:$0xff]  ;;  %s4761_s21 = sld [smem:[#allocation4 + $0x3e]] }
 0x1b4   : > { %v790_v43 = vadd.f32 %v786_v7, %v770_v27  ;;  %v800_v0 = vadd.f32 %v796_v46, %v780_v34  ;;  %v4677_v40 = vmul.f32 %v5973_v18, %v452_v9  ;;  %v1500_v41 = vmul.f32 %v5975_v44, %v452_v9  ;;  %v2315_v47 = vld [vmem:[%s5794_s26 + $0x18] sm:$0xff]  ;;  %s4763_s26 = sld [smem:[#allocation3 + $0x3f]] }
 0x1b5   : > { %v1149_v28 = vmul.f32 %v1141_v37, %v5976_v63  ;;  %v1153_v20 = vmul.f32 %v1145_v52, %v5977_v60  ;;  %v1161_v32 = vmul.f32 %v1145_v52, %v5976_v63  ;;  %v1165_v22 = vmul.f32 %v1141_v37, %v5977_v60 }
 0x1b6   : > { %5974 = vst [vmem:[#allocation46_spill] sm:$0xff] %v4677_v40  ;;  %v5978_v25 = vsub.f32 %v5914_v12, %v4301_v31  ;;  %v804_v19 = vmul.f32 %v790_v43, %v5980_v16  ;;  %v808_v51 = vmul.f32 %v800_v0, %v5980_v16  ;;  %v4701_v45 = vadd.f32 %v460_v6, %v5981_v53 }
 0x1b7   : > { %v4709_v8 = vadd.f32 %v4480_v56, %v4487_v36  ;;  %v1157_v54 = vsub.f32 %v1149_v28, %v1153_v20  ;;  %v1169_v31 = vadd.f32 %v1165_v22, %v1161_v32  ;;  %v4712_v12 = vstv %s4625_s28  ;;  %s4776_s28 = sld [smem:[#allocation4 + $0x3f]] }
 0x1b8   : > { %v4696_v23 = vadd.f32 %v5978_v25, %v4485_v48  ;;  %5983 = vst [vmem:[#allocation121_spill] sm:$0xff] %v4712_v12  ;;  %v812_v48 = vadd.f32 %v804_v19, %v732_v57  ;;  %v816_v1 = vadd.f32 %v808_v51, %v736_v17  ;;  %2306 = vrsqrt.f32 %v4701_v45  ;;  %v5987_v57 = vld [vmem:[#allocation70_spill] sm:$0xff] }
 0x1b9   : > { %5982 = vst [vmem:[#allocation44_spill] sm:$0xff] %v4709_v8  ;;  %v4720_v15 = vstv %s4631_s19  ;;  %v5985_v56 = vsub.f32 %v4472_v61, %v4475_v29  ;;  %v1177_v4 = vadd.f32 %v1169_v31, %v4503_v5  ;;  %v4733_v35 = vadd.f32 %v1500_v41, %v5987_v57  ;;  %s6098_s19 = sld [smem:[#allocation25_spill]] }
 0x1ba   : > { %5979 = vst [vmem:[#allocation118_spill] sm:$0xff] %v4696_v23  ;;  %5984 = vst [vmem:[#allocation87_spill] sm:$0xff] %v4720_v15  ;;  %v4740_v62 = vmul.f32 %v2314_v13, %v812_v48  ;;  %v4743_v61 = vmul.f32 %v2315_v47, %v816_v1  ;;  %v832_v29 = vmul.f32 %v2314_v13, %v816_v1  ;;  %v485_v46 = vand.u32 2147483648, %v4701_v45 }
 0x1bb   : > { %v1173_v36 = vadd.f32 %v1157_v54, %v5985_v56  ;;  %5988 = vst [vmem:[#allocation88_spill] sm:$0xff] %v4733_v35  ;;  %v836_v5 = vmul.f32 %v2315_v47, %v812_v48  ;;  %v5991_v27 = vsub.f32 %v5916_v3, %v4459_v11  ;;  %v4755_v7 = vadd.f32 %v4498_v50, %v1177_v4  ;;  %v6010_v47 = vld [vmem:[#allocation119_spill] sm:$0xff] }
 0x1bc   : > { %5989 = vst [vmem:[#allocation41_spill] sm:$0xff] %v4740_v62  ;;  %5990 = vst [vmem:[#allocation31_spill] sm:$0xff] %v4743_v61  ;;  %v4759_v58 = vstv %s4638_s13  ;;  %vm482_vm8 = vcmp.eq.f32.partialorder %v4701_v45, inf  ;;  %v4771_v50 = vstv %s4633_s29  ;;  %v4774_v9 = vstv %s4657_s25  ;;  %v6013_v35 = vld [vmem:[#allocation35_spill] sm:$0xff]  ;;  %s6115_s13 = sld [smem:[#allocation18_spill]] }
 0x1bd   : > { %v4752_v34 = vadd.f32 %v5991_v27, %v1173_v36  ;;  %5993 = vst [vmem:[#allocation53_spill] sm:$0xff] %v4755_v7  ;;  %5994 = vst [vmem:[#allocation123_spill] sm:$0xff] %v4759_v58  ;;  %v4767_v3 = vadd.f32 %v836_v5, %v832_v29  ;;  %vm484_vm9 = vcmp.eq.f32.partialorder %v4701_v45, 0.0  ;;  %v4780_v37 = vstv %s4659_s9  ;;  %s6121_s9 = sld [smem:[#allocation131_spill]] }
 0x1be   : > { %5996 = vst [vmem:[#allocation65_spill] sm:$0xff] %v4771_v50  ;;  %5997 = vst [vmem:[#allocation71_spill] sm:$0xff] %v4774_v9  ;;  %v4783_v52 = vstv %s4688_s30  ;;  %v4786_v17 = vstv %s4690_s2  ;;  %v4789_v6 = vstv %s4640_s12  ;;  %v4792_v43 = vstv %s4643_s11 }
 0x1bf   : > { %5992 = vst [vmem:[#allocation48_spill] sm:$0xff] %v4752_v34  ;;  %5995 = vst [vmem:[#allocation51_spill] sm:$0xff] %v4767_v3  ;;  %v4795_v0 = vstv %s4651_s27  ;;  %v4798_v18 = vstv %s4645_s24  ;;  %v4801_v44 = vstv %s4703_s16  ;;  %v4804_v41 = vstv %s4705_s18  ;;  %s2042_s29 = sshll.u32 %s6098_s19, 6  ;;  %s6119_s24 = sld [smem:[#allocation22_spill]] }
 0x1c0   : > { %5998 = vst [vmem:[#allocation42_spill] sm:$0xff] %v4780_v37  ;;  %5999 = vst [vmem:[#allocation127_spill] sm:$0xff] %v4783_v52  ;;  %v4807_v63 = vstv %s4714_s1  ;;  %v4810_v28 = vstv %s4716_s7  ;;  %v4813_v60 = vstv %s4653_s14  ;;  %v4816_v20 = vstv %s4668_s8  ;;  %s225_s12 = scalar_lea.vmem [#allocation10], %s2042_s29 }
 0x1c1   : > { %6000 = vst [vmem:[#allocation128_spill] sm:$0xff] %v4786_v17  ;;  %6001 = vst [vmem:[#allocation47_spill] sm:$0xff] %v4789_v6  ;;  %v4819_v32 = vstv %s4672_s23  ;;  %v4822_v22 = vstv %s4670_s20  ;;  %v4825_v25 = vstv %s4722_s4  ;;  %v4828_v19 = vstv %s4724_s0  ;;  %s1916_s27 = sshll.u32 %s225_s12, 4  ;;  %s1900_s20 = scalar_lea.sflag [#allocation7], %s6098_s19  ;;  %s5305_s27 = int_to_ptr.vmem [resolvable:$true] %s1916_s27 }
 0x1c2   : > { %6002 = vst [vmem:[#allocation56_spill] sm:$0xff] %v4795_v0  ;;  %6003 = vst [vmem:[#allocation63_spill] sm:$0xff] %v4798_v18  ;;  %v4831_v51 = vstv %s4735_s17  ;;  %v4834_v53 = vstv %s4737_s3  ;;  %v4837_v54 = vstv %s4682_s10  ;;  %v2307_v31 = vpop.eup %2306  ;;  %v4840_v48 = vstv %s4674_s6  ;;  %s2202_s11 = sshll.u32 %s6115_s13, 10  ;;  %s2398_s23 = scalar_lea.vmem %s5305_s27, 1024 }
 0x1c3   : > { %6004 = vst [vmem:[#allocation62_spill] sm:$0xff] %v4804_v41  ;;  %6005 = vst [vmem:[#allocation66_spill] sm:$0xff] %v4807_v63  ;;  %v4843_v1 = vstv %s4745_s5  ;;  %v4846_v56 = vstv %s4680_s22  ;;  %v4849_v36 = vstv %s4747_s15  ;;  %v481_v4 = vmul.f32 %v2307_v31, %v4701_v45  ;;  %s5303_s8 = scalar_lea.hbm %s6121_s9, %s2202_s11  ;;  %p2399_p8 = scmp.ne.s32.totalorder %s5305_s27, %s2398_s23 }
 0x1c4   : > { %6006 = vst [vmem:[#allocation67_spill] sm:$0xff] %v4840_v48  ;;  %6007 = vst [vmem:[#allocation69_spill] sm:$0xff] %v4846_v56  ;;  %v4853_v57 = vstv %s4761_s21  ;;  %v4856_v13 = vstv %s4763_s26  ;;  %v1519_v29 = vmul.f32 %v4712_v12, %v6010_v47  ;;  %v4861_v5 = vstv %s4776_s28  ;;  %v6019_v12 = vld [vmem:[#allocation90_spill] sm:$0xff]  ;;  %v6024_v48 = vld [vmem:[#allocation108_spill] sm:$0xff]  ;;  %s2497_s6 = smov [#allocation10]  }
 0x1c5   : > { %6008 = vst [vmem:[#allocation73_spill] sm:$0xff] %v4853_v57  ;;  %6009 = vst [vmem:[#allocation74_spill] sm:$0xff] %v4856_v13  ;;  %v1530_v27 = vmul.f32 %v4759_v58, %v6010_v47  ;;  %v1541_v11 = vmul.f32 %v6012_v33, %v4774_v9  ;;  %v1551_v7 = vmul.f32 %v6012_v33, %v4780_v37  ;;  %v6018_v9 = vld [vmem:[#allocation113_spill] sm:$0xff]  ;;  %v6022_v13 = vld [vmem:[#allocation100_spill] sm:$0xff]  ;;  %p6123_p11 = scmp.ne.s32.totalorder %s6119_s24, 0  ;;  %s2402_s22 = sshll.u32 %s2497_s6, 4  ;;  %s2403_s22 = int_to_ptr.vmem [resolvable:$false] %s2402_s22 }
 0x1c6   : > { %6011 = vst [vmem:[#allocation75_spill] sm:$0xff] %v4861_v5  ;;  %v483_v31 = vsel %vm482_vm8, %v4701_v45, %v481_v4  ;;  %v1524_v34 = vadd.f32 %v4720_v15, %v1519_v29  ;;  %v4875_v8 = vmul.f32 %v4783_v52, %v6013_v35  ;;  %v4879_v23 = vmul.f32 %v4786_v17, %v6013_v35  ;;  %v6014_v45 = vld [vmem:[#allocation97_spill] sm:$0xff]  ;;  %v6017_v15 = vld [vmem:[#allocation107_spill] sm:$0xff]  ;;  %v6021_v5 = vld [vmem:[#allocation98_spill] sm:$0xff]  ;;  %s2404_s10 = scalar_lea.vmem %s2403_s22, 2048  ;;  %p2405_p1 = scmp.lt.s32.totalorder %s5305_s27, %s2403_s22 }
 0x1c7   : > { %v4883_v42 = vsel %vm484_vm9, %v485_v46, %v483_v31  ;;  %v1535_v14 = vadd.f32 %v4771_v50, %v1530_v27  ;;  %v1583_v37 = vmul.f32 %v4789_v6, %v6010_v47  ;;  %v1594_v4 = vmul.f32 %v4795_v0, %v6010_v47  ;;  %v6015_v31 = vld [vmem:[#allocation99_spill] sm:$0xff]  ;;  %v6016_v50 = vld [vmem:[#allocation105_spill] sm:$0xff]  ;;  %p2400_p6 = pnand %p2399_p8, %p6123_p11  ;;  %p2406_p4 = scmp.lt.s32.totalorder %s2404_s10, %s2398_s23 }
 0x1c8   : > { %v496_v29 = vmul.f32 2.0, %v4883_v42  ;;  %v848_v52 = vmul.f32 %v5935_v30, %v4883_v42  ;;  %v859_v17 = vmul.f32 %v5936_v26, %v4883_v42  ;;  %v912_v46 = vmul.f32 %v6014_v45, %v4883_v42  ;;  %v6020_v26 = vld [vmem:[#allocation92_spill] sm:$0xff]  ;;  %v6027_v57 = vld [vmem:[#allocation115_spill] sm:$0xff] }
 0x1c9   : > { %v923_v27 = vmul.f32 %v6015_v31, %v4883_v42  ;;  %v992_v6 = vmul.f32 %v6016_v50, %v4883_v42  ;;  %v1003_v0 = vmul.f32 %v6017_v15, %v4883_v42  ;;  %v1072_v58 = vmul.f32 %v6018_v9, %v4883_v42  ;;  %v6023_v50 = vld [vmem:[#allocation106_spill] sm:$0xff]  ;;  %p2401_p7 = pneg %p2400_p6  ;;  %p2407_p3 = por %p2406_p4, %p2405_p1 }
 0x1ca   : > { %v500_v30 = vmul.f32 %v496_v29, %v4883_v42  ;;  %v853_v40 = vadd.f32 %v6019_v12, %v848_v52  ;;  %v864_v49 = vadd.f32 %v6020_v26, %v859_v17  ;;  %v1605_v45 = vmul.f32 %v6012_v33, %v4801_v44  ;;  %v6026_v9 = vld [vmem:[#allocation114_spill] sm:$0xff] }
 0x1cb   : > { %v917_v31 = vadd.f32 %v6021_v5, %v912_v46  ;;  %v928_v56 = vadd.f32 %v6022_v13, %v923_v27  ;;  %v997_v3 = vadd.f32 %v6023_v50, %v992_v6  ;;  %v1008_v15 = vadd.f32 %v6024_v48, %v1003_v0  ;;  %v6028_v0 = vld [vmem:[#allocation93_spill] sm:$0xff]  ;;  %v6029_v46 = vld [vmem:[#allocation94_spill] sm:$0xff]  ;;  %p2408_p5 = pnand %p2407_p3, %p2401_p7 }
 0x1cc   : > { %v4914_v61 = vadd.f32 -1.0, %v500_v30  ;;  %v1077_v62 = vadd.f32 %v6026_v9, %v1072_v58  ;;  %v1083_v12 = vmul.f32 %v6027_v57, %v4883_v42  ;;  %v1545_v52 = vadd.f32 %v1541_v11, %v1524_v34  ;;  %v6030_v27 = vld [vmem:[#allocation101_spill] sm:$0xff]  ;;  %v6033_v57 = vld [vmem:[#allocation110_spill] sm:$0xff] }
 0x1cd   : > { %v4919_v17 = vadd.f32 %v1551_v7, %v1535_v14  ;;  %v1588_v26 = vadd.f32 %v4792_v43, %v1583_v37  ;;  %v1599_v5 = vadd.f32 %v4798_v18, %v1594_v4  ;;  %v1615_v13 = vmul.f32 %v6012_v33, %v4804_v41  ;;  %v6031_v14 = vld [vmem:[#allocation102_spill] sm:$0xff]  ;;  %v6032_v11 = vld [vmem:[#allocation109_spill] sm:$0xff] }
 0x1ce   : > { %6025 = vst [vmem:[#allocation68_spill] sm:$0xff] %v4914_v61  ;;  %v508_v6 = vmul.f32 %v4914_v61, %v496_v29  ;;  %v870_v48 = vmul.f32 %v4914_v61, %v6028_v0  ;;  %v880_v58 = vmul.f32 %v4914_v61, %v6029_v46  ;;  %v934_v34 = vmul.f32 %v4914_v61, %v6030_v27 }
 0x1cf   : > { %v944_v7 = vmul.f32 %v4914_v61, %v6031_v14  ;;  %v1014_v37 = vmul.f32 %v4914_v61, %v6032_v11  ;;  %v1024_v4 = vmul.f32 %v4914_v61, %v6033_v57  ;;  %v1625_v29 = vmul.f32 %v4807_v63, %v6013_v35  ;;  %v6035_v57 = vld [vmem:[#allocation96_spill] sm:$0xff]  ;;  %v6036_v63 = vld [vmem:[#allocation103_spill] sm:$0xff] }
 0x1d0   : > { %v4941_v30 = vsub.f32 %v508_v6, %v4883_v42  ;;  %v874_v50 = vadd.f32 %v870_v48, %v853_v40  ;;  %v884_v9 = vadd.f32 %v880_v58, %v864_v49  ;;  %v1088_v0 = vadd.f32 %v5961_v59, %v1083_v12  ;;  %v6037_v40 = vld [vmem:[#allocation104_spill] sm:$0xff]  ;;  %v6038_v59 = vld [vmem:[#allocation111_spill] sm:$0xff] }
 0x1d1   : > { %v938_v46 = vadd.f32 %v934_v34, %v917_v31  ;;  %v948_v27 = vadd.f32 %v944_v7, %v928_v56  ;;  %v1018_v41 = vadd.f32 %v1014_v37, %v997_v3  ;;  %v1094_v14 = vmul.f32 %v4914_v61, %v5962_v21  ;;  %v6039_v3 = vld [vmem:[#allocation112_spill] sm:$0xff] }
 0x1d2   : > { %6034 = vst [vmem:[#allocation72_spill] sm:$0xff] %v4941_v30  ;;  %v890_v11 = vmul.f32 %v5963_v38, %v4941_v30  ;;  %v900_v18 = vmul.f32 %v6035_v57, %v4941_v30  ;;  %v954_v6 = vmul.f32 %v6036_v63, %v4941_v30  ;;  %v964_v49 = vmul.f32 %v6037_v40, %v4941_v30 }
 0x1d3   : > { %v1028_v48 = vadd.f32 %v1024_v4, %v1008_v15  ;;  %v1034_v56 = vmul.f32 %v6038_v59, %v4941_v30  ;;  %v1044_v31 = vmul.f32 %v6039_v3, %v4941_v30  ;;  %v1104_v21 = vmul.f32 %v4914_v61, %v5899_v55  ;;  %v6040_v15 = vld [vmem:[#allocation32_spill] sm:$0xff] }
 0x1d4   : > { %v894_v38 = vadd.f32 %v890_v11, %v874_v50  ;;  %v958_v12 = vadd.f32 %v954_v6, %v938_v46  ;;  %v968_v58 = vadd.f32 %v964_v49, %v948_v27  ;;  %v1098_v34 = vadd.f32 %v1094_v14, %v1077_v62  ;;  %v1822_v27 = vpop.permute.xlu1 %1821 }
 0x1d5   : > { %v904_v7 = vadd.f32 %v900_v18, %v884_v9  ;;  %v1038_v37 = vadd.f32 %v1034_v56, %v1018_v41  ;;  %v1048_v63 = vadd.f32 %v1044_v31, %v1028_v48  ;;  %v1114_v57 = vmul.f32 %v5900_v39, %v4941_v30  ;;  %v6041_v56 = vld [vmem:[#allocation58_spill] sm:$0xff] }
 0x1d6   : > { %v972_v4 = vmul.f32 %v958_v12, %v6040_v15  ;;  %v976_v40 = vmul.f32 %v968_v58, %v6040_v15  ;;  %v1108_v59 = vadd.f32 %v1104_v21, %v1088_v0  ;;  %v1124_v3 = vmul.f32 %v5901_v2, %v4941_v30  ;;  %v6042_v58 = vld [vmem:[#allocation80_spill] sm:$0xff] }
 0x1d7   : > { %v1052_v55 = vmul.f32 %v5970_v24, %v1038_v37  ;;  %v1056_v50 = vmul.f32 %v5970_v24, %v1048_v63  ;;  %v1118_v46 = vadd.f32 %v1114_v57, %v1098_v34  ;;  %v1565_v62 = vadd.f32 %v4875_v8, %v1545_v52 }
 0x1d8   : > { %v980_v18 = vadd.f32 %v972_v4, %v894_v38  ;;  %v984_v41 = vadd.f32 %v976_v40, %v904_v7  ;;  %v1128_v9 = vadd.f32 %v1124_v3, %v1108_v59  ;;  %v1609_v39 = vadd.f32 %v1605_v45, %v1588_v26  ;;  %v6043_v7 = vld [vmem:[#allocation82_spill] sm:$0xff]  ;;  %v4992_v15 = vpop.permute.xlu1 %1825 }
 0x1d9   : > { %v1132_v14 = vmul.f32 %v1118_v46, %v5980_v16  ;;  %v1619_v11 = vadd.f32 %v1615_v13, %v1599_v5  ;;  %v1635_v0 = vmul.f32 %v4810_v28, %v6013_v35  ;;  %v1663_v2 = vmul.f32 %v4813_v60, %v6010_v47 }
 0x1da   : > { %v1060_v6 = vadd.f32 %v1052_v55, %v980_v18  ;;  %v1064_v49 = vadd.f32 %v1056_v50, %v984_v41  ;;  %v1136_v24 = vmul.f32 %v1128_v9, %v5980_v16  ;;  %v1629_v8 = vadd.f32 %v1625_v29, %v1609_v39  ;;  %v6044_v41 = vld [vmem:[#allocation27_spill] sm:$0xff] }
 0x1db   : > { %v1639_v52 = vadd.f32 %v1635_v0, %v1619_v11  ;;  %v1668_v48 = vadd.f32 %v4816_v20, %v1663_v2  ;;  %v1674_v45 = vmul.f32 %v4819_v32, %v6010_v47  ;;  %v1685_v26 = vmul.f32 %v6012_v33, %v4825_v25  ;;  %v6047_v11 = vld [vmem:[#allocation31_spill] sm:$0xff] }
 0x1dc   : > { %v1140_v5 = vadd.f32 %v1132_v14, %v1060_v6  ;;  %v1144_v13 = vadd.f32 %v1136_v24, %v1064_v49  ;;  %v1643_v31 = vmul.f32 %v1629_v8, %v6041_v56  ;;  %v1695_v21 = vmul.f32 %v6012_v33, %v4828_v19  ;;  %v6049_v24 = vld [vmem:[#allocation67_spill] sm:$0xff] }
 0x1dd   : > { %v1647_v16 = vmul.f32 %v1639_v52, %v6041_v56  ;;  %v1679_v29 = vadd.f32 %v4822_v22, %v1674_v45  ;;  %v1689_v38 = vadd.f32 %v1685_v26, %v1668_v48  ;;  %v1705_v12 = vmul.f32 %v4831_v51, %v6013_v35  ;;  %v6050_v52 = vld [vmem:[#allocation51_spill] sm:$0xff]  ;;  %v6052_v45 = vld [vmem:[#allocation69_spill] sm:$0xff] }
 0x1de   : > { %v1148_v34 = vmul.f32 %v1140_v5, %v6042_v58  ;;  %v1152_v37 = vmul.f32 %v1144_v13, %v6043_v7  ;;  %v1160_v63 = vmul.f32 %v1144_v13, %v6042_v58  ;;  %v1164_v57 = vmul.f32 %v1140_v5, %v6043_v7  ;;  %v6054_v13 = vld [vmem:[#allocation75_spill] sm:$0xff] }
 0x1df   : > { %v1575_v4 = vadd.f32 %v4879_v23, %v4919_v17  ;;  %v1651_v40 = vadd.f32 %v1643_v31, %v1565_v62  ;;  %v1699_v59 = vadd.f32 %v1695_v21, %v1679_v29  ;;  %v1709_v3 = vadd.f32 %v1705_v12, %v1689_v38  ;;  %v6045_v23 = vld [vmem:[#allocation73_spill] sm:$0xff]  ;;  %v6056_v31 = vld [vmem:[#allocation46_spill] sm:$0xff] }
 0x1e0   : > { %v1156_v55 = vsub.f32 %v1148_v34, %v1152_v37  ;;  %v1168_v50 = vadd.f32 %v1164_v57, %v1160_v63  ;;  %v1715_v46 = vmul.f32 %v4834_v53, %v6013_v35  ;;  %v1743_v18 = vmul.f32 %v4837_v54, %v6010_v47  ;;  %v6046_v62 = vld [vmem:[#allocation41_spill] sm:$0xff]  ;;  %v6059_v37 = vld [vmem:[#allocation120_spill] sm:$0xff] }
 0x1e1   : > { %v1723_v9 = vmul.f32 %v6044_v41, %v1709_v3  ;;  %v1754_v39 = vmul.f32 %v4843_v1, %v6010_v47  ;;  %v1765_v14 = vmul.f32 %v6012_v33, %v4849_v36  ;;  %v1775_v17 = vmul.f32 %v6012_v33, %v6045_v23  ;;  %v6053_v47 = vld [vmem:[#allocation74_spill] sm:$0xff]  ;;  %v6055_v33 = vld [vmem:[#allocation64_spill] sm:$0xff]  ;;  %v6060_v63 = vld [vmem:[#allocation121_spill] sm:$0xff] }
 0x1e2   : > { %v6048_v0 = vsub.f32 %v6046_v62, %v6047_v11  ;;  %v1655_v6 = vadd.f32 %v1647_v16, %v1575_v4  ;;  %v1719_v49 = vadd.f32 %v1715_v46, %v1699_v59  ;;  %v1748_v8 = vadd.f32 %v6049_v24, %v1743_v18  ;;  %v1830_v16 = vpop.permute.xlu1 %1829  ;;  %v6061_v4 = vld [vmem:[#allocation123_spill] sm:$0xff]  ;;  %v6064_v18 = vld [vmem:[#allocation42_spill] sm:$0xff]  ;;  %v6067_v62 = vld [vmem:[#allocation36_spill] sm:$0xff] }
 0x1e3   : > { %v5012_v48 = vadd.f32 %v1168_v50, %v6050_v52  ;;  %v1759_v26 = vadd.f32 %v6052_v45, %v1754_v39  ;;  %v1785_v5 = vmul.f32 %v6053_v47, %v6013_v35  ;;  %v1795_v56 = vmul.f32 %v6054_v13, %v6013_v35  ;;  %v6063_v50 = vld [vmem:[#allocation38_spill] sm:$0xff]  ;;  %v6065_v39 = vld [vmem:[#allocation87_spill] sm:$0xff] }
 0x1e4   : > { %v1172_v2 = vadd.f32 %v1156_v55, %v6048_v0  ;;  %v6057_v21 = vsub.f32 %v6055_v33, %v6056_v31  ;;  %v1727_v38 = vmul.f32 %v6044_v41, %v1719_v49  ;;  %v1731_v12 = vadd.f32 %v1723_v9, %v1651_v40  ;;  %v6062_v55 = vld [vmem:[#allocation71_spill] sm:$0xff]  ;;  %v1820_v40 = vpop.permute.xlu0 %1819 }
 0x1e5   : > { %6051 = vst [vmem:[#allocation76_spill] sm:$0xff] %v5012_v48  ;;  %v1769_v58 = vadd.f32 %v1765_v14, %v1748_v8  ;;  %v1779_v34 = vadd.f32 %v1775_v17, %v1759_v26  ;;  %v1836_v7 = vsel %vm1818_vm10, %v1822_v27, %v1830_v16  ;;  %v1518_v57 = vmul.f32 %v6060_v63, %v6059_v37  ;;  %v6066_v17 = vld [vmem:[#allocation65_spill] sm:$0xff]  ;;  %v6068_v11 = vld [vmem:[#allocation127_spill] sm:$0xff] }
 0x1e6   : > { %v5022_v29 = vadd.f32 %v6057_v21, %v1172_v2  ;;  %v1529_v35 = vmul.f32 %v6061_v4, %v6059_v37  ;;  %v1735_v59 = vadd.f32 %v1727_v38, %v1655_v6  ;;  %v1540_v46 = vmul.f32 %v6063_v50, %v6062_v55  ;;  %v6069_v2 = vld [vmem:[#allocation29_spill] sm:$0xff]  ;;  %v6070_v6 = vld [vmem:[#allocation128_spill] sm:$0xff]  ;;  %v6071_v52 = vld [vmem:[#allocation47_spill] sm:$0xff] }
 0x1e7   : > { %v1789_v3 = vadd.f32 %v1785_v5, %v1769_v58  ;;  %v1550_v41 = vmul.f32 %v6063_v50, %v6064_v18  ;;  %v1799_v9 = vadd.f32 %v1795_v56, %v1779_v34  ;;  %v1523_v14 = vadd.f32 %v6065_v39, %v1518_v57  ;;  %v6072_v5 = vld [vmem:[#allocation56_spill] sm:$0xff]  ;;  %v6074_v34 = vld [vmem:[#allocation63_spill] sm:$0xff] }
 0x1e8   : > { %6058 = vst [vmem:[#allocation77_spill] sm:$0xff] %v5022_v29  ;;  %v1534_v27 = vadd.f32 %v6066_v17, %v1529_v35  ;;  %v1560_v0 = vmul.f32 %v6068_v11, %v6067_v62  ;;  %v1570_v8 = vmul.f32 %v6070_v6, %v6067_v62  ;;  %v1582_v26 = vmul.f32 %v6071_v52, %v6059_v37  ;;  %v6075_v35 = vld [vmem:[#allocation62_spill] sm:$0xff] }
 0x1e9   : > { %v1803_v49 = vmul.f32 %v1789_v3, %v6069_v2  ;;  %v1593_v33 = vmul.f32 %v6072_v5, %v6059_v37  ;;  %v1807_v56 = vmul.f32 %v1799_v9, %v6069_v2  ;;  %v1544_v31 = vadd.f32 %v1540_v46, %v1523_v14  ;;  %v6077_v9 = vld [vmem:[#allocation66_spill] sm:$0xff]  ;;  %v5064_v2 = vpop.permute.xlu0 %1823 }
 0x1ea   : > { %v1554_v21 = vadd.f32 %v1550_v41, %v1534_v27  ;;  %v1604_v16 = vmul.f32 %v6063_v50, %v4801_v44  ;;  %v1587_v58 = vadd.f32 %v4792_v43, %v1582_v26  ;;  %v1614_v3 = vmul.f32 %v6063_v50, %v6075_v35  ;;  %6079 = vst [vmem:[#allocation78_spill] sm:$0xff] %v5064_v2  ;;  %v6093_v2 = vld [vmem:[#allocation40_spill] sm:$0xff] }
 0x1eb   : > { %v5049_v38 = vadd.f32 %v1803_v49, %v1731_v12  ;;  %v1598_v57 = vadd.f32 %v6074_v34, %v1593_v33  ;;  %v5055_v29 = vadd.f32 %v1807_v56, %v1735_v59  ;;  %v1564_v48 = vadd.f32 %v1560_v0, %v1544_v31 }
 0x1ec   : > { %v1574_v30 = vadd.f32 %v1570_v8, %v1554_v21  ;;  %v1624_v46 = vmul.f32 %v6077_v9, %v6067_v62  ;;  %v1608_v14 = vadd.f32 %v1604_v16, %v1587_v58  ;;  %v1634_v27 = vmul.f32 %v4810_v28, %v6067_v62 }
 0x1ed   : > { %6073 = vst [vmem:[#allocation83_spill] sm:$0xff] %v5049_v38  ;;  %6076 = vst [vmem:[#allocation89_spill] sm:$0xff] %v5055_v29  ;;  %v5060_v41 = vmul.f32 %v1836_v7, %v5049_v38  ;;  %v1618_v12 = vadd.f32 %v1614_v3, %v1598_v57  ;;  %v5067_v49 = vmul.f32 %v1836_v7, %v5055_v29  ;;  %v6081_v57 = vld [vmem:[#allocation55_spill] sm:$0xff] }
 0x1ee   : > { %v1662_v59 = vmul.f32 %v4813_v60, %v6059_v37  ;;  %v1673_v0 = vmul.f32 %v4819_v32, %v6059_v37  ;;  %v1684_v8 = vmul.f32 %v6063_v50, %v4825_v25  ;;  %v1628_v26 = vadd.f32 %v1624_v46, %v1608_v14 }
 0x1ef   : > { %6078 = vst [vmem:[#allocation91_spill] sm:$0xff] %v5060_v41  ;;  %6080 = vst [vmem:[#allocation85_spill] sm:$0xff] %v5067_v49  ;;  %v1638_v33 = vadd.f32 %v1634_v27, %v1618_v12  ;;  %v1694_v56 = vmul.f32 %v6063_v50, %v4828_v19  ;;  %v1704_v31 = vmul.f32 %v4831_v51, %v6067_v62 }
 0x1f0   : > { %v1667_v7 = vadd.f32 %v4816_v20, %v1662_v59  ;;  %v1678_v21 = vadd.f32 %v4822_v22, %v1673_v0  ;;  %v1714_v16 = vmul.f32 %v4834_v53, %v6067_v62  ;;  %v1742_v58 = vmul.f32 %v4837_v54, %v6059_v37 }
 0x1f1   : > { %v1642_v3 = vmul.f32 %v1628_v26, %v6081_v57  ;;  %v1646_v46 = vmul.f32 %v1638_v33, %v6081_v57  ;;  %v1753_v14 = vmul.f32 %v4843_v1, %v6059_v37  ;;  %v1764_v12 = vmul.f32 %v6063_v50, %v4849_v36 }
 0x1f2   : > { %v1688_v27 = vadd.f32 %v1684_v8, %v1667_v7  ;;  %v1698_v59 = vadd.f32 %v1694_v56, %v1678_v21  ;;  %v1747_v0 = vadd.f32 %v6049_v24, %v1742_v58  ;;  %v1774_v49 = vmul.f32 %v6063_v50, %v6045_v23  ;;  %v1828_v8 = vpop.permute.xlu0 %1827  ;;  %v6082_v21 = vld [vmem:[#allocation49_spill] sm:$0xff]  ;;  %v6083_v50 = vld [vmem:[#allocation122_spill] sm:$0xff] }
 0x1f3   : > { %v1650_v41 = vadd.f32 %v1642_v3, %v1564_v48  ;;  %v1654_v38 = vadd.f32 %v1646_v46, %v1574_v30  ;;  %v1758_v29 = vadd.f32 %v6052_v45, %v1753_v14  ;;  %v1784_v26 = vmul.f32 %v6053_v47, %v6067_v62  ;;  %v6084_v3 = vld [vmem:[#allocation39_spill] sm:$0xff] }
 0x1f4   : > { %v1708_v33 = vadd.f32 %v1704_v31, %v1688_v27  ;;  %v1718_v57 = vadd.f32 %v1714_v16, %v1698_v59  ;;  %v1768_v37 = vadd.f32 %v1764_v12, %v1747_v0  ;;  %v1794_v61 = vmul.f32 %v6054_v13, %v6067_v62  ;;  %v6085_v27 = vld [vmem:[#allocation45_spill] sm:$0xff]  ;;  %v6086_v0 = vld [vmem:[#allocation54_spill] sm:$0xff] }
 0x1f5   : > { %v1778_v56 = vadd.f32 %v1774_v49, %v1758_v29  ;;  %v1835_v7 = vsel %vm1818_vm10, %v1820_v40, %v1828_v8  ;;  %v1521_v48 = vmul.f32 %v6060_v63, %v6082_v21  ;;  %v1532_v30 = vmul.f32 %v6061_v4, %v6082_v21 }
 0x1f6   : > { %v1722_v58 = vmul.f32 %v6083_v50, %v1708_v33  ;;  %v1726_v31 = vmul.f32 %v6083_v50, %v1718_v57  ;;  %v1788_v16 = vadd.f32 %v1784_v26, %v1768_v37  ;;  %v1543_v46 = vmul.f32 %v6084_v3, %v6062_v55 }
 0x1f7   : > { %v1798_v62 = vadd.f32 %v1794_v61, %v1778_v56  ;;  %v1526_v29 = vadd.f32 %v6065_v39, %v1521_v48  ;;  %v1537_v49 = vadd.f32 %v6066_v17, %v1532_v30  ;;  %v1553_v40 = vmul.f32 %v6084_v3, %v6064_v18  ;;  %v1834_v48 = vpop.permute.xlu1 %1833 }
 0x1f8   : > { %v1730_v14 = vadd.f32 %v1722_v58, %v1650_v41  ;;  %v1734_v12 = vadd.f32 %v1726_v31, %v1654_v38  ;;  %v1802_v59 = vmul.f32 %v1788_v16, %v6085_v27  ;;  %v1563_v33 = vmul.f32 %v6068_v11, %v6086_v0 }
 0x1f9   : > { %v1806_v26 = vmul.f32 %v1798_v62, %v6085_v27  ;;  %v1547_v57 = vadd.f32 %v1543_v46, %v1526_v29  ;;  %v1557_v37 = vadd.f32 %v1553_v40, %v1537_v49  ;;  %v1573_v61 = vmul.f32 %v6070_v6, %v6086_v0 }
 0x1fa   : > { %v5119_v8 = vadd.f32 %v1802_v59, %v1730_v14  ;;  %v1585_v56 = vmul.f32 %v6071_v52, %v6082_v21  ;;  %v1596_v38 = vmul.f32 %v6072_v5, %v6082_v21  ;;  %v1607_v41 = vmul.f32 %v6084_v3, %v4801_v44 }
 0x1fb   : > { %v5127_v30 = vadd.f32 %v1806_v26, %v1734_v12  ;;  %v1567_v50 = vadd.f32 %v1563_v33, %v1547_v57  ;;  %v1577_v58 = vadd.f32 %v1573_v61, %v1557_v37  ;;  %v1617_v31 = vmul.f32 %v6084_v3, %v6075_v35 }
 0x1fc   : > { %6087 = vst [vmem:[#allocation86_spill] sm:$0xff] %v5119_v8  ;;  %v5132_v16 = vmul.f32 %v1835_v7, %v5119_v8  ;;  %v1590_v46 = vadd.f32 %v4792_v43, %v1585_v56  ;;  %v1601_v62 = vadd.f32 %v6074_v34, %v1596_v38  ;;  %v1627_v29 = vmul.f32 %v6077_v9, %v6086_v0 }
 0x1fd   : > { %6088 = vst [vmem:[#allocation116_spill] sm:$0xff] %v5127_v30  ;;  %v5139_v49 = vmul.f32 %v1835_v7, %v5127_v30  ;;  %v1637_v40 = vmul.f32 %v4810_v28, %v6086_v0  ;;  %v1665_v14 = vmul.f32 %v4813_v60, %v6082_v21  ;;  %v1676_v12 = vmul.f32 %v4819_v32, %v6082_v21 }
 0x1fe   : > { %6089 = vst [vmem:[#allocation117_spill] sm:$0xff] %v5132_v16  ;;  %v1611_v27 = vadd.f32 %v1607_v41, %v1590_v46  ;;  %v1621_v59 = vadd.f32 %v1617_v31, %v1601_v62  ;;  %v1687_v33 = vmul.f32 %v6084_v3, %v4825_v25  ;;  %v1697_v26 = vmul.f32 %v6084_v3, %v4828_v19  ;;  %v5161_v46 = vpop.permute.xlu0 %1831  ;;  %v5163_v62 = vpop.permute.xlu1 %1841 }
 0x1ff   : > { %6090 = vst [vmem:[#allocation95_spill] sm:$0xff] %v5139_v49  ;;  %v1670_v7 = vadd.f32 %v4816_v20, %v1665_v14  ;;  %v1681_v57 = vadd.f32 %v4822_v22, %v1676_v12  ;;  %v1707_v37 = vmul.f32 %v4831_v51, %v6086_v0  ;;  %v1717_v61 = vmul.f32 %v4834_v53, %v6086_v0 }
 0x200   : > { %v1631_v56 = vadd.f32 %v1627_v29, %v1611_v27  ;;  %v1641_v38 = vadd.f32 %v1637_v40, %v1621_v59  ;;  %v1745_v41 = vmul.f32 %v4837_v54, %v6082_v21  ;;  %v1756_v31 = vmul.f32 %v4843_v1, %v6082_v21  ;;  %6091 = vst [vmem:[#allocation30_spill] sm:$0xff] %v5163_v62  ;;  %v6092_v29 = vld [vmem:[#allocation126_spill] sm:$0xff] }
 0x201   : > { %v1691_v14 = vadd.f32 %v1687_v33, %v1670_v7  ;;  %v1701_v12 = vadd.f32 %v1697_v26, %v1681_v57  ;;  %v1767_v49 = vmul.f32 %v6084_v3, %v4849_v36  ;;  %v1777_v16 = vmul.f32 %v6084_v3, %v6045_v23 }
 0x202   : > { %v1645_v40 = vmul.f32 %v1631_v56, %v6092_v29  ;;  %v1649_v27 = vmul.f32 %v1641_v38, %v6092_v29  ;;  %v1750_v59 = vadd.f32 %v6049_v24, %v1745_v41  ;;  %v1761_v21 = vadd.f32 %v6052_v45, %v1756_v31 }
 0x203   : > { %v1711_v8 = vadd.f32 %v1707_v37, %v1691_v14  ;;  %v1721_v30 = vadd.f32 %v1717_v61, %v1701_v12  ;;  %v1787_v33 = vmul.f32 %v6053_v47, %v6086_v0  ;;  %v1797_v26 = vmul.f32 %v6054_v13, %v6086_v0  ;;  %v6094_v37 = vld [vmem:[#allocation50_spill] sm:$0xff]  ;;  %v6097_v12 = vld [vmem:[#allocation125_spill] sm:$0xff] }
 0x204   : > { %v1653_v7 = vadd.f32 %v1645_v40, %v1567_v50  ;;  %v1657_v57 = vadd.f32 %v1649_v27, %v1577_v58  ;;  %v1771_v62 = vadd.f32 %v1767_v49, %v1750_v59  ;;  %v1781_v3 = vadd.f32 %v1777_v16, %v1761_v21  ;;  %v6095_v50 = vld [vmem:[#allocation52_spill] sm:$0xff]  ;;  %v5188_v16 = vpop.permute.xlu0 %1839 }
 0x205   : > { %v1725_v56 = vmul.f32 %v6093_v2, %v1711_v8  ;;  %v1729_v38 = vmul.f32 %v6093_v2, %v1721_v30  ;;  %v1838_v41 = vsel %vm1818_vm10, %v4992_v15, %v1834_v48  ;;  %v1520_v61 = vmul.f32 %v6060_v63, %v6094_v37  ;;  %v5190_v8 = vpop.permute.xlu1 %1845  ;;  %v6096_v63 = vld [vmem:[#allocation43_spill] sm:$0xff] }
 0x206   : > { %v1791_v31 = vadd.f32 %v1787_v33, %v1771_v62  ;;  %v1801_v14 = vadd.f32 %v1797_v26, %v1781_v3  ;;  %v1531_v0 = vmul.f32 %v6061_v4, %v6094_v37  ;;  %v1542_v58 = vmul.f32 %v6095_v50, %v6062_v55 }
 0x207   : > { %v1733_v2 = vadd.f32 %v1725_v56, %v1653_v7  ;;  %v1737_v30 = vadd.f32 %v1729_v38, %v1657_v57  ;;  %v1525_v49 = vadd.f32 %v6065_v39, %v1520_v61  ;;  %v1552_v15 = vmul.f32 %v6095_v50, %v6064_v18 }
 0x208   : > { %v1805_v48 = vmul.f32 %v1791_v31, %v6096_v63  ;;  %v1809_v62 = vmul.f32 %v1801_v14, %v6096_v63  ;;  %v1536_v4 = vadd.f32 %v6066_v17, %v1531_v0  ;;  %v1562_v55 = vmul.f32 %v6068_v11, %v6097_v12  ;;  %v5224_v3 = vpop.permute.xlu0 %1843 }
 0x209   : > { %v1546_v29 = vadd.f32 %v1542_v58, %v1525_v49  ;;  %v1572_v40 = vmul.f32 %v6070_v6, %v6097_v12  ;;  %v1584_v27 = vmul.f32 %v6071_v52, %v6094_v37  ;;  %v1595_v39 = vmul.f32 %v6072_v5, %v6094_v37 }
 0x20a   : > { %v5206_v18 = vadd.f32 %v1805_v48, %v1733_v2  ;;  %v5208_v59 = vadd.f32 %v1809_v62, %v1737_v30  ;;  %v1556_v21 = vadd.f32 %v1552_v15, %v1536_v4  ;;  %v1606_v17 = vmul.f32 %v6095_v50, %v4801_v44  ;;  %v1850_v44 = vpop.permute.xlu1 %1849 }
 0x20b   : > { %v1566_v33 = vadd.f32 %v1562_v55, %v1546_v29  ;;  %v1589_v11 = vadd.f32 %v4792_v43, %v1584_v27  ;;  %v1600_v26 = vadd.f32 %v6074_v34, %v1595_v39  ;;  %v1616_v6 = vmul.f32 %v6095_v50, %v6075_v35 }
 0x20c   : > { %v5217_v52 = vmul.f32 %v1838_v41, %v5206_v18  ;;  %v5220_v5 = vmul.f32 %v1838_v41, %v5208_v59  ;;  %v1576_v7 = vadd.f32 %v1572_v40, %v1556_v21  ;;  %v1626_v57 = vmul.f32 %v6077_v9, %v6097_v12  ;;  %v6103_v21 = vld [vmem:[#allocation83_spill] sm:$0xff] }
 0x20d   : > { %v1610_v56 = vadd.f32 %v1606_v17, %v1589_v11  ;;  %v1620_v43 = vadd.f32 %v1616_v6, %v1600_v26  ;;  %v1636_v34 = vmul.f32 %v4810_v28, %v6097_v12  ;;  %v1664_v35 = vmul.f32 %v4813_v60, %v6094_v37  ;;  %v6105_v26 = vld [vmem:[#allocation86_spill] sm:$0xff] }
 0x20e   : > { %v1675_v38 = vmul.f32 %v4819_v32, %v6094_v37  ;;  %v1686_v41 = vmul.f32 %v6095_v50, %v4825_v25  ;;  %v1696_v9 = vmul.f32 %v6095_v50, %v4828_v19  ;;  %v1706_v61 = vmul.f32 %v4831_v51, %v6097_v12 }
 0x20f   : > { %v1630_v31 = vadd.f32 %v1626_v57, %v1610_v56  ;;  %v1640_v14 = vadd.f32 %v1636_v34, %v1620_v43  ;;  %v1669_v0 = vadd.f32 %v4816_v20, %v1664_v35  ;;  %v1716_v28 = vmul.f32 %v4834_v53, %v6097_v12  ;;  %v6108_v43 = vld [vmem:[#allocation85_spill] sm:$0xff] }
 0x210   : > { %v1680_v60 = vadd.f32 %v4822_v22, %v1675_v38  ;;  %v1744_v32 = vmul.f32 %v4837_v54, %v6094_v37  ;;  %v1755_v25 = vmul.f32 %v4843_v1, %v6094_v37  ;;  %v1766_v19 = vmul.f32 %v6095_v50, %v4849_v36  ;;  %v1848_v1 = vpop.permute.xlu0 %1847  ;;  %v1854_v37 = vpop.permute.xlu1 %1853  ;;  %v6109_v35 = vld [vmem:[#allocation117_spill] sm:$0xff] }
 0x211   : > { %v1644_v51 = vmul.f32 %v1630_v31, %v4883_v42  ;;  %v1648_v58 = vmul.f32 %v1640_v14, %v4883_v42  ;;  %v1690_v2 = vadd.f32 %v1686_v41, %v1669_v0  ;;  %v1776_v20 = vmul.f32 %v6095_v50, %v6045_v23  ;;  %v6099_v50 = vld [vmem:[#allocation78_spill] sm:$0xff]  ;;  %v6110_v41 = vld [vmem:[#allocation95_spill] sm:$0xff] }
 0x212   : > { %v1700_v53 = vadd.f32 %v1696_v9, %v1680_v60  ;;  %v1749_v22 = vadd.f32 %v6049_v24, %v1744_v32  ;;  %v1760_v30 = vadd.f32 %v6052_v45, %v1755_v25  ;;  %v1786_v54 = vmul.f32 %v6053_v47, %v6097_v12  ;;  %v6100_v45 = vld [vmem:[#allocation68_spill] sm:$0xff]  ;;  %v6101_v47 = vld [vmem:[#allocation30_spill] sm:$0xff] }
 0x213   : > { %v1652_v36 = vadd.f32 %v1644_v51, %v1566_v33  ;;  %v1656_v49 = vadd.f32 %v1648_v58, %v1576_v7  ;;  %v1710_v15 = vadd.f32 %v1706_v61, %v1690_v2  ;;  %v1796_v42 = vmul.f32 %v6054_v13, %v6097_v12  ;;  %v6104_v33 = vld [vmem:[#allocation116_spill] sm:$0xff]  ;;  %v6112_v25 = vld [vmem:[#allocation34_spill] sm:$0xff] }
 0x214   : > { %v1720_v63 = vadd.f32 %v1716_v28, %v1700_v53  ;;  %v1770_v48 = vadd.f32 %v1766_v19, %v1749_v22  ;;  %v1780_v23 = vadd.f32 %v1776_v20, %v1760_v30  ;;  %v1837_v24 = vsel %vm1818_vm10, %v6099_v50, %v5161_v46  ;;  %v6102_v46 = vld [vmem:[#allocation89_spill] sm:$0xff]  ;;  %v1852_v31 = vpop.permute.xlu0 %1851  ;;  %v6111_v28 = vld [vmem:[#allocation28_spill] sm:$0xff]  ;;  %v6113_v51 = vld [vmem:[#allocation118_spill] sm:$0xff] }
 0x215   : > { %v1724_v62 = vmul.f32 %v6100_v45, %v1710_v15  ;;  %v1856_v4 = vsel %vm1818_vm10, %v6101_v47, %v1850_v44  ;;  %v1855_v55 = vsel %vm1818_vm10, %v5188_v16, %v1848_v1  ;;  %v1858_v13 = vsel %vm1818_vm10, %v5190_v8, %v1854_v37  ;;  %v6106_v16 = vld [vmem:[#allocation72_spill] sm:$0xff]  ;;  %v6107_v8 = vld [vmem:[#allocation91_spill] sm:$0xff] }
 0x216   : > { %v1728_v12 = vmul.f32 %v6100_v45, %v1720_v63  ;;  %v1790_v29 = vadd.f32 %v1786_v54, %v1770_v48  ;;  %v1800_v40 = vadd.f32 %v1796_v42, %v1780_v23  ;;  %v1864_v27 = vmul.f32 %v1856_v4, %v6102_v46  ;;  %v6114_v2 = vld [vmem:[#allocation44_spill] sm:$0xff]  ;;  %v6120_v42 = vld [vmem:[#allocation53_spill] sm:$0xff] }
 0x217   : > { %v1732_v39 = vadd.f32 %v1724_v62, %v1652_v36  ;;  %v1876_v17 = vmul.f32 %v1856_v4, %v6103_v21  ;;  %v1863_v11 = vmul.f32 %v1855_v55, %v6104_v33  ;;  %v1875_v6 = vmul.f32 %v1855_v55, %v6105_v26  ;;  %v6117_v1 = vld [vmem:[#allocation88_spill] sm:$0xff] }
 0x218   : > { %v1736_v7 = vadd.f32 %v1728_v12, %v1656_v49  ;;  %v1804_v57 = vmul.f32 %v1790_v29, %v6106_v16  ;;  %v1808_v44 = vmul.f32 %v1800_v40, %v6106_v16  ;;  %v1868_v56 = vsub.f32 %v6107_v8, %v1864_v27  ;;  %v6118_v36 = vld [vmem:[#allocation48_spill] sm:$0xff] }
 0x219   : > { %v1880_v34 = vadd.f32 %v1876_v17, %v6108_v43  ;;  %v1867_v38 = vsub.f32 %v6109_v35, %v1863_v11  ;;  %v1879_v9 = vadd.f32 %v1875_v6, %v6110_v41  ;;  %v1866_v61 = vmul.f32 %v1858_v13, %v5208_v59 }
 0x21a   : > { %v1812_v14 = vadd.f32 %v1804_v57, %v1732_v39  ;;  %v1816_v0 = vadd.f32 %v1808_v44, %v1736_v7  ;;  %v1884_v60 = vadd.f32 %v1868_v56, %v6111_v28  ;;  %v1878_v32 = vmul.f32 %v1858_v13, %v5206_v18  ;;  %v6116_v18 = vld [vmem:[#allocation76_spill] sm:$0xff] }
 0x21b   : > { %v1888_v19 = vadd.f32 %v1880_v34, %v6112_v25  ;;  %v1883_v58 = vadd.f32 %v1867_v38, %v6113_v51  ;;  %v1887_v20 = vadd.f32 %v1879_v9, %v6114_v2  ;;  %v1870_v53 = vsub.f32 %v5217_v52, %v1866_v61 }
 0x21c   : > { %v1861_v22 = vmul.f32 %v1837_v24, %v1812_v14  ;;  %v1873_v30 = vmul.f32 %v1837_v24, %v1816_v0  ;;  %1892 = vst [vmem:[%s225_s12 + $0x10] sm:$0xff] %v1884_v60  ;;  %v1882_v59 = vadd.f32 %v1878_v32, %v5220_v5  ;;  %v1857_v54 = vsel %vm1818_vm10, %v5224_v3, %v1852_v31  ;;  %v6122_v3 = vld [vmem:[#allocation77_spill] sm:$0xff] }
 0x21d   : > { %v1512_v37 = vadd.f32 %v6117_v1, %v6116_v18  ;;  %1896 = vst [vmem:[%s225_s12 + $0x18] sm:$0xff] %v1888_v19  ;;  %1891 = vst [vmem:[%s225_s12] sm:$0xff] %v1883_v58  ;;  %v1886_v49 = vadd.f32 %v1870_v53, %v6118_v36  ;;  %v1865_v52 = vmul.f32 %v1857_v54, %v1816_v0 }
 0x21e   : > { %1895 = vst [vmem:[%s225_s12 + $0x8] sm:$0xff] %v1887_v20  ;;  %v1877_v15 = vmul.f32 %v1857_v54, %v1812_v14  ;;  %v1890_v5 = vadd.f32 %v1882_v59, %v6120_v42 }
 0x21f   : > { %1894 = vst [vmem:[%s225_s12 + $0x30] sm:$0xff] %v1886_v49  ;;  %v1869_v63 = vsub.f32 %v1861_v22, %v1865_v52 }
 0x220   : > { %v1881_v10 = vadd.f32 %v1877_v15, %v1873_v30  ;;  %1898 = vst [vmem:[%s225_s12 + $0x38] sm:$0xff] %v1890_v5 }
 0x221   : > { %v1885_v48 = vadd.f32 %v1869_v63, %v6122_v3 }
 0x222   : > { %v1889_v23 = vadd.f32 %v1881_v10, %v1512_v37 }
 0x223   : > { %1893 = vst [vmem:[%s225_s12 + $0x20] sm:$0xff] %v1885_v48 }
 0x224   : > { %1897 = vst [vmem:[%s225_s12 + $0x28] sm:$0xff] %v1889_v23 }
 0x225   : > { %2411 = shalt.err (!%p2408_p5)
}
 0x226   : > { %s2412_s30 = scalar_lea.hbm %s5303_s8, 1024  ;;  %s2416_s18 = scalar_lea.hbm %s6121_s9, 2048 }
 0x227   : > { %p2413_p9 = scmp.ne.s32.totalorder %s5303_s8, %s2412_s30  ;;  %p2417_p12 = scmp.lt.u32.totalorder %s5303_s8, %s6121_s9 }
 0x228   : > { %p2418_p0 = scmp.lt.u32.totalorder %s2416_s18, %s2412_s30  ;;  %p2420_p8 = scmp.lt.u32.totalorder %s2412_s30, %s5303_s8 }
 0x229   : > { %p2414_p13 = pnand %p2413_p9, %p6123_p11 }
 0x22a   : > { %p2419_p2 = por %p2418_p0, %p2417_p12 }
 0x22b   : > { %p2415_p10 = pneg %p2414_p13 }
 0x22c   : > { %p2421_p6 = por %p2420_p8, %p2419_p2 }
 0x22e   : > { %p2422_p7 = pnand %p2421_p6, %p2415_p10 }
 0x230   : > { %2425 = shalt.err (!%p2422_p7)
}
 0x231   : > { %s2498_s4 = smov 256   ;;  %s2499_s0 = smov 16  }
 0x232   : > { %2212 = dma.vmem_to_hbm [thread:$0]  (%p6123_p11), %s5305_s27, 1024, %s5303_s8, %s1900_s20, %s2498_s4, %s2498_s4, %s2499_s0  }
 0x233 PF: > { %s6124_s17 = sld [smem:[#allocation15_spill]]  ;;  %s6125_s3 = sld [smem:[#allocation24_spill]] }
 0x234   : > { %s6126_s5 = sld [smem:[#allocation20_spill]] }
 0x239   : > { %s1931_s15 = sand.u32 1, %s6124_s17   ;;  %p6127_p1 = scmp.ne.s32.totalorder %s6125_s3, 0 }
 0x23a   : > { %p6128_p4 = scmp.ge.s32.totalorder %s6126_s5, 2  ;;  %s1932_s21 = scalar_lea.sflag [#allocation7], %s1931_s15 }
 0x23c   : > { %p2222_p3 = pnand %p6128_p4, %p6127_p1 }
 0x23e   : > { %2461 = dma.done.wait (!%p2222_p3), %s1932_s21, 1024  }
 0x23f   : > { %2463 = vsyncadd (!%p2222_p3), %s1932_s21, 4294966272  ;;  %s31_s7 = sadd.s32 1, %s6126_s5   ;;  %s6129_s0 = sld [smem:[#allocation16_spill]] }
 0x240   : > { %p28_p5 = scmp.ge.s32.totalorder %s31_s7, 4   ;;  %s6130_s1 = sld [smem:[#allocation17_spill]] }
 0x241   : > { %s6131_s30 = sld [smem:[#allocation23_spill]]  ;;  %s6132_s5 = sld [smem:[#allocation19_spill]] }
 0x242   : > { %s6133_s6 = sld [smem:[#allocation21_spill]]  ;;  %30 = sbr.rel (!%p28_p5) target bundleno = 31 (0x1f), region = 90 }
 0x249   :  { %1937 = vsyncpa [#allocation6], 1 }
 0x24a   :  { %1939 = vsyncpa [#allocation6 + $0x1], 1 }
 0x24b   :  { %1940 = vsyncpa [#allocation9], 1 }
 0x24c   :  { %1942 = vsyncpa [#allocation9 + $0x1], 1 }
 0x24d   :  { %1943 = vsyncpa [#allocation7], 1 }
 0x24e   :  { %1945 = vsyncpa [#allocation7 + $0x1], 1 }

</bundles_post_ra>
